<compile_context>
chip_gen: v7x
topology: tpu7x:2x2x1
jax: 0.10.0
libtpu: 0.0.40
codegen_flags: <defaults>
</compile_context>

<pallas_src>
import functools

import jax
import jax.numpy as jnp
from jax.experimental import pallas as pl
from jax.experimental.pallas import tpu as pltpu


def _round_up(x, m):
    return (x + m - 1) // m * m


# ----------------------------------------------------------------------------
# Pure-JAX reference convs (NCHW).  Used ONLY for one-time parameter prep
# (building the dense per-layer matrices) and the in-script correctness check.
# They are NOT part of the Pallas hot path.
# ----------------------------------------------------------------------------
def conv2d_ref(x, w, b, stride, pad):
    """x: (N,Cin,H,W), w: (Cout,Cin,kh,kw) [PyTorch Conv2d], b: (Cout,)."""
    N, Cin, H, W = x.shape
    Cout, _, kh, kw = w.shape
    xn = jnp.transpose(x, (0, 2, 3, 1))                      # NHWC
    xn = jnp.pad(xn, ((0, 0), (pad, pad), (pad, pad), (0, 0)))
    Ho = (H + 2 * pad - kh) // stride + 1
    Wo = (W + 2 * pad - kw) // stride + 1
    cols = []
    for di in range(kh):
        for dj in range(kw):
            cols.append(xn[:, di:di + stride * Ho:stride,
                           dj:dj + stride * Wo:stride, :])
    patches = jnp.concatenate(cols, axis=-1).reshape(N * Ho * Wo, kh * kw * Cin)
    wmat = jnp.transpose(w, (2, 3, 1, 0)).reshape(kh * kw * Cin, Cout)
    y = (patches @ wmat + b).reshape(N, Ho, Wo, Cout)
    return jnp.transpose(y, (0, 3, 1, 2))                    # NCHW


def conv_transpose2d_ref(x, w, b, stride, pad, output_pad):
    """x: (N,Cin,H,W), w: (Cin,Cout,kh,kw) [PyTorch ConvTranspose2d], b: (Cout,).

    Dilate by `stride`, pad with (k-1-pad) / (k-1-pad+output_pad), then run a
    stride-1 conv with the flipped / channel-swapped kernel (exact equivalent).
    """
    Cin, Cout, kh, kw = w.shape
    N, _, H, W = x.shape
    Hd, Wd = (H - 1) * stride + 1, (W - 1) * stride + 1
    xd = jnp.zeros((N, Cin, Hd, Wd), x.dtype).at[:, :, ::stride, ::stride].set(x)
    pt = kh - 1 - pad
    pb = kh - 1 - pad + output_pad
    xp = jnp.pad(xd, ((0, 0), (0, 0), (pt, pb), (pt, pb)))
    w_eq = jnp.transpose(jnp.flip(w, axis=(2, 3)), (1, 0, 2, 3))  # (Cout,Cin,kh,kw)
    return conv2d_ref(xp, w_eq, b, stride=1, pad=0)


# Fixed ConvAutoencoder architecture.
_LAYERS = (
    ("conv", "e0_w", "e0_b"),
    ("conv", "e1_w", "e1_b"),
    ("conv", "e2_w", "e2_b"),
    ("convT", "d0_w", "d0_b"),
    ("convT", "d1_w", "d1_b"),
    ("convT", "d2_w", "d2_b"),
)


def _apply_layer(kind, x, w, b):
    if kind == "conv":
        return conv2d_ref(x, w, b, stride=2, pad=1)
    return conv_transpose2d_ref(x, w, b, stride=2, pad=1, output_pad=1)


def reference_forward(x_nchw, params):
    """Layer-by-layer pure-JAX f32 forward (numerical reference only)."""
    h = x_nchw
    for idx, (kind, wk, bk) in enumerate(_LAYERS):
        h = _apply_layer(kind, h, params[wk], params[bk])
        if idx < len(_LAYERS) - 1:
            h = jnp.maximum(h, 0.0)
    return h


def prepare_dense_params(params, in_shape_chw=(1, 16, 16),
                         weight_dtype=jnp.bfloat16):
    """One-time prep (outside the hot path): lower each conv / conv-transpose
    layer to an exact dense matrix on NCHW row-major flattened features plus a
    broadcast bias row.  Weights in `weight_dtype` (bf16 recommended for the
    MXU), biases always f32.  Returns (mats, biases)."""
    shape = in_shape_chw
    mats, biases = [], []
    for kind, wk, bk in _LAYERS:
        w, b = params[wk], params[bk]
        C, H, W = shape
        f_in = C * H * W
        basis = jnp.eye(f_in, dtype=jnp.float32).reshape(f_in, C, H, W)
        t = _apply_layer(kind, basis, w, jnp.zeros_like(b)).reshape(f_in, -1)
        y0 = _apply_layer(kind, jnp.zeros((1, C, H, W), jnp.float32), w, b)
        shape = y0.shape[1:]
        mats.append(t.astype(weight_dtype))
        biases.append(y0.reshape(1, -1).astype(jnp.float32))
    return tuple(mats), tuple(biases)


def dense_reference_forward(x_nchw, mats, biases):
    """Pure-JAX matmul chain numerically matched to the Pallas kernel (same
    bf16/f32 casts and f32 accumulation).  Tight correctness reference."""
    cd = mats[0].dtype
    h = x_nchw.reshape(x_nchw.shape[0], -1).astype(jnp.float32).astype(cd)
    y = None
    for l, (m, b) in enumerate(zip(mats, biases)):
        y = jnp.dot(h, m, preferred_element_type=jnp.float32) + b
        if l < len(mats) - 1:
            h = jnp.maximum(y, 0.0).astype(cd)
    return y.reshape(x_nchw.shape)


# ----------------------------------------------------------------------------
# Fused Pallas kernel: the whole autoencoder as a VMEM-resident matmul chain.
# ----------------------------------------------------------------------------
def _fused_dense_ae_kernel(*refs, num_layers):
    x_ref = refs[0]
    w_refs = refs[1:1 + num_layers]
    b_refs = refs[1 + num_layers:1 + 2 * num_layers]
    o_ref = refs[1 + 2 * num_layers]
    act_ref = refs[2 + 2 * num_layers]          # VMEM scratch (compute dtype)

    compute_dtype = w_refs[0].dtype
    # Cast the input block once to the MXU compute dtype (bf16 by default).
    h = x_ref[...].astype(compute_dtype)
    for l in range(num_layers):
        w = w_refs[l][...]
        # bf16 (or f32) MXU matmul with f32 accumulation.
        y = jnp.dot(h, w, preferred_element_type=jnp.float32)
        y = y + b_refs[l][...]                  # bias in f32
        if l < num_layers - 1:
            y = jnp.maximum(y, 0.0)             # ReLU in f32
            width = w_refs[l].shape[1]
            # Stage the inter-layer activation in VMEM scratch: bounds the
            # >64-vreg live range explicitly (instead of compiler spill/fill)
            # and performs the single bf16 cast for the next layer's matmul.
            act_ref[:, :width] = y.astype(compute_dtype)
            h = act_ref[:, :width]
        else:
            o_ref[...] = y.astype(o_ref.dtype)


def _choose_block_rows(n):
    """Batch-row tile: multiple of 8 (sublanes), capped at 256 (full MXU M on
    v6e/v7x — pass block_rows=128 explicitly for v5e), and sized so the
    'parallel' grid axis has >= 2 steps whenever the batch allows (shards
    across v7x's two TensorCores) with < 8 padded rows per step."""
    n8 = _round_up(max(n, 1), 8)
    if n8 <= 8:
        return 8
    steps = max(2, pl.cdiv(n8, 256))
    return min(256, _round_up(pl.cdiv(n8, steps), 8))


def _const_full_spec(arr):
    # Full-array block with a constant index_map: DMA'd into VMEM once and
    # reused for every grid step.  Single-buffered (never changes between
    # steps), halving its VMEM footprint vs the default double-buffering.
    # NOTE: the lambda deliberately captures no loop variables (avoids the
    # Python late-binding pitfall for shape-dependent index_maps).
    return pl.BlockSpec(arr.shape, lambda i: (0, 0), pipeline_mode=pl.Buffered(1))


def conv_autoencoder_forward(x_nchw, mats, biases, *, block_rows=None):
    """Fused Pallas forward.  x_nchw: (N,1,16,16) -> (N,1,16,16) f32."""
    num_layers = len(mats)
    n = x_nchw.shape[0]
    f_in = mats[0].shape[0]
    f_out = mats[-1].shape[1]
    compute_dtype = mats[0].dtype
    # Widest inter-layer activation (for the staging scratch).
    max_width = max([m.shape[1] for m in mats[:-1]] + [128])

    # NCHW row-major flatten matches the feature ordering of the dense mats.
    x = x_nchw.reshape(n, f_in).astype(jnp.float32)

    if block_rows is None:
        block_rows = _choose_block_rows(n)
    block_rows = _round_up(block_rows, 8)
    n_pad = _round_up(n, block_rows)
    if n_pad != n:
        x = jnp.pad(x, ((0, n_pad - n), (0, 0)))

    in_specs = [pl.BlockSpec((block_rows, f_in), lambda i: (i, 0))]
    for m in mats:
        in_specs.append(_const_full_spec(m))
    for b in biases:
        in_specs.append(_const_full_spec(b))

    # Right-sized VMEM budget: single-buffered weights + f32 biases +
    # double-buffered activation I/O blocks + staging scratch + headroom.
    est = (sum(int(m.size) * m.dtype.itemsize for m in mats)
           + sum(int(b.size) * b.dtype.itemsize for b in biases)
           + 2 * block_rows * f_in * 4
           + 2 * block_rows * f_out * 4
           + block_rows * max_width * compute_dtype.itemsize)
    vmem_limit = min(48 * 1024 * 1024,
                     max(24 * 1024 * 1024,
                         _round_up(est + 8 * 1024 * 1024, 1 << 20)))

    y = pl.pallas_call(
        functools.partial(_fused_dense_ae_kernel, num_layers=num_layers),
        out_shape=jax.ShapeDtypeStruct((n_pad, f_out), jnp.float32),
        grid=(n_pad // block_rows,),
        in_specs=in_specs,
        out_specs=pl.BlockSpec((block_rows, f_out), lambda i: (i, 0)),
        scratch_shapes=[pltpu.VMEM((block_rows, max_width), compute_dtype)],
        compiler_params=pltpu.CompilerParams(
            dimension_semantics=("parallel",),
            vmem_limit_bytes=vmem_limit,
        ),
    )(x, *mats, *biases)

    # Autoencoder: output shape == input shape (slice off padded batch rows).
    return y[:n].reshape(x_nchw.shape)


# ----------------------------------------------------------------------------
# Parameter init (PyTorch default uniform +/- 1/sqrt(fan_in) style).
# ----------------------------------------------------------------------------
def init_params(key):
    def u(k, shape, fan_in):
        bound = 1.0 / (fan_in ** 0.5)
        return jax.random.uniform(k, shape, jnp.float32, -bound, bound)

    keys = jax.random.split(key, 12)
    p = {}
    # encoder Conv2d weights: (Cout, Cin, 3, 3)
    for idx, (co, ci) in enumerate([(16, 1), (32, 16), (64, 32)]):
        fan = ci * 9
        p[f"e{idx}_w"] = u(keys[2 * idx], (co, ci, 3, 3), fan)
        p[f"e{idx}_b"] = u(keys[2 * idx + 1], (co,), fan)
    # decoder ConvTranspose2d weights: (Cin, Cout, 3, 3)
    for idx, (ci, co) in enumerate([(64, 32), (32, 16), (16, 1)]):
        fan = co * 9  # PyTorch uses weight.size(1) * kh * kw for transpose conv
        p[f"d{idx}_w"] = u(keys[6 + 2 * idx], (ci, co, 3, 3), fan)
        p[f"d{idx}_b"] = u(keys[6 + 2 * idx + 1], (co,), fan)
    return p


if __name__ == "__main__":
    key = jax.random.PRNGKey(0)
    k_x, k_p = jax.random.split(key)
    x = jax.random.normal(k_x, (2, 1, 16, 16), jnp.float32)  # NCHW, Cin=1
    params = init_params(k_p)

    # One-time parameter prep (outside the hot path): bf16 weights, f32 bias.
    mats, biases = prepare_dense_params(params, weight_dtype=jnp.bfloat16)

    fwd = jax.jit(conv_autoencoder_forward)
    y = fwd(x, mats, biases)
    jax.block_until_ready(y)

    assert y.shape == x.shape, f"expected {x.shape}, got {y.shape}"
    assert y.dtype == jnp.float32

    # Tight check: pure-JAX matmul chain with identical bf16/f32 casts.
    y_dense = dense_reference_forward(x, mats, biases)
    err_dense = float(jnp.max(jnp.abs(y - y_dense)))
    assert err_dense < 5e-3, f"kernel vs matched dense reference: {err_dense}"

    # Loose check: f32 layer-by-layer conv reference (bf16-path tolerance).
    y_ref = reference_forward(x, params)
    tol = 5e-2 * max(1.0, float(jnp.max(jnp.abs(y_ref))))
    err_ref = float(jnp.max(jnp.abs(y - y_ref)))
    assert err_ref < tol, f"kernel vs f32 conv reference: {err_ref} (tol {tol})"

    print("KERNEL_OK")
</pallas_src>

<mosaic_0001>
module attributes {stable_mosaic.version = 11 : i64} {
  func.func @_fused_dense_ae_kernel(%arg0: i32, %arg1: memref<8x256xf32, #tpu.memory_space<vmem>>, %arg2: memref<256x1024xbf16, #tpu.memory_space<vmem>>, %arg3: memref<1024x512xbf16, #tpu.memory_space<vmem>>, %arg4: memref<512x256xbf16, #tpu.memory_space<vmem>>, %arg5: memref<256x512xbf16, #tpu.memory_space<vmem>>, %arg6: memref<512x1024xbf16, #tpu.memory_space<vmem>>, %arg7: memref<1024x256xbf16, #tpu.memory_space<vmem>>, %arg8: memref<1x1024xf32, #tpu.memory_space<vmem>>, %arg9: memref<1x512xf32, #tpu.memory_space<vmem>>, %arg10: memref<1x256xf32, #tpu.memory_space<vmem>>, %arg11: memref<1x512xf32, #tpu.memory_space<vmem>>, %arg12: memref<1x1024xf32, #tpu.memory_space<vmem>>, %arg13: memref<1x256xf32, #tpu.memory_space<vmem>>, %arg14: memref<8x256xf32, #tpu.memory_space<vmem>>, %arg15: memref<8x1024xbf16, #tpu.memory_space<vmem>>) attributes {dimension_semantics = [#tpu.dimension_semantics<parallel>], iteration_bounds = array<i64: 1>, scalar_prefetch = 0 : i64, scratch_operands = 1 : i64, tpu.core_type = #tpu.core_type<tc>, window_params = [{transform_indices = @transform_0, window_bounds = array<i64: 8, 256>}, {pipeline_mode = #tpu.pipeline_mode<synchronous>, transform_indices = @transform_1, window_bounds = array<i64: 256, 1024>}, {pipeline_mode = #tpu.pipeline_mode<synchronous>, transform_indices = @transform_2, window_bounds = array<i64: 1024, 512>}, {pipeline_mode = #tpu.pipeline_mode<synchronous>, transform_indices = @transform_3, window_bounds = array<i64: 512, 256>}, {pipeline_mode = #tpu.pipeline_mode<synchronous>, transform_indices = @transform_4, window_bounds = array<i64: 256, 512>}, {pipeline_mode = #tpu.pipeline_mode<synchronous>, transform_indices = @transform_5, window_bounds = array<i64: 512, 1024>}, {pipeline_mode = #tpu.pipeline_mode<synchronous>, transform_indices = @transform_6, window_bounds = array<i64: 1024, 256>}, {pipeline_mode = #tpu.pipeline_mode<synchronous>, transform_indices = @transform_7, window_bounds = array<i64: 1, 1024>}, {pipeline_mode = #tpu.pipeline_mode<synchronous>, transform_indices = @transform_8, window_bounds = array<i64: 1, 512>}, {pipeline_mode = #tpu.pipeline_mode<synchronous>, transform_indices = @transform_9, window_bounds = array<i64: 1, 256>}, {pipeline_mode = #tpu.pipeline_mode<synchronous>, transform_indices = @transform_10, window_bounds = array<i64: 1, 512>}, {pipeline_mode = #tpu.pipeline_mode<synchronous>, transform_indices = @transform_11, window_bounds = array<i64: 1, 1024>}, {pipeline_mode = #tpu.pipeline_mode<synchronous>, transform_indices = @transform_12, window_bounds = array<i64: 1, 256>}, {transform_indices = @transform_13, window_bounds = array<i64: 8, 256>}]} {
    %c0 = arith.constant 0 : index
    %c0_0 = arith.constant 0 : index
    %0 = vector.load %arg1[%c0, %c0_0] : memref<8x256xf32, #tpu.memory_space<vmem>>, vector<8x256xf32>
    %1 = arith.truncf %0 : vector<8x256xf32> to vector<8x256xbf16>
    %c0_1 = arith.constant 0 : index
    %c0_2 = arith.constant 0 : index
    %2 = vector.load %arg2[%c0_1, %c0_2] : memref<256x1024xbf16, #tpu.memory_space<vmem>>, vector<256x1024xbf16>
    %cst = arith.constant dense<0.000000e+00> : vector<8x1024xf32>
    %3 = tpu.matmul %1, %2, %cst {dimension_numbers = #tpu.dot_dimension_numbers<[1], [0], [0], [1], [0, 0, 1, 1], [], []>} : vector<8x256xbf16>, vector<256x1024xbf16>, vector<8x1024xf32> -> vector<8x1024xf32>
    %c0_3 = arith.constant 0 : index
    %c0_4 = arith.constant 0 : index
    %4 = vector.load %arg8[%c0_3, %c0_4] : memref<1x1024xf32, #tpu.memory_space<vmem>>, vector<1x1024xf32>
    %5 = vector.broadcast %4 : vector<1x1024xf32> to vector<8x1024xf32>
    %6 = arith.addf %3, %5 : vector<8x1024xf32>
    %cst_5 = arith.constant 0.000000e+00 : f32
    %7 = vector.broadcast %cst_5 : f32 to vector<8x1024xf32>
    %8 = arith.maximumf %6, %7 : vector<8x1024xf32>
    %9 = arith.truncf %8 : vector<8x1024xf32> to vector<8x1024xbf16>
    %c0_6 = arith.constant 0 : index
    %c0_7 = arith.constant 0 : index
    %10 = vector.load %arg15[%c0_6, %c0_7] : memref<8x1024xbf16, #tpu.memory_space<vmem>>, vector<8x1024xbf16>
    tpu.vector_store %arg15[%c0_6, %c0_7], %9 {strides = array<i32>} : memref<8x1024xbf16, #tpu.memory_space<vmem>>, vector<8x1024xbf16>,
    %c0_8 = arith.constant 0 : index
    %c0_9 = arith.constant 0 : index
    %11 = vector.load %arg15[%c0_8, %c0_9] : memref<8x1024xbf16, #tpu.memory_space<vmem>>, vector<8x1024xbf16>
    %c0_10 = arith.constant 0 : index
    %c0_11 = arith.constant 0 : index
    %12 = vector.load %arg3[%c0_10, %c0_11] : memref<1024x512xbf16, #tpu.memory_space<vmem>>, vector<1024x512xbf16>
    %cst_12 = arith.constant dense<0.000000e+00> : vector<8x512xf32>
    %13 = tpu.matmul %11, %12, %cst_12 {dimension_numbers = #tpu.dot_dimension_numbers<[1], [0], [0], [1], [0, 0, 1, 1], [], []>} : vector<8x1024xbf16>, vector<1024x512xbf16>, vector<8x512xf32> -> vector<8x512xf32>
    %c0_13 = arith.constant 0 : index
    %c0_14 = arith.constant 0 : index
    %14 = vector.load %arg9[%c0_13, %c0_14] : memref<1x512xf32, #tpu.memory_space<vmem>>, vector<1x512xf32>
    %15 = vector.broadcast %14 : vector<1x512xf32> to vector<8x512xf32>
    %16 = arith.addf %13, %15 : vector<8x512xf32>
    %cst_15 = arith.constant 0.000000e+00 : f32
    %17 = vector.broadcast %cst_15 : f32 to vector<8x512xf32>
    %18 = arith.maximumf %16, %17 : vector<8x512xf32>
    %19 = arith.truncf %18 : vector<8x512xf32> to vector<8x512xbf16>
    %c0_16 = arith.constant 0 : index
    %c0_17 = arith.constant 0 : index
    %20 = vector.load %arg15[%c0_16, %c0_17] : memref<8x1024xbf16, #tpu.memory_space<vmem>>, vector<8x512xbf16>
    tpu.vector_store %arg15[%c0_16, %c0_17], %19 {strides = array<i32>} : memref<8x1024xbf16, #tpu.memory_space<vmem>>, vector<8x512xbf16>,
    %c0_18 = arith.constant 0 : index
    %c0_19 = arith.constant 0 : index
    %21 = vector.load %arg15[%c0_18, %c0_19] : memref<8x1024xbf16, #tpu.memory_space<vmem>>, vector<8x512xbf16>
    %c0_20 = arith.constant 0 : index
    %c0_21 = arith.constant 0 : index
    %22 = vector.load %arg4[%c0_20, %c0_21] : memref<512x256xbf16, #tpu.memory_space<vmem>>, vector<512x256xbf16>
    %cst_22 = arith.constant dense<0.000000e+00> : vector<8x256xf32>
    %23 = tpu.matmul %21, %22, %cst_22 {dimension_numbers = #tpu.dot_dimension_numbers<[1], [0], [0], [1], [0, 0, 1, 1], [], []>} : vector<8x512xbf16>, vector<512x256xbf16>, vector<8x256xf32> -> vector<8x256xf32>
    %c0_23 = arith.constant 0 : index
    %c0_24 = arith.constant 0 : index
    %24 = vector.load %arg10[%c0_23, %c0_24] : memref<1x256xf32, #tpu.memory_space<vmem>>, vector<1x256xf32>
    %25 = vector.broadcast %24 : vector<1x256xf32> to vector<8x256xf32>
    %26 = arith.addf %23, %25 : vector<8x256xf32>
    %cst_25 = arith.constant 0.000000e+00 : f32
    %27 = vector.broadcast %cst_25 : f32 to vector<8x256xf32>
    %28 = arith.maximumf %26, %27 : vector<8x256xf32>
    %29 = arith.truncf %28 : vector<8x256xf32> to vector<8x256xbf16>
    %c0_26 = arith.constant 0 : index
    %c0_27 = arith.constant 0 : index
    %30 = vector.load %arg15[%c0_26, %c0_27] : memref<8x1024xbf16, #tpu.memory_space<vmem>>, vector<8x256xbf16>
    tpu.vector_store %arg15[%c0_26, %c0_27], %29 {strides = array<i32>} : memref<8x1024xbf16, #tpu.memory_space<vmem>>, vector<8x256xbf16>,
    %c0_28 = arith.constant 0 : index
    %c0_29 = arith.constant 0 : index
    %31 = vector.load %arg15[%c0_28, %c0_29] : memref<8x1024xbf16, #tpu.memory_space<vmem>>, vector<8x256xbf16>
    %c0_30 = arith.constant 0 : index
    %c0_31 = arith.constant 0 : index
    %32 = vector.load %arg5[%c0_30, %c0_31] : memref<256x512xbf16, #tpu.memory_space<vmem>>, vector<256x512xbf16>
    %cst_32 = arith.constant dense<0.000000e+00> : vector<8x512xf32>
    %33 = tpu.matmul %31, %32, %cst_32 {dimension_numbers = #tpu.dot_dimension_numbers<[1], [0], [0], [1], [0, 0, 1, 1], [], []>} : vector<8x256xbf16>, vector<256x512xbf16>, vector<8x512xf32> -> vector<8x512xf32>
    %c0_33 = arith.constant 0 : index
    %c0_34 = arith.constant 0 : index
    %34 = vector.load %arg11[%c0_33, %c0_34] : memref<1x512xf32, #tpu.memory_space<vmem>>, vector<1x512xf32>
    %35 = vector.broadcast %34 : vector<1x512xf32> to vector<8x512xf32>
    %36 = arith.addf %33, %35 : vector<8x512xf32>
    %cst_35 = arith.constant 0.000000e+00 : f32
    %37 = vector.broadcast %cst_35 : f32 to vector<8x512xf32>
    %38 = arith.maximumf %36, %37 : vector<8x512xf32>
    %39 = arith.truncf %38 : vector<8x512xf32> to vector<8x512xbf16>
    %c0_36 = arith.constant 0 : index
    %c0_37 = arith.constant 0 : index
    %40 = vector.load %arg15[%c0_36, %c0_37] : memref<8x1024xbf16, #tpu.memory_space<vmem>>, vector<8x512xbf16>
    tpu.vector_store %arg15[%c0_36, %c0_37], %39 {strides = array<i32>} : memref<8x1024xbf16, #tpu.memory_space<vmem>>, vector<8x512xbf16>,
    %c0_38 = arith.constant 0 : index
    %c0_39 = arith.constant 0 : index
    %41 = vector.load %arg15[%c0_38, %c0_39] : memref<8x1024xbf16, #tpu.memory_space<vmem>>, vector<8x512xbf16>
    %c0_40 = arith.constant 0 : index
    %c0_41 = arith.constant 0 : index
    %42 = vector.load %arg6[%c0_40, %c0_41] : memref<512x1024xbf16, #tpu.memory_space<vmem>>, vector<512x1024xbf16>
    %cst_42 = arith.constant dense<0.000000e+00> : vector<8x1024xf32>
    %43 = tpu.matmul %41, %42, %cst_42 {dimension_numbers = #tpu.dot_dimension_numbers<[1], [0], [0], [1], [0, 0, 1, 1], [], []>} : vector<8x512xbf16>, vector<512x1024xbf16>, vector<8x1024xf32> -> vector<8x1024xf32>
    %c0_43 = arith.constant 0 : index
    %c0_44 = arith.constant 0 : index
    %44 = vector.load %arg12[%c0_43, %c0_44] : memref<1x1024xf32, #tpu.memory_space<vmem>>, vector<1x1024xf32>
    %45 = vector.broadcast %44 : vector<1x1024xf32> to vector<8x1024xf32>
    %46 = arith.addf %43, %45 : vector<8x1024xf32>
    %cst_45 = arith.constant 0.000000e+00 : f32
    %47 = vector.broadcast %cst_45 : f32 to vector<8x1024xf32>
    %48 = arith.maximumf %46, %47 : vector<8x1024xf32>
    %49 = arith.truncf %48 : vector<8x1024xf32> to vector<8x1024xbf16>
    %c0_46 = arith.constant 0 : index
    %c0_47 = arith.constant 0 : index
    %50 = vector.load %arg15[%c0_46, %c0_47] : memref<8x1024xbf16, #tpu.memory_space<vmem>>, vector<8x1024xbf16>
    tpu.vector_store %arg15[%c0_46, %c0_47], %49 {strides = array<i32>} : memref<8x1024xbf16, #tpu.memory_space<vmem>>, vector<8x1024xbf16>,
    %c0_48 = arith.constant 0 : index
    %c0_49 = arith.constant 0 : index
    %51 = vector.load %arg15[%c0_48, %c0_49] : memref<8x1024xbf16, #tpu.memory_space<vmem>>, vector<8x1024xbf16>
    %c0_50 = arith.constant 0 : index
    %c0_51 = arith.constant 0 : index
    %52 = vector.load %arg7[%c0_50, %c0_51] : memref<1024x256xbf16, #tpu.memory_space<vmem>>, vector<1024x256xbf16>
    %cst_52 = arith.constant dense<0.000000e+00> : vector<8x256xf32>
    %53 = tpu.matmul %51, %52, %cst_52 {dimension_numbers = #tpu.dot_dimension_numbers<[1], [0], [0], [1], [0, 0, 1, 1], [], []>} : vector<8x1024xbf16>, vector<1024x256xbf16>, vector<8x256xf32> -> vector<8x256xf32>
    %c0_53 = arith.constant 0 : index
    %c0_54 = arith.constant 0 : index
    %54 = vector.load %arg13[%c0_53, %c0_54] : memref<1x256xf32, #tpu.memory_space<vmem>>, vector<1x256xf32>
    %55 = vector.broadcast %54 : vector<1x256xf32> to vector<8x256xf32>
    %56 = arith.addf %53, %55 : vector<8x256xf32>
    %c0_55 = arith.constant 0 : index
    %c0_56 = arith.constant 0 : index
    %57 = vector.load %arg14[%c0_55, %c0_56] : memref<8x256xf32, #tpu.memory_space<vmem>>, vector<8x256xf32>
    tpu.vector_store %arg14[%c0_55, %c0_56], %56 {strides = array<i32>} : memref<8x256xf32, #tpu.memory_space<vmem>>, vector<8x256xf32>,
    return
  }
  func.func @transform_0(%arg0: i32) -> (i32, i32) {
    %c0_i32 = arith.constant 0 : i32
    %c0_i32_0 = arith.constant 0 : i32
    return %arg0, %c0_i32 : i32, i32
  }
  func.func @transform_1(%arg0: i32) -> (i32, i32) {
    %c0_i32 = arith.constant 0 : i32
    %c0_i32_0 = arith.constant 0 : i32
    %c0_i32_1 = arith.constant 0 : i32
    return %c0_i32, %c0_i32_0 : i32, i32
  }
  func.func @transform_2(%arg0: i32) -> (i32, i32) {
    %c0_i32 = arith.constant 0 : i32
    %c0_i32_0 = arith.constant 0 : i32
    %c0_i32_1 = arith.constant 0 : i32
    return %c0_i32, %c0_i32_0 : i32, i32
  }
  func.func @transform_3(%arg0: i32) -> (i32, i32) {
    %c0_i32 = arith.constant 0 : i32
    %c0_i32_0 = arith.constant 0 : i32
    %c0_i32_1 = arith.constant 0 : i32
    return %c0_i32, %c0_i32_0 : i32, i32
  }
  func.func @transform_4(%arg0: i32) -> (i32, i32) {
    %c0_i32 = arith.constant 0 : i32
    %c0_i32_0 = arith.constant 0 : i32
    %c0_i32_1 = arith.constant 0 : i32
    return %c0_i32, %c0_i32_0 : i32, i32
  }
  func.func @transform_5(%arg0: i32) -> (i32, i32) {
    %c0_i32 = arith.constant 0 : i32
    %c0_i32_0 = arith.constant 0 : i32
    %c0_i32_1 = arith.constant 0 : i32
    return %c0_i32, %c0_i32_0 : i32, i32
  }
  func.func @transform_6(%arg0: i32) -> (i32, i32) {
    %c0_i32 = arith.constant 0 : i32
    %c0_i32_0 = arith.constant 0 : i32
    %c0_i32_1 = arith.constant 0 : i32
    return %c0_i32, %c0_i32_0 : i32, i32
  }
  func.func @transform_7(%arg0: i32) -> (i32, i32) {
    %c0_i32 = arith.constant 0 : i32
    %c0_i32_0 = arith.constant 0 : i32
    %c0_i32_1 = arith.constant 0 : i32
    return %c0_i32, %c0_i32_0 : i32, i32
  }
  func.func @transform_8(%arg0: i32) -> (i32, i32) {
    %c0_i32 = arith.constant 0 : i32
    %c0_i32_0 = arith.constant 0 : i32
    %c0_i32_1 = arith.constant 0 : i32
    return %c0_i32, %c0_i32_0 : i32, i32
  }
  func.func @transform_9(%arg0: i32) -> (i32, i32) {
    %c0_i32 = arith.constant 0 : i32
    %c0_i32_0 = arith.constant 0 : i32
    %c0_i32_1 = arith.constant 0 : i32
    return %c0_i32, %c0_i32_0 : i32, i32
  }
  func.func @transform_10(%arg0: i32) -> (i32, i32) {
    %c0_i32 = arith.constant 0 : i32
    %c0_i32_0 = arith.constant 0 : i32
    %c0_i32_1 = arith.constant 0 : i32
    return %c0_i32, %c0_i32_0 : i32, i32
  }
  func.func @transform_11(%arg0: i32) -> (i32, i32) {
    %c0_i32 = arith.constant 0 : i32
    %c0_i32_0 = arith.constant 0 : i32
    %c0_i32_1 = arith.constant 0 : i32
    return %c0_i32, %c0_i32_0 : i32, i32
  }
  func.func @transform_12(%arg0: i32) -> (i32, i32) {
    %c0_i32 = arith.constant 0 : i32
    %c0_i32_0 = arith.constant 0 : i32
    %c0_i32_1 = arith.constant 0 : i32
    return %c0_i32, %c0_i32_0 : i32, i32
  }
  func.func @transform_13(%arg0: i32) -> (i32, i32) {
    %c0_i32 = arith.constant 0 : i32
    %c0_i32_0 = arith.constant 0 : i32
    return %arg0, %c0_i32 : i32, i32
  }
}

</mosaic_0001>

<bundles_post_ra>
// kernel: conv_autoencoder_forward.1
= control target key start
LH: loop header
LB: loop body
LE: loop exit
PB: predicated region body
PF: predicated region fallthrough
CT: control target
= control target key end

     0   :  { %18 = vsyncpa [#allocation4], 0  ;;  %s9402_s0 = inlined_call_operand.vmem [shape: f32[8,256], index: 0, kind: input, shape index: {}]   ;;  %s9403_s1 = inlined_call_operand.hbm [shape: bf16[256,1024], index: 1, kind: input, shape index: {}]   ;;  %s9404_s2 = inlined_call_operand.hbm [shape: bf16[1024,512], index: 2, kind: input, shape index: {}]   ;;  %s9405_s3 = inlined_call_operand.hbm [shape: bf16[512,256], index: 3, kind: input, shape index: {}]   ;;  %s9406_s4 = inlined_call_operand.hbm [shape: bf16[256,512], index: 4, kind: input, shape index: {}]   ;;  %s9407_s5 = inlined_call_operand.hbm [shape: bf16[512,1024], index: 5, kind: input, shape index: {}]   ;;  %s9408_s6 = inlined_call_operand.hbm [shape: bf16[1024,256], index: 6, kind: input, shape index: {}]   ;;  %s9409_s7 = inlined_call_operand.vmem [shape: f32[1,1024], index: 7, kind: input, shape index: {}]   ;;  %s9410_s8 = inlined_call_operand.vmem [shape: f32[1,512], index: 8, kind: input, shape index: {}]   ;;  %s9411_s9 = inlined_call_operand.vmem [shape: f32[1,256], index: 9, kind: input, shape index: {}]   ;;  %s9412_s10 = inlined_call_operand.vmem [shape: f32[1,512], index: 10, kind: input, shape index: {}]   ;;  %s9413_s11 = inlined_call_operand.vmem [shape: f32[1,1024], index: 11, kind: input, shape index: {}]   ;;  %s9414_s12 = inlined_call_operand.vmem [shape: f32[1,256], index: 12, kind: input, shape index: {}]   ;;  %s9415_s13 = inlined_call_operand.vmem [shape: f32[8,256], index: 13, kind: output, shape index: {}]  }
   0x1   :  { %19 = vsyncpa [#allocation6], 0 }
   0x2   :  { %20 = vsyncpa [#allocation9], 0 }
   0x3   :  { %21 = vsyncpa [#allocation12], 0  ;;  %s9029_s25 = smov [#allocation5]   ;;  %s8889_s29 = scalar_lea.hbm %s9404_s2, 32768 }
   0x4   :  { %s41_s26 = sshll.u32 %s9029_s25, 4  ;;  %p8890_p0 = scmp.ne.s32.totalorder %s9404_s2, %s8889_s29  ;;  %s42_s26 = int_to_ptr.vmem [resolvable:$true] %s41_s26 }
   0x5   :  { %p8893_p1 = scmp.lt.u32.totalorder %s8889_s29, %s9404_s2 }
   0x7   :  { %p8895_p2 = pnand %p8893_p1, %p8890_p0 }
   0x9   :  { %8898 = shalt.err (!%p8895_p2)
}
   0xa   :  { %s8899_s17 = scalar_lea.vmem %s42_s26, 32768  ;;  %p8904_p4 = scmp.lt.s32.totalorder %s42_s26, %s42_s26 }
   0xb   :  { %p8900_p3 = scmp.ne.s32.totalorder %s42_s26, %s8899_s17  ;;  %p8905_p5 = scmp.lt.s32.totalorder %s8899_s17, %s8899_s17 }
   0xd   :  { %p8906_p6 = por %p8905_p5, %p8904_p4 }
   0xf   :  { %p8907_p7 = pnand %p8906_p6, %p8900_p3 }
  0x11   :  { %8910 = shalt.err (!%p8907_p7)
}
  0x12   :  { %s9030_s18 = smov 256   ;;  %s9031_s19 = smov 16  }
  0x13   :  { %47 = dma.hbm_to_vmem [thread:$0]  %s9404_s2, 32768, %s42_s26, [#allocation6], %s9030_s18, %s9030_s18, %s9031_s19  }
  0x14   :  { %s9032_s22 = smov [#allocation8]   ;;  %s9033_s24 = smov [#allocation3]  }
  0x15   :  { %s65_s23 = sshll.u32 %s9032_s22, 4  ;;  %s29_s25 = sshll.u32 %s9033_s24, 4  ;;  %s66_s23 = int_to_ptr.vmem [resolvable:$true] %s65_s23  ;;  %s30_s25 = int_to_ptr.vmem [resolvable:$true] %s29_s25 }
  0x16   :  { %s8911_s29 = scalar_lea.hbm %s9406_s4, 8192 }
  0x17   :  { %p8912_p8 = scmp.ne.s32.totalorder %s9406_s4, %s8911_s29  ;;  %p8915_p9 = scmp.lt.u32.totalorder %s8911_s29, %s9406_s4 }
  0x19   :  { %p8917_p10 = pnand %p8915_p9, %p8912_p8 }
  0x1b   :  { %8920 = shalt.err (!%p8917_p10)
}
  0x1c   :  { %s8921_s2 = scalar_lea.vmem %s66_s23, 8192  ;;  %p8926_p12 = scmp.lt.s32.totalorder %s66_s23, %s66_s23 }
  0x1d   :  { %p8922_p11 = scmp.ne.s32.totalorder %s66_s23, %s8921_s2  ;;  %p8927_p13 = scmp.lt.s32.totalorder %s8921_s2, %s8921_s2 }
  0x1f   :  { %p8928_p0 = por %p8927_p13, %p8926_p12 }
  0x21   :  { %p8929_p1 = pnand %p8928_p0, %p8922_p11 }
  0x23   :  { %8932 = shalt.err (!%p8929_p1)
}
  0x24   :  { %71 = dma.hbm_to_vmem [thread:$0]  %s9406_s4, 8192, %s66_s23, [#allocation9], %s9030_s18, %s9030_s18, %s9031_s19  }
  0x25   :  { %s8933_s22 = scalar_lea.hbm %s9403_s1, 16384 }
  0x26   :  { %p8934_p2 = scmp.ne.s32.totalorder %s9403_s1, %s8933_s22  ;;  %p8937_p3 = scmp.lt.u32.totalorder %s8933_s22, %s9403_s1 }
  0x28   :  { %p8939_p4 = pnand %p8937_p3, %p8934_p2 }
  0x2a   :  { %8942 = shalt.err (!%p8939_p4)
}
  0x2b   :  { %s8943_s30 = scalar_lea.vmem %s30_s25, 16384  ;;  %p8948_p6 = scmp.lt.s32.totalorder %s30_s25, %s30_s25 }
  0x2c   :  { %p8944_p5 = scmp.ne.s32.totalorder %s30_s25, %s8943_s30  ;;  %p8949_p7 = scmp.lt.s32.totalorder %s8943_s30, %s8943_s30 }
  0x2e   :  { %p8950_p8 = por %p8949_p7, %p8948_p6 }
  0x30   :  { %p8951_p9 = pnand %p8950_p8, %p8944_p5 }
  0x32   :  { %8954 = shalt.err (!%p8951_p9)
}
  0x33   :  { %s9034_s4 = smov 512   ;;  %s9035_s18 = smov 32  }
  0x34   :  { %35 = dma.hbm_to_vmem [thread:$0]  %s9403_s1, 16384, %s30_s25, [#allocation4], %s9034_s4, %s9034_s4, %s9035_s18  }
  0x35   :  { %s9036_s14 = smov [#allocation7]   ;;  %s8955_s26 = scalar_lea.hbm %s9405_s3, 8192 }
  0x36   :  { %s53_s15 = sshll.u32 %s9036_s14, 4  ;;  %p8956_p10 = scmp.ne.s32.totalorder %s9405_s3, %s8955_s26  ;;  %s54_s15 = int_to_ptr.vmem [resolvable:$true] %s53_s15 }
  0x37   :  { %p8959_p11 = scmp.lt.u32.totalorder %s8955_s26, %s9405_s3 }
  0x39   :  { %p8961_p12 = pnand %p8959_p11, %p8956_p10 }
  0x3b   :  { %8964 = shalt.err (!%p8961_p12)
}
  0x3c   :  { %s8965_s24 = scalar_lea.vmem %s54_s15, 8192  ;;  %p8970_p0 = scmp.lt.s32.totalorder %s54_s15, %s54_s15 }
  0x3d   :  { %p8966_p13 = scmp.ne.s32.totalorder %s54_s15, %s8965_s24  ;;  %p8971_p1 = scmp.lt.s32.totalorder %s8965_s24, %s8965_s24 }
  0x3f   :  { %p8972_p2 = por %p8971_p1, %p8970_p0 }
  0x41   :  { %p8973_p3 = pnand %p8972_p2, %p8966_p13 }
  0x43   :  { %8976 = shalt.err (!%p8973_p3)
}
  0x44   :  { %s9037_s1 = smov 128   ;;  %s9038_s25 = smov 8  }
  0x45   :  { %59 = dma.hbm_to_vmem [thread:$0]  %s9405_s3, 8192, %s54_s15, [#allocation6], %s9037_s1, %s9037_s1, %s9038_s25  }
  0x46   :  { %s9039_s29 = smov [#allocation10]   ;;  %s9040_s19 = smov [#allocation11]  }
  0x47   :  { %s77_s30 = sshll.u32 %s9039_s29, 4  ;;  %s89_s23 = sshll.u32 %s9040_s19, 4  ;;  %s78_s30 = int_to_ptr.vmem [resolvable:$true] %s77_s30  ;;  %s9165_s23 = int_to_ptr.vmem [resolvable:$true] %s89_s23 }
  0x48   :  { %s8977_s2 = scalar_lea.hbm %s9407_s5, 32768 }
  0x49   :  { %p8978_p4 = scmp.ne.s32.totalorder %s9407_s5, %s8977_s2  ;;  %p8981_p5 = scmp.lt.u32.totalorder %s8977_s2, %s9407_s5 }
  0x4b   :  { %p8983_p6 = pnand %p8981_p5, %p8978_p4 }
  0x4d   :  { %8986 = shalt.err (!%p8983_p6)
}
  0x4e   :  { %s8987_s3 = scalar_lea.vmem %s78_s30, 32768  ;;  %p8992_p8 = scmp.lt.s32.totalorder %s78_s30, %s78_s30 }
  0x4f   :  { %p8988_p7 = scmp.ne.s32.totalorder %s78_s30, %s8987_s3  ;;  %p8993_p9 = scmp.lt.s32.totalorder %s8987_s3, %s8987_s3 }
  0x51   :  { %p8994_p10 = por %p8993_p9, %p8992_p8 }
  0x53   :  { %p8995_p11 = pnand %p8994_p10, %p8988_p7 }
  0x55   :  { %8998 = shalt.err (!%p8995_p11)
}
  0x56   :  { %83 = dma.hbm_to_vmem [thread:$0]  %s9407_s5, 32768, %s78_s30, [#allocation9], %s9034_s4, %s9034_s4, %s9035_s18  }
  0x57   :  { %s8999_s28 = scalar_lea.hbm %s9408_s6, 16384 }
  0x58   :  { %p9000_p12 = scmp.ne.s32.totalorder %s9408_s6, %s8999_s28  ;;  %p9003_p13 = scmp.lt.u32.totalorder %s8999_s28, %s9408_s6 }
  0x5a   :  { %p9005_p0 = pnand %p9003_p13, %p9000_p12 }
  0x5c   :  { %9008 = shalt.err (!%p9005_p0)
}
  0x5d   :  { %s9009_s2 = scalar_lea.vmem %s9165_s23, 16384  ;;  %p9014_p2 = scmp.lt.s32.totalorder %s9165_s23, %s9165_s23 }
  0x5e   :  { %p9010_p1 = scmp.ne.s32.totalorder %s9165_s23, %s9009_s2  ;;  %p9015_p3 = scmp.lt.s32.totalorder %s9009_s2, %s9009_s2 }
  0x60   :  { %p9016_p4 = por %p9015_p3, %p9014_p2 }
  0x62   :  { %p9017_p5 = pnand %p9016_p4, %p9010_p1 }
  0x64   :  { %9020 = shalt.err (!%p9017_p5)
}
  0x65   :  { %95 = dma.hbm_to_vmem [thread:$0]  %s9408_s6, 16384, %s9165_s23, [#allocation12], %s9037_s1, %s9037_s1, %s9038_s25  }
  0x66   :  { %9021 = dma.done.wait [#allocation4], 16384  }
  0x67   :  { %9022 = vsyncadd [#allocation4], 4294950912 }
  0x68   :  { %9023 = dma.done.wait [#allocation6], 40960  }
  0x69   :  { %9024 = vsyncadd [#allocation6], 4294926336 }
  0x6a   :  { %9025 = dma.done.wait [#allocation9], 40960  }
  0x6b   :  { %9026 = vsyncadd [#allocation9], 4294926336 }
  0x6c   :  { %9027 = dma.done.wait [#allocation12], 16384  }
  0x6d   :  { %9028 = vsyncadd [#allocation12], 4294950912  ;;  %v130_v0 = vld [vmem:[#allocation3] sm:$0xff]  ;;  %v127_v17 = vld [vmem:[%s9402_s0 + $0x8] sm:$0xff] }
  0x6e   :  { %v134_v1 = vld [vmem:[#allocation3 + $0x20] sm:$0xff]  ;;  %v9205_v18 = vpack.c.bf16 %v127_v17, %v127_v17 }
  0x6f   :  { %v138_v2 = vld [vmem:[#allocation3 + $0x40] sm:$0xff]  ;;  %v7064_v3 = vcombine.high %v130_v0, %v134_v1  ;;  %v7063_v4 = vcombine.low %v130_v0, %v134_v1  ;;  %v131_v0 = vld [vmem:[#allocation3 + $0x8] sm:$0xff] }
  0x70   :  { %v142_v5 = vld [vmem:[#allocation3 + $0x60] sm:$0xff]  ;;  %972 = vmatprep.mubr.bf16.mxu1 %v9205_v18  ;;  %v135_v1 = vld [vmem:[#allocation3 + $0x28] sm:$0xff] }
  0x71   :  { %v7072_v6 = vcombine.high %v138_v2, %v142_v5  ;;  %v146_v7 = vld [vmem:[#allocation3 + $0x80] sm:$0xff]  ;;  %940 = vmatprep.subr.bf16.mxu1 %v7064_v3  ;;  %v7071_v9 = vcombine.low %v138_v2, %v142_v5  ;;  %v139_v5 = vld [vmem:[#allocation3 + $0x48] sm:$0xff] }
  0x72   :  { %v150_v8 = vld [vmem:[#allocation3 + $0xa0] sm:$0xff]  ;;  %941 = vmatpush1.bf16.msra.mxu1 %v7063_v4 }
  0x73   :  { %942 = vmatprep.subr.bf16.mxu1 %v7072_v6  ;;  %v7080_v10 = vcombine.high %v146_v7, %v150_v8  ;;  %v154_v11 = vld [vmem:[#allocation3 + $0xc0] sm:$0xff]  ;;  %v7079_v13 = vcombine.low %v146_v7, %v150_v8  ;;  %v143_v6 = vld [vmem:[#allocation3 + $0x68] sm:$0xff]  ;;  %v7066_v7 = vcombine.high %v131_v0, %v135_v1 }
  0x74   :  { %v158_v12 = vld [vmem:[#allocation3 + $0xe0] sm:$0xff] }
  0x75   :  { %v7088_v14 = vcombine.high %v154_v11, %v158_v12  ;;  %v162_v15 = vld [vmem:[#allocation3 + $0x100] sm:$0xff]  ;;  %v7087_v19 = vcombine.low %v154_v11, %v158_v12  ;;  %v151_v11 = vld [vmem:[#allocation3 + $0xa8] sm:$0xff]  ;;  %v7074_v12 = vcombine.high %v139_v5, %v143_v6 }
  0x76   :  { %943 = vmatpush1.bf16.msra.mxu1 %v7071_v9  ;;  %v166_v16 = vld [vmem:[#allocation3 + $0x120] sm:$0xff]  ;;  %v7065_v9 = vcombine.low %v131_v0, %v135_v1  ;;  %v239_v0 = vld [vmem:[#allocation3 + $0x368] sm:$0xff] }
  0x77   :  { %944 = vmatprep.subr.bf16.mxu1 %v7080_v10  ;;  %v7096_v20 = vcombine.high %v162_v15, %v166_v16  ;;  %v170_v21 = vld [vmem:[#allocation3 + $0x140] sm:$0xff]  ;;  %v7095_v23 = vcombine.low %v162_v15, %v166_v16  ;;  %v147_v10 = vld [vmem:[#allocation3 + $0x88] sm:$0xff] }
  0x78   :  { %v174_v22 = vld [vmem:[#allocation3 + $0x160] sm:$0xff]  ;;  %v159_v15 = vld [vmem:[#allocation3 + $0xe8] sm:$0xff]  ;;  %v7082_v16 = vcombine.high %v147_v10, %v151_v11  ;;  %v7081_v17 = vcombine.low %v147_v10, %v151_v11 }
  0x79   :  { %v7104_v24 = vcombine.high %v170_v21, %v174_v22  ;;  %v178_v25 = vld [vmem:[#allocation3 + $0x180] sm:$0xff]  ;;  %v7103_v27 = vcombine.low %v170_v21, %v174_v22 }
  0x7a   :  { %945 = vmatpush1.bf16.msra.mxu1 %v7079_v13  ;;  %v182_v26 = vld [vmem:[#allocation3 + $0x1a0] sm:$0xff]  ;;  %v7073_v13 = vcombine.low %v139_v5, %v143_v6  ;;  %v243_v5 = vld [vmem:[#allocation3 + $0x388] sm:$0xff] }
  0x7b   :  { %946 = vmatprep.subr.bf16.mxu1 %v7088_v14  ;;  %v7112_v28 = vcombine.high %v178_v25, %v182_v26  ;;  %v186_v29 = vld [vmem:[#allocation3 + $0x1c0] sm:$0xff]  ;;  %v7111_v31 = vcombine.low %v178_v25, %v182_v26  ;;  %v155_v14 = vld [vmem:[#allocation3 + $0xc8] sm:$0xff] }
  0x7c   :  { %v190_v30 = vld [vmem:[#allocation3 + $0x1e0] sm:$0xff]  ;;  %v7090_v21 = vcombine.high %v155_v14, %v159_v15  ;;  %v7089_v22 = vcombine.low %v155_v14, %v159_v15  ;;  %v247_v6 = vld [vmem:[#allocation3 + $0x3a8] sm:$0xff] }
  0x7d   :  { %v7120_v32 = vcombine.high %v186_v29, %v190_v30  ;;  %v194_v33 = vld [vmem:[#allocation3 + $0x200] sm:$0xff]  ;;  %v7119_v35 = vcombine.low %v186_v29, %v190_v30  ;;  %v7178_v14 = vcombine.high %v243_v5, %v247_v6 }
  0x7e   :  { %947 = vmatpush1.bf16.msra.mxu1 %v7087_v19  ;;  %v198_v34 = vld [vmem:[#allocation3 + $0x220] sm:$0xff]  ;;  %v163_v19 = vld [vmem:[#allocation3 + $0x108] sm:$0xff] }
  0x7f   :  { %948 = vmatprep.subr.bf16.mxu1 %v7096_v20  ;;  %v202_v36 = vld [vmem:[#allocation3 + $0x240] sm:$0xff]  ;;  %v7128_v38 = vcombine.high %v194_v33, %v198_v34  ;;  %v7127_v39 = vcombine.low %v194_v33, %v198_v34  ;;  %v167_v20 = vld [vmem:[#allocation3 + $0x128] sm:$0xff] }
  0x80   :  { %v206_v37 = vld [vmem:[#allocation3 + $0x260] sm:$0xff]  ;;  %v7098_v25 = vcombine.high %v163_v19, %v167_v20  ;;  %v7097_v26 = vcombine.low %v163_v19, %v167_v20  ;;  %v132_v19 = vld [vmem:[#allocation3 + $0x10] sm:$0xff] }
  0x81   :  { %v210_v40 = vld [vmem:[#allocation3 + $0x280] sm:$0xff]  ;;  %v7136_v42 = vcombine.high %v202_v36, %v206_v37  ;;  %v7135_v43 = vcombine.low %v202_v36, %v206_v37  ;;  %v199_v36 = vld [vmem:[#allocation3 + $0x228] sm:$0xff]  ;;  %v136_v20 = vld [vmem:[#allocation3 + $0x30] sm:$0xff] }
  0x82   :  { %949 = vmatpush1.bf16.msra.mxu1 %v7095_v23  ;;  %v214_v41 = vld [vmem:[#allocation3 + $0x2a0] sm:$0xff]  ;;  %v171_v23 = vld [vmem:[#allocation3 + $0x148] sm:$0xff] }
  0x83   :  { %950 = vmatprep.subr.bf16.mxu1 %v7104_v24  ;;  %v218_v44 = vld [vmem:[#allocation3 + $0x2c0] sm:$0xff]  ;;  %v7144_v46 = vcombine.high %v210_v40, %v214_v41  ;;  %v7143_v47 = vcombine.low %v210_v40, %v214_v41  ;;  %v175_v24 = vld [vmem:[#allocation3 + $0x168] sm:$0xff] }
  0x84   :  { %v222_v45 = vld [vmem:[#allocation3 + $0x2e0] sm:$0xff]  ;;  %v7106_v29 = vcombine.high %v171_v23, %v175_v24  ;;  %v7105_v30 = vcombine.low %v171_v23, %v175_v24  ;;  %v207_v40 = vld [vmem:[#allocation3 + $0x268] sm:$0xff] }
  0x85   :  { %v226_v48 = vld [vmem:[#allocation3 + $0x300] sm:$0xff]  ;;  %v7152_v50 = vcombine.high %v218_v44, %v222_v45  ;;  %v7151_v51 = vcombine.low %v218_v44, %v222_v45  ;;  %v211_v45 = vld [vmem:[#allocation3 + $0x288] sm:$0xff] }
  0x86   :  { %951 = vmatpush1.bf16.msra.mxu1 %v7103_v27  ;;  %v230_v49 = vld [vmem:[#allocation3 + $0x320] sm:$0xff]  ;;  %v179_v27 = vld [vmem:[#allocation3 + $0x188] sm:$0xff] }
  0x87   :  { %952 = vmatprep.subr.bf16.mxu1 %v7112_v28  ;;  %v234_v52 = vld [vmem:[#allocation3 + $0x340] sm:$0xff]  ;;  %v7160_v54 = vcombine.high %v226_v48, %v230_v49  ;;  %v7159_v55 = vcombine.low %v226_v48, %v230_v49  ;;  %v183_v28 = vld [vmem:[#allocation3 + $0x1a8] sm:$0xff] }
  0x88   :  { %v238_v53 = vld [vmem:[#allocation3 + $0x360] sm:$0xff]  ;;  %v7114_v33 = vcombine.high %v179_v27, %v183_v28  ;;  %v7113_v34 = vcombine.low %v179_v27, %v183_v28  ;;  %v7068_v27 = vcombine.high %v132_v19, %v136_v20 }
  0x89   :  { %v242_v56 = vld [vmem:[#allocation3 + $0x380] sm:$0xff]  ;;  %v7168_v58 = vcombine.high %v234_v52, %v238_v53  ;;  %v7167_v59 = vcombine.low %v234_v52, %v238_v53  ;;  %v223_v52 = vld [vmem:[#allocation3 + $0x2e8] sm:$0xff] }
  0x8a   :  { %953 = vmatpush1.bf16.msra.mxu1 %v7111_v31  ;;  %v246_v57 = vld [vmem:[#allocation3 + $0x3a0] sm:$0xff]  ;;  %v187_v31 = vld [vmem:[#allocation3 + $0x1c8] sm:$0xff] }
  0x8b   :  { %954 = vmatprep.subr.bf16.mxu1 %v7120_v32  ;;  %v250_v60 = vld [vmem:[#allocation3 + $0x3c0] sm:$0xff]  ;;  %v7176_v62 = vcombine.high %v242_v56, %v246_v57  ;;  %v7175_v63 = vcombine.low %v242_v56, %v246_v57  ;;  %v191_v32 = vld [vmem:[#allocation3 + $0x1e8] sm:$0xff] }
  0x8c   :  { %v254_v61 = vld [vmem:[#allocation3 + $0x3e0] sm:$0xff]  ;;  %v7122_v37 = vcombine.high %v187_v31, %v191_v32  ;;  %v227_v57 = vld [vmem:[#allocation3 + $0x308] sm:$0xff] }
  0x8d   :  { %v7184_v2 = vcombine.high %v250_v60, %v254_v61  ;;  %v126_v3 = vld [vmem:[%s9402_s0] sm:$0xff]  ;;  %v7183_v4 = vcombine.low %v250_v60, %v254_v61 }
  0x8e   :  { %955 = vmatpush1.bf16.msra.mxu1 %v7119_v35  ;;  %v9211_v8 = vpack.c.bf16 %v126_v3, %v126_v3  ;;  %v195_v35 = vld [vmem:[#allocation3 + $0x208] sm:$0xff]  ;;  %v8124_v48 = vld [vmem:[#allocation5 + $0x24] ss:$16 sps:$4 sm:$0xff]   ;;  %v8126_v49 = vld [vmem:[#allocation5 + $0x20] ss:$16 sps:$4 sm:$0xff]  }
  0x8f   :  { %956 = vmatprep.subr.bf16.mxu1 %v7128_v38  ;;  %v7121_v38 = vcombine.low %v187_v31, %v191_v32  ;;  %v7130_v41 = vcombine.high %v195_v35, %v199_v36  ;;  %v7129_v44 = vcombine.low %v195_v35, %v199_v36  ;;  %v8130_v60 = vld [vmem:[#allocation5 + $0x64] ss:$16 sps:$4 sm:$0xff]   ;;  %v8132_v61 = vld [vmem:[#allocation5 + $0x60] ss:$16 sps:$4 sm:$0xff]  }
  0x90   :  { %v8135_v3 = vld [vmem:[#allocation5 + $0x80] ss:$16 sps:$4 sm:$0xff]   ;;  %v8139_v15 = vld [vmem:[#allocation5 + $0xc4] ss:$16 sps:$4 sm:$0xff]  }
  0x91   :  { %v8138_v10 = vld [vmem:[#allocation5 + $0xa0] ss:$16 sps:$4 sm:$0xff]   ;;  %v8145_v28 = vld [vmem:[#allocation5 + $0x104] ss:$16 sps:$4 sm:$0xff]  }
  0x92   :  { %957 = vmatpush1.bf16.msra.mxu1 %v7127_v39  ;;  %v203_v39 = vld [vmem:[#allocation3 + $0x248] sm:$0xff]  ;;  %v8144_v23 = vld [vmem:[#allocation5 + $0xe0] ss:$16 sps:$4 sm:$0xff]  }
  0x93   :  { %958 = vmatprep.subr.bf16.mxu1 %v7136_v42  ;;  %v8121_v42 = vld [vmem:[#allocation5 + $0x4] ss:$16 sps:$4 sm:$0xff]   ;;  %v8153_v35 = vld [vmem:[#allocation5 + $0x120] ss:$16 sps:$4 sm:$0xff]  }
  0x94   :  { %2738 = vmatprep.subr.bf16.mxu0 %v8121_v42  ;;  %v148_v32 = vld [vmem:[#allocation3 + $0x90] sm:$0xff] }
  0x96   :  { %959 = vmatpush1.bf16.msra.mxu1 %v7135_v43  ;;  %v8123_v43 = vld [vmem:[#allocation5] ss:$16 sps:$4 sm:$0xff]  }
  0x97   :  { %960 = vmatprep.subr.bf16.mxu1 %v7144_v46  ;;  %v215_v46 = vld [vmem:[#allocation3 + $0x2a8] sm:$0xff]  ;;  %2739 = vmatpush1.bf16.msra.mxu0 %v8123_v43  ;;  %v164_v43 = vld [vmem:[#allocation3 + $0x110] sm:$0xff] }
  0x98   :  { %2740 = vmatprep.subr.bf16.mxu0 %v8124_v48  ;;  %v7146_v53 = vcombine.high %v211_v45, %v215_v46  ;;  %v7145_v56 = vcombine.low %v211_v45, %v215_v46  ;;  %v8160_v45 = vld [vmem:[#allocation5 + $0x164] ss:$16 sps:$4 sm:$0xff]  }
  0x9a   :  { %961 = vmatpush1.bf16.msra.mxu1 %v7143_v47  ;;  %v7138_v47 = vcombine.high %v203_v39, %v207_v40 }
  0x9b   :  { %962 = vmatprep.subr.bf16.mxu1 %v7152_v50  ;;  %v7137_v50 = vcombine.low %v203_v39, %v207_v40  ;;  %2741 = vmatpush1.bf16.msra.mxu0 %v8126_v49  ;;  %v8154_v39 = vld [vmem:[#allocation5 + $0x144] ss:$16 sps:$4 sm:$0xff]  }
  0x9c   :  { %v172_v49 = vld [vmem:[#allocation3 + $0x150] sm:$0xff] }
  0x9e   :  { %963 = vmatpush1.bf16.msra.mxu1 %v7151_v51  ;;  %v219_v51 = vld [vmem:[#allocation3 + $0x2c8] sm:$0xff] }
  0x9f   :  { %964 = vmatprep.subr.bf16.mxu1 %v7160_v54  ;;  %v8127_v54 = vld [vmem:[#allocation5 + $0x44] ss:$16 sps:$4 sm:$0xff]  }
  0xa0   :  { %2742 = vmatprep.subr.bf16.mxu0 %v8127_v54 }
  0xa2   :  { %965 = vmatpush1.bf16.msra.mxu1 %v7159_v55  ;;  %v8129_v55 = vld [vmem:[#allocation5 + $0x40] ss:$16 sps:$4 sm:$0xff]  }
  0xa3   :  { %966 = vmatprep.subr.bf16.mxu1 %v7168_v58  ;;  %v231_v58 = vld [vmem:[#allocation3 + $0x328] sm:$0xff]  ;;  %2743 = vmatpush1.bf16.msra.mxu0 %v8129_v55  ;;  %v180_v55 = vld [vmem:[#allocation3 + $0x190] sm:$0xff] }
  0xa4   :  { %2744 = vmatprep.subr.bf16.mxu0 %v8130_v60  ;;  %v7162_v1 = vcombine.high %v227_v57, %v231_v58 }
  0xa6   :  { %967 = vmatpush1.bf16.msra.mxu1 %v7167_v59  ;;  %v7154_v59 = vcombine.high %v219_v51, %v223_v52 }
  0xa7   :  { %968 = vmatprep.subr.bf16.mxu1 %v7176_v62  ;;  %v7153_v62 = vcombine.low %v219_v51, %v223_v52  ;;  %2745 = vmatpush1.bf16.msra.mxu0 %v8132_v61  ;;  %v8166_v51 = vld [vmem:[#allocation5 + $0x184] ss:$16 sps:$4 sm:$0xff]  }
  0xaa   :  { %969 = vmatpush1.bf16.msra.mxu1 %v7175_v63  ;;  %v235_v63 = vld [vmem:[#allocation3 + $0x348] sm:$0xff] }
  0xab   :  { %970 = vmatprep.subr.bf16.mxu1 %v7184_v2  ;;  %v8133_v2 = vld [vmem:[#allocation5 + $0x84] ss:$16 sps:$4 sm:$0xff]   ;;  %v7169_v11 = vcombine.low %v235_v63, %v239_v0 }
  0xac   :  { %2746 = vmatprep.subr.bf16.mxu0 %v8133_v2 }
  0xad   :  { %2747 = vmatpush1.bf16.msra.mxu0 %v8135_v3 }
  0xae   :  { %971 = vmatpush1.bf16.msra.mxu1 %v7183_v4  ;;  %v7161_v4 = vcombine.low %v227_v57, %v231_v58  ;;  %v8172_v57 = vld [vmem:[#allocation5 + $0x1a4] ss:$16 sps:$4 sm:$0xff]  }
  0xaf   :  { %981 = vmatprep.subr.bf16.mxu1 %v7066_v7  ;;  %v7170_v7 = vcombine.high %v235_v63, %v239_v0  ;;  %v8178_v63 = vld [vmem:[#allocation5 + $0x1c4] ss:$16 sps:$4 sm:$0xff]  }
  0xb0   :  { %v192_v0 = vld [vmem:[#allocation3 + $0x1f0] sm:$0xff] }
  0xb1   :  { %973 = vmatmul.mubr.bf16.vlgmr.msra.gmra.mrb[0].mxu1 %v9211_v8 }
  0xb2   :  { %982 = vmatpush1.bf16.msra.mxu1 %v7065_v9  ;;  %1013 = vmatprep.mubr.bf16.mxu1 %v9205_v18  ;;  %v8136_v9 = vld [vmem:[#allocation5 + $0xa4] ss:$16 sps:$4 sm:$0xff]  }
  0xb3   :  { %983 = vmatprep.subr.bf16.mxu1 %v7074_v12  ;;  %2748 = vmatprep.subr.bf16.mxu0 %v8136_v9  ;;  %v251_v12 = vld [vmem:[#allocation3 + $0x3c8] sm:$0xff] }
  0xb4   :  { %2749 = vmatpush1.bf16.msra.mxu0 %v8138_v10 }
  0xb5   :  { %2750 = vmatprep.subr.bf16.mxu0 %v8139_v15 }
  0xb6   :  { %984 = vmatpush1.bf16.msra.mxu1 %v7073_v13  ;;  %v255_v13 = vld [vmem:[#allocation3 + $0x3e8] sm:$0xff] }
  0xb7   :  { %985 = vmatprep.subr.bf16.mxu1 %v7082_v16  ;;  %v8141_v16 = vld [vmem:[#allocation5 + $0xc0] ss:$16 sps:$4 sm:$0xff]   ;;  %v7185_v24 = vcombine.low %v251_v12, %v255_v13 }
  0xb8   :  { %2751 = vmatpush1.bf16.msra.mxu0 %v8141_v16  ;;  %v212_v16 = vld [vmem:[#allocation3 + $0x290] sm:$0xff] }
  0xba   :  { %986 = vmatpush1.bf16.msra.mxu1 %v7081_v17  ;;  %v7177_v17 = vcombine.low %v243_v5, %v247_v6  ;;  %v8184_v5 = vld [vmem:[#allocation5 + $0x1e4] ss:$16 sps:$4 sm:$0xff]  }
  0xbb   :  { %987 = vmatprep.subr.bf16.mxu1 %v7090_v21  ;;  %v7186_v21 = vcombine.high %v251_v12, %v255_v13  ;;  %v200_v6 = vld [vmem:[#allocation3 + $0x230] sm:$0xff] }
  0xbc   :  { %v204_v12 = vld [vmem:[#allocation3 + $0x250] sm:$0xff] }
  0xbd   :  { %v208_v13 = vld [vmem:[#allocation3 + $0x270] sm:$0xff] }
  0xbe   :  { %988 = vmatpush1.bf16.msra.mxu1 %v7089_v22  ;;  %v8142_v22 = vld [vmem:[#allocation5 + $0xe4] ss:$16 sps:$4 sm:$0xff]   ;;  %v7140_v15 = vcombine.high %v204_v12, %v208_v13 }
  0xbf   :  { %989 = vmatprep.subr.bf16.mxu1 %v7098_v25  ;;  %2752 = vmatprep.subr.bf16.mxu0 %v8142_v22  ;;  %v140_v25 = vld [vmem:[#allocation3 + $0x50] sm:$0xff] }
  0xc0   :  { %2753 = vmatpush1.bf16.msra.mxu0 %v8144_v23  ;;  %v224_v22 = vld [vmem:[#allocation3 + $0x2f0] sm:$0xff] }
  0xc1   :  { %2754 = vmatprep.subr.bf16.mxu0 %v8145_v28 }
  0xc2   :  { %990 = vmatpush1.bf16.msra.mxu1 %v7097_v26  ;;  %v144_v26 = vld [vmem:[#allocation3 + $0x70] sm:$0xff] }
  0xc3   :  { %991 = vmatprep.subr.bf16.mxu1 %v7106_v29  ;;  %v8147_v29 = vld [vmem:[#allocation5 + $0x100] ss:$16 sps:$4 sm:$0xff]   ;;  %v7076_v31 = vcombine.high %v140_v25, %v144_v26  ;;  %v7075_v36 = vcombine.low %v140_v25, %v144_v26 }
  0xc4   :  { %2755 = vmatpush1.bf16.msra.mxu0 %v8147_v29  ;;  %v228_v25 = vld [vmem:[#allocation3 + $0x310] sm:$0xff] }
  0xc5   :  { %v232_v26 = vld [vmem:[#allocation3 + $0x330] sm:$0xff] }
  0xc6   :  { %992 = vmatpush1.bf16.msra.mxu1 %v7105_v30  ;;  %v7067_v30 = vcombine.low %v132_v19, %v136_v20  ;;  %v7139_v19 = vcombine.low %v204_v12, %v208_v13  ;;  %v7164_v28 = vcombine.high %v228_v25, %v232_v26  ;;  %v236_v29 = vld [vmem:[#allocation3 + $0x350] sm:$0xff]  ;;  %v205_v13 = vld [vmem:[#allocation3 + $0x258] sm:$0xff] }
  0xc7   :  { %993 = vmatprep.subr.bf16.mxu1 %v7114_v33  ;;  %v8148_v33 = vld [vmem:[#allocation5 + $0x124] ss:$16 sps:$4 sm:$0xff]  }
  0xc8   :  { %2756 = vmatprep.subr.bf16.mxu0 %v8148_v33  ;;  %v244_v33 = vld [vmem:[#allocation3 + $0x390] sm:$0xff] }
  0xc9   :  { %2757 = vmatpush1.bf16.msra.mxu0 %v8153_v35 }
  0xca   :  { %994 = vmatpush1.bf16.msra.mxu1 %v7113_v34  ;;  %v152_v34 = vld [vmem:[#allocation3 + $0xb0] sm:$0xff]  ;;  %2758 = vmatprep.subr.bf16.mxu0 %v8154_v39 }
  0xcb   :  { %995 = vmatprep.subr.bf16.mxu1 %v7122_v37  ;;  %v156_v37 = vld [vmem:[#allocation3 + $0xd0] sm:$0xff]  ;;  %v7084_v40 = vcombine.high %v148_v32, %v152_v34  ;;  %v7083_v42 = vcombine.low %v148_v32, %v152_v34 }
  0xcc   :  { %v248_v34 = vld [vmem:[#allocation3 + $0x3b0] sm:$0xff] }
  0xcd   :  { %v7179_v39 = vcombine.low %v244_v33, %v248_v34 }
  0xce   :  { %996 = vmatpush1.bf16.msra.mxu1 %v7121_v38  ;;  %v160_v38 = vld [vmem:[#allocation3 + $0xf0] sm:$0xff] }
  0xcf   :  { %997 = vmatprep.subr.bf16.mxu1 %v7130_v41  ;;  %v8159_v41 = vld [vmem:[#allocation5 + $0x140] ss:$16 sps:$4 sm:$0xff]   ;;  %v7092_v46 = vcombine.high %v156_v37, %v160_v38  ;;  %v7091_v48 = vcombine.low %v156_v37, %v160_v38 }
  0xd0   :  { %2759 = vmatpush1.bf16.msra.mxu0 %v8159_v41  ;;  %v252_v37 = vld [vmem:[#allocation3 + $0x3d0] sm:$0xff]  ;;  %v133_v41 = vld [vmem:[#allocation3 + $0x18] sm:$0xff] }
  0xd1   :  { %2760 = vmatprep.subr.bf16.mxu0 %v8160_v45  ;;  %v256_v38 = vld [vmem:[#allocation3 + $0x3f0] sm:$0xff]  ;;  %v141_v45 = vld [vmem:[#allocation3 + $0x58] sm:$0xff] }
  0xd2   :  { %998 = vmatpush1.bf16.msra.mxu1 %v7129_v44  ;;  %v168_v44 = vld [vmem:[#allocation3 + $0x130] sm:$0xff] }
  0xd3   :  { %999 = vmatprep.subr.bf16.mxu1 %v7138_v47  ;;  %v8165_v47 = vld [vmem:[#allocation5 + $0x160] ss:$16 sps:$4 sm:$0xff]   ;;  %v7100_v52 = vcombine.high %v164_v43, %v168_v44  ;;  %v7099_v54 = vcombine.low %v164_v43, %v168_v44  ;;  %v7187_v43 = vcombine.low %v252_v37, %v256_v38 }
  0xd4   :  { %2761 = vmatpush1.bf16.msra.mxu0 %v8165_v47 }
  0xd5   :  { %2762 = vmatprep.subr.bf16.mxu0 %v8166_v51 }
  0xd6   :  { %1000 = vmatpush1.bf16.msra.mxu1 %v7137_v50  ;;  %v176_v50 = vld [vmem:[#allocation3 + $0x170] sm:$0xff] }
  0xd7   :  { %1001 = vmatprep.subr.bf16.mxu1 %v7146_v53  ;;  %v8171_v53 = vld [vmem:[#allocation5 + $0x180] ss:$16 sps:$4 sm:$0xff]   ;;  %v7108_v58 = vcombine.high %v172_v49, %v176_v50  ;;  %v7107_v60 = vcombine.low %v172_v49, %v176_v50  ;;  %v149_v49 = vld [vmem:[#allocation3 + $0x98] sm:$0xff] }
  0xd8   :  { %2763 = vmatpush1.bf16.msra.mxu0 %v8171_v53  ;;  %v153_v50 = vld [vmem:[#allocation3 + $0xb8] sm:$0xff] }
  0xd9   :  { %2764 = vmatprep.subr.bf16.mxu0 %v8172_v57  ;;  %v157_v53 = vld [vmem:[#allocation3 + $0xd8] sm:$0xff] }
  0xda   :  { %1002 = vmatpush1.bf16.msra.mxu1 %v7145_v56  ;;  %v184_v56 = vld [vmem:[#allocation3 + $0x1b0] sm:$0xff]  ;;  %v165_v57 = vld [vmem:[#allocation3 + $0x118] sm:$0xff] }
  0xdb   :  { %1003 = vmatprep.subr.bf16.mxu1 %v7154_v59  ;;  %v8177_v59 = vld [vmem:[#allocation5 + $0x1a0] ss:$16 sps:$4 sm:$0xff]   ;;  %v7116_v61 = vcombine.high %v180_v55, %v184_v56  ;;  %v7115_v2 = vcombine.low %v180_v55, %v184_v56  ;;  %v7085_v55 = vcombine.low %v149_v49, %v153_v50 }
  0xdc   :  { %2765 = vmatpush1.bf16.msra.mxu0 %v8177_v59 }
  0xdd   :  { %2766 = vmatprep.subr.bf16.mxu0 %v8178_v63 }
  0xde   :  { %1004 = vmatpush1.bf16.msra.mxu1 %v7153_v62  ;;  %v188_v62 = vld [vmem:[#allocation3 + $0x1d0] sm:$0xff] }
  0xdf   :  { %1005 = vmatprep.subr.bf16.mxu1 %v7162_v1  ;;  %v8183_v1 = vld [vmem:[#allocation5 + $0x1c0] ss:$16 sps:$4 sm:$0xff]   ;;  %v7124_v3 = vcombine.high %v188_v62, %v192_v0  ;;  %v7123_v9 = vcombine.low %v188_v62, %v192_v0  ;;  %v177_v62 = vld [vmem:[#allocation3 + $0x178] sm:$0xff] }
  0xe0   :  { %2767 = vmatpush1.bf16.msra.mxu0 %v8183_v1  ;;  %v181_v0 = vld [vmem:[#allocation3 + $0x198] sm:$0xff] }
  0xe1   :  { %2768 = vmatprep.subr.bf16.mxu0 %v8184_v5  ;;  %v185_v1 = vld [vmem:[#allocation3 + $0x1b8] sm:$0xff] }
  0xe2   :  { %1006 = vmatpush1.bf16.msra.mxu1 %v7161_v4  ;;  %v196_v4 = vld [vmem:[#allocation3 + $0x210] sm:$0xff]  ;;  %v193_v5 = vld [vmem:[#allocation3 + $0x1f8] sm:$0xff] }
  0xe3   :  { %1007 = vmatprep.subr.bf16.mxu1 %v7170_v7  ;;  %v8189_v7 = vld [vmem:[#allocation5 + $0x1e0] ss:$16 sps:$4 sm:$0xff]   ;;  %v7132_v10 = vcombine.high %v196_v4, %v200_v6 }
  0xe4   :  { %2769 = vmatpush1.bf16.msra.mxu0 %v8189_v7 }
  0xe6   :  { %1008 = vmatpush1.bf16.msra.mxu1 %v7169_v11  ;;  %v8192_v11 = vld [vmem:[#allocation5 + $0x204] ss:$16 sps:$4 sm:$0xff]  }
  0xe7   :  { %1009 = vmatprep.subr.bf16.mxu1 %v7178_v14  ;;  %2779 = vmatprep.subr.bf16.mxu0 %v8192_v11  ;;  %v7131_v14 = vcombine.low %v196_v4, %v200_v6  ;;  %v189_v4 = vld [vmem:[#allocation3 + $0x1d8] sm:$0xff]  ;;  %v7117_v6 = vcombine.low %v181_v0, %v185_v1 }
  0xe8   :  { %v7126_v7 = vcombine.high %v189_v4, %v193_v5  ;;  %v7125_v11 = vcombine.low %v189_v4, %v193_v5  ;;  %v8195_v5 = vld [vmem:[#allocation5 + $0xec] ss:$16 sps:$4 sm:$0xff]  }
  0xea   :  { %1010 = vmatpush1.bf16.msra.mxu1 %v7177_v17  ;;  %v216_v17 = vld [vmem:[#allocation3 + $0x2b0] sm:$0xff] }
  0xeb   :  { %1011 = vmatprep.subr.bf16.mxu1 %v7186_v21  ;;  %v7148_v20 = vcombine.high %v212_v16, %v216_v17  ;;  %v220_v21 = vld [vmem:[#allocation3 + $0x2d0] sm:$0xff]  ;;  %v7147_v23 = vcombine.low %v212_v16, %v216_v17  ;;  %v213_v17 = vld [vmem:[#allocation3 + $0x298] sm:$0xff] }
  0xee   :  { %1012 = vmatpush1.bf16.msra.mxu1 %v7185_v24  ;;  %v7156_v24 = vcombine.high %v220_v21, %v224_v22 }
  0xef   :  { %1022 = vmatprep.subr.bf16.mxu1 %v7068_v27  ;;  %v7155_v27 = vcombine.low %v220_v21, %v224_v22  ;;  %v221_v22 = vld [vmem:[#allocation3 + $0x2d8] sm:$0xff] }
  0xf1   :  { %1014 = vmatmul.mubr.bf16.vlgmr.msra.gmra.mrb[4].mxu1 %v9211_v8 }
  0xf2   :  { %1023 = vmatpush1.bf16.msra.mxu1 %v7067_v30  ;;  %1054 = vmatprep.mubr.bf16.mxu1 %v9205_v18  ;;  %v240_v30 = vld [vmem:[#allocation3 + $0x370] sm:$0xff] }
  0xf3   :  { %1024 = vmatprep.subr.bf16.mxu1 %v7076_v31  ;;  %v7163_v31 = vcombine.low %v228_v25, %v232_v26  ;;  %v7172_v32 = vcombine.high %v236_v29, %v240_v30  ;;  %v7171_v35 = vcombine.low %v236_v29, %v240_v30  ;;  %v229_v26 = vld [vmem:[#allocation3 + $0x318] sm:$0xff] }
  0xf4   :  { %v237_v30 = vld [vmem:[#allocation3 + $0x358] sm:$0xff] }
  0xf6   :  { %1025 = vmatpush1.bf16.msra.mxu1 %v7075_v36  ;;  %v7180_v36 = vcombine.high %v244_v33, %v248_v34  ;;  %v245_v34 = vld [vmem:[#allocation3 + $0x398] sm:$0xff] }
  0xf7   :  { %1026 = vmatprep.subr.bf16.mxu1 %v7084_v40  ;;  %v7188_v40 = vcombine.high %v252_v37, %v256_v38  ;;  %v253_v38 = vld [vmem:[#allocation3 + $0x3d8] sm:$0xff] }
  0xfa   :  { %1027 = vmatpush1.bf16.msra.mxu1 %v7083_v42  ;;  %v137_v42 = vld [vmem:[#allocation3 + $0x38] sm:$0xff] }
  0xfb   :  { %1028 = vmatprep.subr.bf16.mxu1 %v7092_v46  ;;  %v7070_v44 = vcombine.high %v133_v41, %v137_v42  ;;  %v145_v46 = vld [vmem:[#allocation3 + $0x78] sm:$0xff]  ;;  %v7069_v47 = vcombine.low %v133_v41, %v137_v42 }
  0xfc   :  { %v7077_v51 = vcombine.low %v141_v45, %v145_v46 }
  0xfe   :  { %1029 = vmatpush1.bf16.msra.mxu1 %v7091_v48  ;;  %v7078_v48 = vcombine.high %v141_v45, %v145_v46  ;;  %v8158_v45 = vld [vmem:[#allocation5 + $0x2c] ss:$16 sps:$4 sm:$0xff]   ;;  %v8156_v46 = vld [vmem:[#allocation5 + $0x28] ss:$16 sps:$4 sm:$0xff]  }
  0xff   :  { %1030 = vmatprep.subr.bf16.mxu1 %v7100_v52  ;;  %v7086_v52 = vcombine.high %v149_v49, %v153_v50  ;;  %v8162_v49 = vld [vmem:[#allocation5 + $0x48] ss:$16 sps:$4 sm:$0xff]   ;;  %v8170_v50 = vld [vmem:[#allocation5 + $0x6c] ss:$16 sps:$4 sm:$0xff]  }
 0x102   :  { %1031 = vmatpush1.bf16.msra.mxu1 %v7099_v54  ;;  %v161_v54 = vld [vmem:[#allocation3 + $0xf8] sm:$0xff] }
 0x103   :  { %1032 = vmatprep.subr.bf16.mxu1 %v7108_v58  ;;  %v7094_v56 = vcombine.high %v157_v53, %v161_v54  ;;  %v169_v58 = vld [vmem:[#allocation3 + $0x138] sm:$0xff]  ;;  %v7093_v59 = vcombine.low %v157_v53, %v161_v54 }
 0x104   :  { %v7101_v63 = vcombine.low %v165_v57, %v169_v58  ;;  %v8176_v53 = vld [vmem:[#allocation5 + $0x8c] ss:$16 sps:$4 sm:$0xff]  }
 0x106   :  { %1033 = vmatpush1.bf16.msra.mxu1 %v7107_v60  ;;  %v7102_v60 = vcombine.high %v165_v57, %v169_v58  ;;  %v8182_v57 = vld [vmem:[#allocation5 + $0xac] ss:$16 sps:$4 sm:$0xff]  }
 0x107   :  { %1034 = vmatprep.subr.bf16.mxu1 %v7116_v61  ;;  %v173_v61 = vld [vmem:[#allocation3 + $0x158] sm:$0xff] }
 0x10a   :  { %1035 = vmatpush1.bf16.msra.mxu1 %v7115_v2  ;;  %v7109_v2 = vcombine.low %v173_v61, %v177_v62 }
 0x10b   :  { %1036 = vmatprep.subr.bf16.mxu1 %v7124_v3  ;;  %v7118_v3 = vcombine.high %v181_v0, %v185_v1 }
 0x10e   :  { %1037 = vmatpush1.bf16.msra.mxu1 %v7123_v9  ;;  %v197_v9 = vld [vmem:[#allocation3 + $0x218] sm:$0xff] }
 0x10f   :  { %1038 = vmatprep.subr.bf16.mxu1 %v7132_v10  ;;  %v201_v10 = vld [vmem:[#allocation3 + $0x238] sm:$0xff] }
 0x110   :  { %v7134_v12 = vcombine.high %v197_v9, %v201_v10 }
 0x112   :  { %1039 = vmatpush1.bf16.msra.mxu1 %v7131_v14  ;;  %v209_v14 = vld [vmem:[#allocation3 + $0x278] sm:$0xff] }
 0x113   :  { %1040 = vmatprep.subr.bf16.mxu1 %v7140_v15  ;;  %v7133_v15 = vcombine.low %v197_v9, %v201_v10  ;;  %v7142_v16 = vcombine.high %v205_v13, %v209_v14  ;;  %v8190_v10 = vld [vmem:[#allocation5 + $0x200] ss:$16 sps:$4 sm:$0xff]  }
 0x116   :  { %1041 = vmatpush1.bf16.msra.mxu1 %v7139_v19  ;;  %v217_v19 = vld [vmem:[#allocation3 + $0x2b8] sm:$0xff] }
 0x117   :  { %1042 = vmatprep.subr.bf16.mxu1 %v7148_v20  ;;  %v7141_v20 = vcombine.low %v205_v13, %v209_v14  ;;  %v7150_v21 = vcombine.high %v213_v17, %v217_v19  ;;  %v8201_v13 = vld [vmem:[#allocation5 + $0x10c] ss:$16 sps:$4 sm:$0xff]   ;;  %v8196_v14 = vld [vmem:[#allocation5 + $0x220] ss:$16 sps:$4 sm:$0xff]  }
 0x11a   :  { %1043 = vmatpush1.bf16.msra.mxu1 %v7147_v23  ;;  %v225_v23 = vld [vmem:[#allocation3 + $0x2f8] sm:$0xff] }
 0x11b   :  { %1044 = vmatprep.subr.bf16.mxu1 %v7156_v24  ;;  %v7149_v24 = vcombine.low %v213_v17, %v217_v19  ;;  %v7158_v25 = vcombine.high %v221_v22, %v225_v23  ;;  %v8207_v17 = vld [vmem:[#allocation5 + $0x12c] ss:$16 sps:$4 sm:$0xff]   ;;  %v8202_v19 = vld [vmem:[#allocation5 + $0x240] ss:$16 sps:$4 sm:$0xff]  }
 0x11e   :  { %1045 = vmatpush1.bf16.msra.mxu1 %v7155_v27  ;;  %v233_v27 = vld [vmem:[#allocation3 + $0x338] sm:$0xff] }
 0x11f   :  { %1046 = vmatprep.subr.bf16.mxu1 %v7164_v28  ;;  %v7157_v28 = vcombine.low %v221_v22, %v225_v23  ;;  %v7166_v29 = vcombine.high %v229_v26, %v233_v27  ;;  %v8213_v22 = vld [vmem:[#allocation5 + $0x14c] ss:$16 sps:$4 sm:$0xff]   ;;  %v8208_v23 = vld [vmem:[#allocation5 + $0x260] ss:$16 sps:$4 sm:$0xff]  }
 0x122   :  { %1047 = vmatpush1.bf16.msra.mxu1 %v7163_v31  ;;  %v241_v31 = vld [vmem:[#allocation3 + $0x378] sm:$0xff] }
 0x123   :  { %1048 = vmatprep.subr.bf16.mxu1 %v7172_v32  ;;  %v7165_v32 = vcombine.low %v229_v26, %v233_v27  ;;  %v7174_v33 = vcombine.high %v237_v30, %v241_v31  ;;  %v8219_v26 = vld [vmem:[#allocation5 + $0x16c] ss:$16 sps:$4 sm:$0xff]   ;;  %v8214_v27 = vld [vmem:[#allocation5 + $0x280] ss:$16 sps:$4 sm:$0xff]  }
 0x126   :  { %1049 = vmatpush1.bf16.msra.mxu1 %v7171_v35  ;;  %v249_v35 = vld [vmem:[#allocation3 + $0x3b8] sm:$0xff] }
 0x127   :  { %1050 = vmatprep.subr.bf16.mxu1 %v7180_v36  ;;  %v7173_v36 = vcombine.low %v237_v30, %v241_v31  ;;  %v7182_v37 = vcombine.high %v245_v34, %v249_v35  ;;  %v8225_v30 = vld [vmem:[#allocation5 + $0x18c] ss:$16 sps:$4 sm:$0xff]   ;;  %v8220_v31 = vld [vmem:[#allocation5 + $0x2a0] ss:$16 sps:$4 sm:$0xff]  }
 0x12a   :  { %1051 = vmatpush1.bf16.msra.mxu1 %v7179_v39  ;;  %v257_v39 = vld [vmem:[#allocation3 + $0x3f8] sm:$0xff] }
 0x12b   :  { %1052 = vmatprep.subr.bf16.mxu1 %v7188_v40  ;;  %v7181_v40 = vcombine.low %v245_v34, %v249_v35  ;;  %v7190_v41 = vcombine.high %v253_v38, %v257_v39  ;;  %v7189_v42 = vcombine.low %v253_v38, %v257_v39  ;;  %v8231_v34 = vld [vmem:[#allocation5 + $0x1ac] ss:$16 sps:$4 sm:$0xff]   ;;  %v8226_v35 = vld [vmem:[#allocation5 + $0x2c0] ss:$16 sps:$4 sm:$0xff]  }
 0x12c   :  { %v8237_v38 = vld [vmem:[#allocation5 + $0x1cc] ss:$16 sps:$4 sm:$0xff]   ;;  %v8232_v39 = vld [vmem:[#allocation5 + $0x2e0] ss:$16 sps:$4 sm:$0xff]  }
 0x12e   :  { %1053 = vmatpush1.bf16.msra.mxu1 %v7187_v43  ;;  %v8152_v43 = vld [vmem:[#allocation5 + $0xc] ss:$16 sps:$4 sm:$0xff]  }
 0x12f   :  { %1063 = vmatprep.subr.bf16.mxu1 %v7070_v44  ;;  %v8150_v44 = vld [vmem:[#allocation5 + $0x8] ss:$16 sps:$4 sm:$0xff]  }
 0x131   :  { %1055 = vmatmul.mubr.bf16.vlgmr.msra.gmra.mrb[8].mxu1 %v9211_v8 }
 0x132   :  { %1064 = vmatpush1.bf16.msra.mxu1 %v7069_v47  ;;  %1095 = vmatprep.mubr.bf16.mxu1 %v9205_v18  ;;  %v7110_v18 = vcombine.high %v173_v61, %v177_v62  ;;  %v8164_v47 = vld [vmem:[#allocation5 + $0x4c] ss:$16 sps:$4 sm:$0xff]  }
 0x133   :  { %1065 = vmatprep.subr.bf16.mxu1 %v7078_v48  ;;  %v260_v48 = vlaneseq  ;;  %v8188_v61 = vld [vmem:[#allocation5 + $0xcc] ss:$16 sps:$4 sm:$0xff]  }
 0x136   :  { %1066 = vmatpush1.bf16.msra.mxu1 %v7077_v51  ;;  %v9220_v51 = vshrl.u32 %v260_v48, 7  ;;  %v8247_v48 = vld [vmem:[#allocation5 + $0x208] ss:$16 sps:$4 sm:$0xff]  }
 0x137   :  { %1067 = vmatprep.subr.bf16.mxu1 %v7086_v52  ;;  %v8168_v52 = vld [vmem:[#allocation5 + $0x68] ss:$16 sps:$4 sm:$0xff]  }
 0x138   :  { %v9223_v54 = vsub.s32 0, %v9220_v51 }
 0x13a   :  { %1068 = vmatpush1.bf16.msra.mxu1 %v7085_v55  ;;  %v9228_v55 = vld [vmem:[%s9409_s7] sm:$0xff] }
 0x13b   :  { %1069 = vmatprep.subr.bf16.mxu1 %v7094_v56  ;;  %v9231_v56 = vsub.s32 1, %v9220_v51  ;;  %v263_v58 = vrot.slane %v9228_v55, %v9223_v54 }
 0x13e   :  { %1070 = vmatpush1.bf16.msra.mxu1 %v7093_v59  ;;  %v267_v59 = vrot.slane %v9228_v55, %v9231_v56 }
 0x13f   :  { %1071 = vmatprep.subr.bf16.mxu1 %v7102_v60  ;;  %v8180_v60 = vld [vmem:[#allocation5 + $0xa8] ss:$16 sps:$4 sm:$0xff]  }
 0x142   :  { %1072 = vmatpush1.bf16.msra.mxu1 %v7101_v63 }
 0x143   :  { %1073 = vmatprep.subr.bf16.mxu1 %v7110_v18 }
 0x146   :  { %1074 = vmatpush1.bf16.msra.mxu1 %v7109_v2  ;;  %v8186_v2 = vld [vmem:[#allocation5 + $0xc8] ss:$16 sps:$4 sm:$0xff]  }
 0x147   :  { %1075 = vmatprep.subr.bf16.mxu1 %v7118_v3 }
 0x14a   :  { %1076 = vmatpush1.bf16.msra.mxu1 %v7117_v6 }
 0x14b   :  { %1077 = vmatprep.subr.bf16.mxu1 %v7126_v7 }
 0x14e   :  { %1078 = vmatpush1.bf16.msra.mxu1 %v7125_v11  ;;  %v8193_v11 = vld [vmem:[#allocation5 + $0xe8] ss:$16 sps:$4 sm:$0xff]  }
 0x14f   :  { %1079 = vmatprep.subr.bf16.mxu1 %v7134_v12  ;;  %v8198_v12 = vld [vmem:[#allocation5 + $0x224] ss:$16 sps:$4 sm:$0xff]  }
 0x152   :  { %1080 = vmatpush1.bf16.msra.mxu1 %v7133_v15  ;;  %v8199_v15 = vld [vmem:[#allocation5 + $0x108] ss:$16 sps:$4 sm:$0xff]  }
 0x153   :  { %1081 = vmatprep.subr.bf16.mxu1 %v7142_v16  ;;  %v8204_v16 = vld [vmem:[#allocation5 + $0x244] ss:$16 sps:$4 sm:$0xff]  }
 0x156   :  { %1082 = vmatpush1.bf16.msra.mxu1 %v7141_v20  ;;  %v8205_v20 = vld [vmem:[#allocation5 + $0x128] ss:$16 sps:$4 sm:$0xff]  }
 0x157   :  { %1083 = vmatprep.subr.bf16.mxu1 %v7150_v21  ;;  %v8210_v21 = vld [vmem:[#allocation5 + $0x264] ss:$16 sps:$4 sm:$0xff]  }
 0x15a   :  { %1084 = vmatpush1.bf16.msra.mxu1 %v7149_v24  ;;  %v8211_v24 = vld [vmem:[#allocation5 + $0x148] ss:$16 sps:$4 sm:$0xff]  }
 0x15b   :  { %1085 = vmatprep.subr.bf16.mxu1 %v7158_v25  ;;  %v8216_v25 = vld [vmem:[#allocation5 + $0x284] ss:$16 sps:$4 sm:$0xff]  }
 0x15e   :  { %1086 = vmatpush1.bf16.msra.mxu1 %v7157_v28  ;;  %v8217_v28 = vld [vmem:[#allocation5 + $0x168] ss:$16 sps:$4 sm:$0xff]  }
 0x15f   :  { %1087 = vmatprep.subr.bf16.mxu1 %v7166_v29  ;;  %v8222_v29 = vld [vmem:[#allocation5 + $0x2a4] ss:$16 sps:$4 sm:$0xff]  }
 0x162   :  { %1088 = vmatpush1.bf16.msra.mxu1 %v7165_v32  ;;  %v8223_v32 = vld [vmem:[#allocation5 + $0x188] ss:$16 sps:$4 sm:$0xff]  }
 0x163   :  { %1089 = vmatprep.subr.bf16.mxu1 %v7174_v33  ;;  %v8228_v33 = vld [vmem:[#allocation5 + $0x2c4] ss:$16 sps:$4 sm:$0xff]  }
 0x166   :  { %1090 = vmatpush1.bf16.msra.mxu1 %v7173_v36  ;;  %v8229_v36 = vld [vmem:[#allocation5 + $0x1a8] ss:$16 sps:$4 sm:$0xff]  }
 0x167   :  { %1091 = vmatprep.subr.bf16.mxu1 %v7182_v37  ;;  %v8234_v37 = vld [vmem:[#allocation5 + $0x2e4] ss:$16 sps:$4 sm:$0xff]  }
 0x16a   :  { %1092 = vmatpush1.bf16.msra.mxu1 %v7181_v40  ;;  %v8235_v40 = vld [vmem:[#allocation5 + $0x1c8] ss:$16 sps:$4 sm:$0xff]  }
 0x16b   :  { %1093 = vmatprep.subr.bf16.mxu1 %v7190_v41  ;;  %v8240_v41 = vld [vmem:[#allocation5 + $0x304] ss:$16 sps:$4 sm:$0xff]  }
 0x16e   :  { %1094 = vmatpush1.bf16.msra.mxu1 %v7189_v42  ;;  %v8243_v42 = vld [vmem:[#allocation5 + $0x1ec] ss:$16 sps:$4 sm:$0xff]  }
 0x16f   :  { %2902 = vmatprep.subr.bf16.mxu1 %v8152_v43  ;;  %v8238_v43 = vld [vmem:[#allocation5 + $0x300] ss:$16 sps:$4 sm:$0xff]  }
 0x171   :  { %1096 = vmatmul.mubr.bf16.vlgmr.msra.gmra.mrb[12].mxu1 %v9211_v8  ;;  %v8174_v8 = vld [vmem:[#allocation5 + $0x88] ss:$16 sps:$4 sm:$0xff]  }
 0x172   :  { %2903 = vmatpush1.bf16.msra.mxu1 %v8150_v44  ;;  %v8241_v44 = vld [vmem:[#allocation5 + $0x1e8] ss:$16 sps:$4 sm:$0xff]  }
 0x173   :  { %2904 = vmatprep.subr.bf16.mxu1 %v8158_v45  ;;  %v8246_v45 = vld [vmem:[#allocation5 + $0x324] ss:$16 sps:$4 sm:$0xff]  }
 0x176   :  { %2905 = vmatpush1.bf16.msra.mxu1 %v8156_v46  ;;  %v8249_v46 = vld [vmem:[#allocation5 + $0x20c] ss:$16 sps:$4 sm:$0xff]  }
 0x177   :  { %2906 = vmatprep.subr.bf16.mxu1 %v8164_v47  ;;  %v8244_v47 = vld [vmem:[#allocation5 + $0x320] ss:$16 sps:$4 sm:$0xff]  }
 0x17a   :  { %2907 = vmatpush1.bf16.msra.mxu1 %v8162_v49  ;;  %v8252_v49 = vld [vmem:[#allocation5 + $0x344] ss:$16 sps:$4 sm:$0xff]  }
 0x17b   :  { %2908 = vmatprep.subr.bf16.mxu1 %v8170_v50  ;;  %v8255_v50 = vld [vmem:[#allocation5 + $0x22c] ss:$16 sps:$4 sm:$0xff]  }
 0x17e   :  { %2909 = vmatpush1.bf16.msra.mxu1 %v8168_v52  ;;  %v8250_v52 = vld [vmem:[#allocation5 + $0x340] ss:$16 sps:$4 sm:$0xff]  }
 0x17f   :  { %2910 = vmatprep.subr.bf16.mxu1 %v8176_v53  ;;  %v8253_v53 = vld [vmem:[#allocation5 + $0x228] ss:$16 sps:$4 sm:$0xff]  }
 0x182   :  { %2911 = vmatpush1.bf16.msra.mxu1 %v8174_v8  ;;  %v8258_v8 = vld [vmem:[#allocation5 + $0x364] ss:$16 sps:$4 sm:$0xff]  }
 0x183   :  { %2912 = vmatprep.subr.bf16.mxu1 %v8182_v57  ;;  %v8261_v57 = vld [vmem:[#allocation5 + $0x24c] ss:$16 sps:$4 sm:$0xff]  }
 0x184   :  { %v974_v62 = vpop.f32.mrb[0].mxu1 }
 0x185   :  { %v975_v63 = vadd.f32 %v974_v62, %v263_v58  ;;  %v976_v18 = vpop.f32.mrb[1].mxu1  ;;  %v8256_v58 = vld [vmem:[#allocation5 + $0x360] ss:$16 sps:$4 sm:$0xff]  }
 0x186   :  { %v977_v0 = vadd.f32 %v976_v18, %v267_v59  ;;  %v978_v1 = vpop.f32.mrb[2].mxu1  ;;  %2913 = vmatpush1.bf16.msra.mxu1 %v8180_v60  ;;  %v8259_v59 = vld [vmem:[#allocation5 + $0x248] ss:$16 sps:$4 sm:$0xff]   ;;  %v8264_v60 = vld [vmem:[#allocation5 + $0x384] ss:$16 sps:$4 sm:$0xff]  }
 0x187   :  { %v1104_v3 = vmax.f32 %v975_v63, 0.0  ;;  %v979_v4 = vpop.f32.mrb[3].mxu1  ;;  %2914 = vmatprep.subr.bf16.mxu1 %v8188_v61  ;;  %v8267_v61 = vld [vmem:[#allocation5 + $0x26c] ss:$16 sps:$4 sm:$0xff]   ;;  %v8262_v62 = vld [vmem:[#allocation5 + $0x380] ss:$16 sps:$4 sm:$0xff]  }
 0x188   :  { %v1105_v6 = vmax.f32 %v977_v0, 0.0  ;;  %v8265_v63 = vld [vmem:[#allocation5 + $0x268] ss:$16 sps:$4 sm:$0xff]   ;;  %v8270_v18 = vld [vmem:[#allocation5 + $0x3a4] ss:$16 sps:$4 sm:$0xff]   ;;  %v9242_v1 = vsub.s32 2, %v9220_v51 }
 0x189   :  { %v9237_v7 = vpack.c.bf16 %v1104_v3, %v1104_v3  ;;  %v8273_v0 = vld [vmem:[#allocation5 + $0x28c] ss:$16 sps:$4 sm:$0xff]   ;;  %v8271_v3 = vld [vmem:[#allocation5 + $0x288] ss:$16 sps:$4 sm:$0xff]   ;;  %v9245_v4 = vsub.s32 3, %v9220_v51 }
 0x18a   :  { %2915 = vmatpush1.bf16.msra.mxu1 %v8186_v2  ;;  %v8012_v9 = vpack.c.bf16 %v1105_v6, %v1105_v6  ;;  %v8268_v2 = vld [vmem:[#allocation5 + $0x3a0] ss:$16 sps:$4 sm:$0xff]   ;;  %v8279_v6 = vld [vmem:[#allocation5 + $0x2ac] ss:$16 sps:$4 sm:$0xff]  }
 0x18b   :  { %2916 = vmatprep.subr.bf16.mxu1 %v8195_v5  ;;  %v8276_v5 = vld [vmem:[#allocation5 + $0x3c4] ss:$16 sps:$4 sm:$0xff]  }
 0x18c   :  { %2770 = vmatprep.mubr.bf16.mxu0 %v8012_v9  ;;  %2934 = vmatprep.mubr.bf16.mxu1 %v8012_v9  ;;  %v275_v9 = vrot.slane %v9228_v55, %v9245_v4 }
 0x18d   :  { %2771 = vmatmul.mubr.bf16.vlgmr.msra.gmra.mrb[0].mxu0 %v9237_v7 }
 0x18e   :  { %2780 = vmatpush1.bf16.msra.mxu0 %v8190_v10  ;;  %2917 = vmatpush1.bf16.msra.mxu1 %v8193_v11  ;;  %v8274_v10 = vld [vmem:[#allocation5 + $0x3c0] ss:$16 sps:$4 sm:$0xff]   ;;  %v8277_v11 = vld [vmem:[#allocation5 + $0x2a8] ss:$16 sps:$4 sm:$0xff]  }
 0x18f   :  { %2781 = vmatprep.subr.bf16.mxu0 %v8198_v12  ;;  %2918 = vmatprep.subr.bf16.mxu1 %v8201_v13  ;;  %v8282_v12 = vld [vmem:[#allocation5 + $0x3e4] ss:$16 sps:$4 sm:$0xff]   ;;  %v8285_v13 = vld [vmem:[#allocation5 + $0x2cc] ss:$16 sps:$4 sm:$0xff]  }
 0x192   :  { %2782 = vmatpush1.bf16.msra.mxu0 %v8196_v14  ;;  %2919 = vmatpush1.bf16.msra.mxu1 %v8199_v15 }
 0x193   :  { %2783 = vmatprep.subr.bf16.mxu0 %v8204_v16  ;;  %2920 = vmatprep.subr.bf16.mxu1 %v8207_v17 }
 0x196   :  { %2784 = vmatpush1.bf16.msra.mxu0 %v8202_v19  ;;  %2921 = vmatpush1.bf16.msra.mxu1 %v8205_v20  ;;  %v8280_v20 = vld [vmem:[#allocation5 + $0x3e0] ss:$16 sps:$4 sm:$0xff]  }
 0x197   :  { %2785 = vmatprep.subr.bf16.mxu0 %v8210_v21  ;;  %2922 = vmatprep.subr.bf16.mxu1 %v8213_v22  ;;  %v8283_v21 = vld [vmem:[#allocation5 + $0x2c8] ss:$16 sps:$4 sm:$0xff]  }
 0x19a   :  { %2786 = vmatpush1.bf16.msra.mxu0 %v8208_v23  ;;  %2923 = vmatpush1.bf16.msra.mxu1 %v8211_v24  ;;  %v8288_v24 = vld [vmem:[#allocation5 + $0x404] ss:$16 sps:$4 sm:$0xff]  }
 0x19b   :  { %2787 = vmatprep.subr.bf16.mxu0 %v8216_v25  ;;  %2924 = vmatprep.subr.bf16.mxu1 %v8219_v26  ;;  %v8291_v25 = vld [vmem:[#allocation5 + $0x2ec] ss:$16 sps:$4 sm:$0xff]  }
 0x19e   :  { %2788 = vmatpush1.bf16.msra.mxu0 %v8214_v27  ;;  %2925 = vmatpush1.bf16.msra.mxu1 %v8217_v28 }
 0x19f   :  { %2789 = vmatprep.subr.bf16.mxu0 %v8222_v29  ;;  %2926 = vmatprep.subr.bf16.mxu1 %v8225_v30  ;;  %v8286_v29 = vld [vmem:[#allocation5 + $0x400] ss:$16 sps:$4 sm:$0xff]   ;;  %v8289_v30 = vld [vmem:[#allocation5 + $0x2e8] ss:$16 sps:$4 sm:$0xff]  }
 0x1a2   :  { %2790 = vmatpush1.bf16.msra.mxu0 %v8220_v31  ;;  %2927 = vmatpush1.bf16.msra.mxu1 %v8223_v32  ;;  %v8294_v31 = vld [vmem:[#allocation5 + $0x424] ss:$16 sps:$4 sm:$0xff]   ;;  %v8297_v32 = vld [vmem:[#allocation5 + $0x30c] ss:$16 sps:$4 sm:$0xff]  }
 0x1a3   :  { %2791 = vmatprep.subr.bf16.mxu0 %v8228_v33  ;;  %2928 = vmatprep.subr.bf16.mxu1 %v8231_v34  ;;  %v8292_v33 = vld [vmem:[#allocation5 + $0x420] ss:$16 sps:$4 sm:$0xff]   ;;  %v8295_v34 = vld [vmem:[#allocation5 + $0x308] ss:$16 sps:$4 sm:$0xff]  }
 0x1a6   :  { %2792 = vmatpush1.bf16.msra.mxu0 %v8226_v35  ;;  %2929 = vmatpush1.bf16.msra.mxu1 %v8229_v36  ;;  %v8300_v35 = vld [vmem:[#allocation5 + $0x444] ss:$16 sps:$4 sm:$0xff]   ;;  %v8303_v36 = vld [vmem:[#allocation5 + $0x32c] ss:$16 sps:$4 sm:$0xff]  }
 0x1a7   :  { %2793 = vmatprep.subr.bf16.mxu0 %v8234_v37  ;;  %2930 = vmatprep.subr.bf16.mxu1 %v8237_v38  ;;  %v8298_v37 = vld [vmem:[#allocation5 + $0x440] ss:$16 sps:$4 sm:$0xff]   ;;  %v8301_v38 = vld [vmem:[#allocation5 + $0x328] ss:$16 sps:$4 sm:$0xff]  }
 0x1aa   :  { %2794 = vmatpush1.bf16.msra.mxu0 %v8232_v39  ;;  %2931 = vmatpush1.bf16.msra.mxu1 %v8235_v40  ;;  %v8306_v39 = vld [vmem:[#allocation5 + $0x464] ss:$16 sps:$4 sm:$0xff]   ;;  %v8309_v40 = vld [vmem:[#allocation5 + $0x34c] ss:$16 sps:$4 sm:$0xff]  }
 0x1ab   :  { %2795 = vmatprep.subr.bf16.mxu0 %v8240_v41  ;;  %2932 = vmatprep.subr.bf16.mxu1 %v8243_v42  ;;  %v8304_v41 = vld [vmem:[#allocation5 + $0x460] ss:$16 sps:$4 sm:$0xff]   ;;  %v8307_v42 = vld [vmem:[#allocation5 + $0x348] ss:$16 sps:$4 sm:$0xff]  }
 0x1ae   :  { %2796 = vmatpush1.bf16.msra.mxu0 %v8238_v43  ;;  %2933 = vmatpush1.bf16.msra.mxu1 %v8241_v44  ;;  %v8312_v43 = vld [vmem:[#allocation5 + $0x484] ss:$16 sps:$4 sm:$0xff]   ;;  %v8315_v44 = vld [vmem:[#allocation5 + $0x36c] ss:$16 sps:$4 sm:$0xff]  }
 0x1af   :  { %2797 = vmatprep.subr.bf16.mxu0 %v8246_v45  ;;  %2943 = vmatprep.subr.bf16.mxu1 %v8249_v46  ;;  %v8310_v45 = vld [vmem:[#allocation5 + $0x480] ss:$16 sps:$4 sm:$0xff]   ;;  %v8313_v46 = vld [vmem:[#allocation5 + $0x368] ss:$16 sps:$4 sm:$0xff]  }
 0x1b1   :  { %2935 = vmatmul.mubr.bf16.vlgmr.msra.gmra.mrb[16].mxu1 %v9237_v7  ;;  %v271_v7 = vrot.slane %v9228_v55, %v9242_v1 }
 0x1b2   :  { %2798 = vmatpush1.bf16.msra.mxu0 %v8244_v47  ;;  %2944 = vmatpush1.bf16.msra.mxu1 %v8247_v48  ;;  %v8318_v47 = vld [vmem:[#allocation5 + $0x4a4] ss:$16 sps:$4 sm:$0xff]   ;;  %v8321_v48 = vld [vmem:[#allocation5 + $0x38c] ss:$16 sps:$4 sm:$0xff]  }
 0x1b3   :  { %2799 = vmatprep.subr.bf16.mxu0 %v8252_v49  ;;  %2945 = vmatprep.subr.bf16.mxu1 %v8255_v50  ;;  %v8316_v49 = vld [vmem:[#allocation5 + $0x4a0] ss:$16 sps:$4 sm:$0xff]   ;;  %v8319_v50 = vld [vmem:[#allocation5 + $0x388] ss:$16 sps:$4 sm:$0xff]  }
 0x1b6   :  { %2800 = vmatpush1.bf16.msra.mxu0 %v8250_v52  ;;  %2946 = vmatpush1.bf16.msra.mxu1 %v8253_v53  ;;  %v8324_v52 = vld [vmem:[#allocation5 + $0x4c4] ss:$16 sps:$4 sm:$0xff]   ;;  %v8327_v53 = vld [vmem:[#allocation5 + $0x3ac] ss:$16 sps:$4 sm:$0xff]  }
 0x1b7   :  { %2801 = vmatprep.subr.bf16.mxu0 %v8258_v8  ;;  %2947 = vmatprep.subr.bf16.mxu1 %v8261_v57  ;;  %v8322_v8 = vld [vmem:[#allocation5 + $0x4c0] ss:$16 sps:$4 sm:$0xff]   ;;  %v8325_v57 = vld [vmem:[#allocation5 + $0x3a8] ss:$16 sps:$4 sm:$0xff]  }
 0x1ba   :  { %2802 = vmatpush1.bf16.msra.mxu0 %v8256_v58  ;;  %2948 = vmatpush1.bf16.msra.mxu1 %v8259_v59  ;;  %v8330_v58 = vld [vmem:[#allocation5 + $0x4e4] ss:$16 sps:$4 sm:$0xff]   ;;  %v8333_v59 = vld [vmem:[#allocation5 + $0x3cc] ss:$16 sps:$4 sm:$0xff]  }
 0x1bb   :  { %2803 = vmatprep.subr.bf16.mxu0 %v8264_v60  ;;  %2949 = vmatprep.subr.bf16.mxu1 %v8267_v61  ;;  %v8328_v60 = vld [vmem:[#allocation5 + $0x4e0] ss:$16 sps:$4 sm:$0xff]   ;;  %v8331_v61 = vld [vmem:[#allocation5 + $0x3c8] ss:$16 sps:$4 sm:$0xff]  }
 0x1be   :  { %2804 = vmatpush1.bf16.msra.mxu0 %v8262_v62  ;;  %2950 = vmatpush1.bf16.msra.mxu1 %v8265_v63  ;;  %v8336_v62 = vld [vmem:[#allocation5 + $0x504] ss:$16 sps:$4 sm:$0xff]   ;;  %v8339_v63 = vld [vmem:[#allocation5 + $0x3ec] ss:$16 sps:$4 sm:$0xff]  }
 0x1bf   :  { %2805 = vmatprep.subr.bf16.mxu0 %v8270_v18  ;;  %2951 = vmatprep.subr.bf16.mxu1 %v8273_v0  ;;  %v8334_v18 = vld [vmem:[#allocation5 + $0x500] ss:$16 sps:$4 sm:$0xff]   ;;  %v8337_v0 = vld [vmem:[#allocation5 + $0x3e8] ss:$16 sps:$4 sm:$0xff]  }
 0x1c2   :  { %2806 = vmatpush1.bf16.msra.mxu0 %v8268_v2  ;;  %2952 = vmatpush1.bf16.msra.mxu1 %v8271_v3  ;;  %v8342_v2 = vld [vmem:[#allocation5 + $0x524] ss:$16 sps:$4 sm:$0xff]   ;;  %v8345_v3 = vld [vmem:[#allocation5 + $0x40c] ss:$16 sps:$4 sm:$0xff]  }
 0x1c3   :  { %2807 = vmatprep.subr.bf16.mxu0 %v8276_v5  ;;  %2953 = vmatprep.subr.bf16.mxu1 %v8279_v6  ;;  %v8340_v5 = vld [vmem:[#allocation5 + $0x520] ss:$16 sps:$4 sm:$0xff]   ;;  %v8343_v6 = vld [vmem:[#allocation5 + $0x408] ss:$16 sps:$4 sm:$0xff]  }
 0x1c4   :  { %v1015_v14 = vpop.f32.mrb[4].mxu1 }
 0x1c5   :  { %v1016_v15 = vadd.f32 %v1015_v14, %v271_v7  ;;  %v1017_v16 = vpop.f32.mrb[5].mxu1  ;;  %v8348_v7 = vld [vmem:[#allocation5 + $0x544] ss:$16 sps:$4 sm:$0xff]   ;;  %v8352_v14 = vld [vmem:[#allocation5 + $0x560] ss:$16 sps:$4 sm:$0xff]  }
 0x1c6   :  { %v1018_v17 = vadd.f32 %v1017_v16, %v275_v9  ;;  %v1019_v19 = vpop.f32.mrb[6].mxu1  ;;  %2808 = vmatpush1.bf16.msra.mxu0 %v8274_v10  ;;  %2954 = vmatpush1.bf16.msra.mxu1 %v8277_v11  ;;  %v8351_v9 = vld [vmem:[#allocation5 + $0x42c] ss:$16 sps:$4 sm:$0xff]   ;;  %v8346_v10 = vld [vmem:[#allocation5 + $0x540] ss:$16 sps:$4 sm:$0xff]  }
 0x1c7   :  { %v1106_v22 = vmax.f32 %v1016_v15, 0.0  ;;  %v1020_v23 = vpop.f32.mrb[7].mxu1  ;;  %2809 = vmatprep.subr.bf16.mxu0 %v8282_v12  ;;  %2955 = vmatprep.subr.bf16.mxu1 %v8285_v13  ;;  %v8349_v11 = vld [vmem:[#allocation5 + $0x428] ss:$16 sps:$4 sm:$0xff]   ;;  %v8354_v12 = vld [vmem:[#allocation5 + $0x564] ss:$16 sps:$4 sm:$0xff]  }
 0x1c8   :  { %v1107_v26 = vmax.f32 %v1018_v17, 0.0  ;;  %v8357_v13 = vld [vmem:[#allocation5 + $0x44c] ss:$16 sps:$4 sm:$0xff]   ;;  %v8355_v15 = vld [vmem:[#allocation5 + $0x448] ss:$16 sps:$4 sm:$0xff]   ;;  %v278_v23 = vsub.s32 4, %v9220_v51 }
 0x1c9   :  { %v9251_v27 = vpack.c.bf16 %v1106_v22, %v1106_v22  ;;  %v8360_v16 = vld [vmem:[#allocation5 + $0x584] ss:$16 sps:$4 sm:$0xff]   ;;  %v8363_v17 = vld [vmem:[#allocation5 + $0x46c] ss:$16 sps:$4 sm:$0xff]   ;;  %v8358_v19 = vld [vmem:[#allocation5 + $0x580] ss:$16 sps:$4 sm:$0xff]  }
 0x1ca   :  { %v8014_v28 = vpack.c.bf16 %v1107_v26, %v1107_v26  ;;  %2810 = vmatpush1.bf16.msra.mxu0 %v8280_v20  ;;  %2956 = vmatpush1.bf16.msra.mxu1 %v8283_v21  ;;  %v8361_v20 = vld [vmem:[#allocation5 + $0x468] ss:$16 sps:$4 sm:$0xff]   ;;  %v8366_v21 = vld [vmem:[#allocation5 + $0x5a4] ss:$16 sps:$4 sm:$0xff]   ;;  %v8369_v22 = vld [vmem:[#allocation5 + $0x48c] ss:$16 sps:$4 sm:$0xff]  }
 0x1cb   :  { %2820 = vmatprep.subr.bf16.mxu0 %v8288_v24  ;;  %2957 = vmatprep.subr.bf16.mxu1 %v8291_v25  ;;  %v8364_v24 = vld [vmem:[#allocation5 + $0x5a0] ss:$16 sps:$4 sm:$0xff]   ;;  %v8367_v25 = vld [vmem:[#allocation5 + $0x488] ss:$16 sps:$4 sm:$0xff]   ;;  %v282_v26 = vsub.s32 5, %v9220_v51 }
 0x1cc   :  { %2811 = vmatprep.mubr.bf16.mxu0 %v8014_v28  ;;  %2975 = vmatprep.mubr.bf16.mxu1 %v8014_v28  ;;  %v8375_v28 = vld [vmem:[#allocation5 + $0x4ac] ss:$16 sps:$4 sm:$0xff]  }
 0x1cd   :  { %2812 = vmatmul.mubr.bf16.vlgmr.msra.gmra.mrb[0].mxu0 %v9251_v27 }
 0x1ce   :  { %2821 = vmatpush1.bf16.msra.mxu0 %v8286_v29  ;;  %2958 = vmatpush1.bf16.msra.mxu1 %v8289_v30  ;;  %v279_v29 = vrot.slane %v9228_v55, %v278_v23  ;;  %v283_v30 = vrot.slane %v9228_v55, %v282_v26 }
 0x1cf   :  { %2822 = vmatprep.subr.bf16.mxu0 %v8294_v31  ;;  %2959 = vmatprep.subr.bf16.mxu1 %v8297_v32  ;;  %v8370_v31 = vld [vmem:[#allocation5 + $0x5c0] ss:$16 sps:$4 sm:$0xff]   ;;  %v8373_v32 = vld [vmem:[#allocation5 + $0x4a8] ss:$16 sps:$4 sm:$0xff]  }
 0x1d2   :  { %2823 = vmatpush1.bf16.msra.mxu0 %v8292_v33  ;;  %2960 = vmatpush1.bf16.msra.mxu1 %v8295_v34  ;;  %v8378_v33 = vld [vmem:[#allocation5 + $0x5e4] ss:$16 sps:$4 sm:$0xff]   ;;  %v8381_v34 = vld [vmem:[#allocation5 + $0x4cc] ss:$16 sps:$4 sm:$0xff]  }
 0x1d3   :  { %2824 = vmatprep.subr.bf16.mxu0 %v8300_v35  ;;  %2961 = vmatprep.subr.bf16.mxu1 %v8303_v36 }
 0x1d6   :  { %2825 = vmatpush1.bf16.msra.mxu0 %v8298_v37  ;;  %2962 = vmatpush1.bf16.msra.mxu1 %v8301_v38 }
 0x1d7   :  { %2826 = vmatprep.subr.bf16.mxu0 %v8306_v39  ;;  %2963 = vmatprep.subr.bf16.mxu1 %v8309_v40  ;;  %v8376_v40 = vld [vmem:[#allocation5 + $0x5e0] ss:$16 sps:$4 sm:$0xff]  }
 0x1da   :  { %2827 = vmatpush1.bf16.msra.mxu0 %v8304_v41  ;;  %2964 = vmatpush1.bf16.msra.mxu1 %v8307_v42  ;;  %v8379_v41 = vld [vmem:[#allocation5 + $0x4c8] ss:$16 sps:$4 sm:$0xff]  }
 0x1db   :  { %2828 = vmatprep.subr.bf16.mxu0 %v8312_v43  ;;  %2965 = vmatprep.subr.bf16.mxu1 %v8315_v44  ;;  %v8384_v44 = vld [vmem:[#allocation5 + $0x604] ss:$16 sps:$4 sm:$0xff]  }
 0x1de   :  { %2829 = vmatpush1.bf16.msra.mxu0 %v8310_v45  ;;  %2966 = vmatpush1.bf16.msra.mxu1 %v8313_v46  ;;  %v8387_v45 = vld [vmem:[#allocation5 + $0x4ec] ss:$16 sps:$4 sm:$0xff]  }
 0x1df   :  { %2830 = vmatprep.subr.bf16.mxu0 %v8318_v47  ;;  %2967 = vmatprep.subr.bf16.mxu1 %v8321_v48 }
 0x1e2   :  { %2831 = vmatpush1.bf16.msra.mxu0 %v8316_v49  ;;  %2968 = vmatpush1.bf16.msra.mxu1 %v8319_v50  ;;  %v8382_v49 = vld [vmem:[#allocation5 + $0x600] ss:$16 sps:$4 sm:$0xff]   ;;  %v8385_v50 = vld [vmem:[#allocation5 + $0x4e8] ss:$16 sps:$4 sm:$0xff]  }
 0x1e3   :  { %2832 = vmatprep.subr.bf16.mxu0 %v8324_v52  ;;  %2969 = vmatprep.subr.bf16.mxu1 %v8327_v53  ;;  %v8390_v52 = vld [vmem:[#allocation5 + $0x624] ss:$16 sps:$4 sm:$0xff]   ;;  %v8393_v53 = vld [vmem:[#allocation5 + $0x50c] ss:$16 sps:$4 sm:$0xff]  }
 0x1e6   :  { %2833 = vmatpush1.bf16.msra.mxu0 %v8322_v8  ;;  %2970 = vmatpush1.bf16.msra.mxu1 %v8325_v57  ;;  %v8388_v8 = vld [vmem:[#allocation5 + $0x620] ss:$16 sps:$4 sm:$0xff]   ;;  %v8391_v57 = vld [vmem:[#allocation5 + $0x508] ss:$16 sps:$4 sm:$0xff]  }
 0x1e7   :  { %2834 = vmatprep.subr.bf16.mxu0 %v8330_v58  ;;  %2971 = vmatprep.subr.bf16.mxu1 %v8333_v59  ;;  %v8396_v58 = vld [vmem:[#allocation5 + $0x644] ss:$16 sps:$4 sm:$0xff]   ;;  %v8399_v59 = vld [vmem:[#allocation5 + $0x52c] ss:$16 sps:$4 sm:$0xff]  }
 0x1ea   :  { %2835 = vmatpush1.bf16.msra.mxu0 %v8328_v60  ;;  %2972 = vmatpush1.bf16.msra.mxu1 %v8331_v61  ;;  %v8394_v60 = vld [vmem:[#allocation5 + $0x640] ss:$16 sps:$4 sm:$0xff]   ;;  %v8397_v61 = vld [vmem:[#allocation5 + $0x528] ss:$16 sps:$4 sm:$0xff]  }
 0x1eb   :  { %2836 = vmatprep.subr.bf16.mxu0 %v8336_v62  ;;  %2973 = vmatprep.subr.bf16.mxu1 %v8339_v63  ;;  %v8402_v62 = vld [vmem:[#allocation5 + $0x664] ss:$16 sps:$4 sm:$0xff]   ;;  %v8405_v63 = vld [vmem:[#allocation5 + $0x54c] ss:$16 sps:$4 sm:$0xff]  }
 0x1ee   :  { %2837 = vmatpush1.bf16.msra.mxu0 %v8334_v18  ;;  %2974 = vmatpush1.bf16.msra.mxu1 %v8337_v0  ;;  %v8400_v18 = vld [vmem:[#allocation5 + $0x660] ss:$16 sps:$4 sm:$0xff]   ;;  %v8403_v0 = vld [vmem:[#allocation5 + $0x548] ss:$16 sps:$4 sm:$0xff]  }
 0x1ef   :  { %2838 = vmatprep.subr.bf16.mxu0 %v8342_v2  ;;  %2984 = vmatprep.subr.bf16.mxu1 %v8345_v3  ;;  %v8408_v2 = vld [vmem:[#allocation5 + $0x684] ss:$16 sps:$4 sm:$0xff]   ;;  %v8411_v3 = vld [vmem:[#allocation5 + $0x56c] ss:$16 sps:$4 sm:$0xff]  }
 0x1f1   :  { %2976 = vmatmul.mubr.bf16.vlgmr.msra.gmra.mrb[16].mxu1 %v9251_v27  ;;  %v8372_v27 = vld [vmem:[#allocation5 + $0x5c4] ss:$16 sps:$4 sm:$0xff]  }
 0x1f2   :  { %2839 = vmatpush1.bf16.msra.mxu0 %v8340_v5  ;;  %2985 = vmatpush1.bf16.msra.mxu1 %v8343_v6  ;;  %v8406_v5 = vld [vmem:[#allocation5 + $0x680] ss:$16 sps:$4 sm:$0xff]   ;;  %v8409_v6 = vld [vmem:[#allocation5 + $0x568] ss:$16 sps:$4 sm:$0xff]  }
 0x1f3   :  { %2840 = vmatprep.subr.bf16.mxu0 %v8348_v7  ;;  %2986 = vmatprep.subr.bf16.mxu1 %v8351_v9  ;;  %v8414_v7 = vld [vmem:[#allocation5 + $0x6a4] ss:$16 sps:$4 sm:$0xff]   ;;  %v8417_v9 = vld [vmem:[#allocation5 + $0x58c] ss:$16 sps:$4 sm:$0xff]  }
 0x1f6   :  { %2841 = vmatpush1.bf16.msra.mxu0 %v8346_v10  ;;  %2987 = vmatpush1.bf16.msra.mxu1 %v8349_v11  ;;  %v8412_v10 = vld [vmem:[#allocation5 + $0x6a0] ss:$16 sps:$4 sm:$0xff]   ;;  %v8415_v11 = vld [vmem:[#allocation5 + $0x588] ss:$16 sps:$4 sm:$0xff]  }
 0x1f7   :  { %2842 = vmatprep.subr.bf16.mxu0 %v8354_v12  ;;  %2988 = vmatprep.subr.bf16.mxu1 %v8357_v13  ;;  %v8420_v12 = vld [vmem:[#allocation5 + $0x6c4] ss:$16 sps:$4 sm:$0xff]   ;;  %v8423_v13 = vld [vmem:[#allocation5 + $0x5ac] ss:$16 sps:$4 sm:$0xff]  }
 0x1fa   :  { %2843 = vmatpush1.bf16.msra.mxu0 %v8352_v14  ;;  %2989 = vmatpush1.bf16.msra.mxu1 %v8355_v15  ;;  %v8418_v14 = vld [vmem:[#allocation5 + $0x6c0] ss:$16 sps:$4 sm:$0xff]   ;;  %v8421_v15 = vld [vmem:[#allocation5 + $0x5a8] ss:$16 sps:$4 sm:$0xff]  }
 0x1fb   :  { %2844 = vmatprep.subr.bf16.mxu0 %v8360_v16  ;;  %2990 = vmatprep.subr.bf16.mxu1 %v8363_v17  ;;  %v8426_v16 = vld [vmem:[#allocation5 + $0x6e4] ss:$16 sps:$4 sm:$0xff]   ;;  %v8429_v17 = vld [vmem:[#allocation5 + $0x5cc] ss:$16 sps:$4 sm:$0xff]  }
 0x1fe   :  { %2845 = vmatpush1.bf16.msra.mxu0 %v8358_v19  ;;  %2991 = vmatpush1.bf16.msra.mxu1 %v8361_v20  ;;  %v8424_v19 = vld [vmem:[#allocation5 + $0x6e0] ss:$16 sps:$4 sm:$0xff]   ;;  %v8427_v20 = vld [vmem:[#allocation5 + $0x5c8] ss:$16 sps:$4 sm:$0xff]  }
 0x1ff   :  { %2846 = vmatprep.subr.bf16.mxu0 %v8366_v21  ;;  %2992 = vmatprep.subr.bf16.mxu1 %v8369_v22  ;;  %v8432_v21 = vld [vmem:[#allocation5 + $0x704] ss:$16 sps:$4 sm:$0xff]   ;;  %v8435_v22 = vld [vmem:[#allocation5 + $0x5ec] ss:$16 sps:$4 sm:$0xff]  }
 0x202   :  { %2847 = vmatpush1.bf16.msra.mxu0 %v8364_v24  ;;  %2993 = vmatpush1.bf16.msra.mxu1 %v8367_v25  ;;  %v8430_v24 = vld [vmem:[#allocation5 + $0x700] ss:$16 sps:$4 sm:$0xff]   ;;  %v8433_v25 = vld [vmem:[#allocation5 + $0x5e8] ss:$16 sps:$4 sm:$0xff]  }
 0x203   :  { %2848 = vmatprep.subr.bf16.mxu0 %v8372_v27  ;;  %2994 = vmatprep.subr.bf16.mxu1 %v8375_v28  ;;  %v8438_v27 = vld [vmem:[#allocation5 + $0x724] ss:$16 sps:$4 sm:$0xff]   ;;  %v8441_v28 = vld [vmem:[#allocation5 + $0x60c] ss:$16 sps:$4 sm:$0xff]  }
 0x204   :  { %v1056_v35 = vpop.f32.mrb[8].mxu1 }
 0x205   :  { %v1057_v36 = vadd.f32 %v1056_v35, %v279_v29  ;;  %v1058_v37 = vpop.f32.mrb[9].mxu1  ;;  %v8436_v29 = vld [vmem:[#allocation5 + $0x720] ss:$16 sps:$4 sm:$0xff]   ;;  %v8450_v35 = vld [vmem:[#allocation5 + $0x764] ss:$16 sps:$4 sm:$0xff]  }
 0x206   :  { %v1059_v38 = vadd.f32 %v1058_v37, %v283_v30  ;;  %v1060_v39 = vpop.f32.mrb[10].mxu1  ;;  %2849 = vmatpush1.bf16.msra.mxu0 %v8370_v31  ;;  %2995 = vmatpush1.bf16.msra.mxu1 %v8373_v32  ;;  %v8439_v30 = vld [vmem:[#allocation5 + $0x608] ss:$16 sps:$4 sm:$0xff]   ;;  %v8444_v31 = vld [vmem:[#allocation5 + $0x744] ss:$16 sps:$4 sm:$0xff]  }
 0x207   :  { %v1108_v42 = vmax.f32 %v1057_v36, 0.0  ;;  %v1061_v43 = vpop.f32.mrb[11].mxu1  ;;  %2850 = vmatprep.subr.bf16.mxu0 %v8378_v33  ;;  %2996 = vmatprep.subr.bf16.mxu1 %v8381_v34  ;;  %v8447_v32 = vld [vmem:[#allocation5 + $0x62c] ss:$16 sps:$4 sm:$0xff]   ;;  %v8442_v33 = vld [vmem:[#allocation5 + $0x740] ss:$16 sps:$4 sm:$0xff]  }
 0x208   :  { %v1109_v46 = vmax.f32 %v1059_v38, 0.0  ;;  %v8445_v34 = vld [vmem:[#allocation5 + $0x628] ss:$16 sps:$4 sm:$0xff]   ;;  %v8453_v36 = vld [vmem:[#allocation5 + $0x64c] ss:$16 sps:$4 sm:$0xff]  }
 0x209   :  { %v9263_v47 = vpack.c.bf16 %v1108_v42, %v1108_v42  ;;  %v8448_v37 = vld [vmem:[#allocation5 + $0x760] ss:$16 sps:$4 sm:$0xff]   ;;  %v8451_v38 = vld [vmem:[#allocation5 + $0x648] ss:$16 sps:$4 sm:$0xff]   ;;  %v8456_v39 = vld [vmem:[#allocation5 + $0x784] ss:$16 sps:$4 sm:$0xff]  }
 0x20a   :  { %v8016_v48 = vpack.c.bf16 %v1109_v46, %v1109_v46  ;;  %2851 = vmatpush1.bf16.msra.mxu0 %v8376_v40  ;;  %2997 = vmatpush1.bf16.msra.mxu1 %v8379_v41  ;;  %v8459_v40 = vld [vmem:[#allocation5 + $0x66c] ss:$16 sps:$4 sm:$0xff]   ;;  %v8454_v41 = vld [vmem:[#allocation5 + $0x780] ss:$16 sps:$4 sm:$0xff]   ;;  %v8457_v42 = vld [vmem:[#allocation5 + $0x668] ss:$16 sps:$4 sm:$0xff]  }
 0x20b   :  { %2861 = vmatprep.subr.bf16.mxu0 %v8384_v44  ;;  %2998 = vmatprep.subr.bf16.mxu1 %v8387_v45  ;;  %v8462_v43 = vld [vmem:[#allocation5 + $0x7a4] ss:$16 sps:$4 sm:$0xff]   ;;  %v8465_v44 = vld [vmem:[#allocation5 + $0x68c] ss:$16 sps:$4 sm:$0xff]   ;;  %v286_v45 = vsub.s32 6, %v9220_v51 }
 0x20c   :  { %2852 = vmatprep.mubr.bf16.mxu0 %v8016_v48  ;;  %3016 = vmatprep.mubr.bf16.mxu1 %v8016_v48  ;;  %v8460_v46 = vld [vmem:[#allocation5 + $0x7a0] ss:$16 sps:$4 sm:$0xff]   ;;  %v290_v48 = vsub.s32 7, %v9220_v51 }
 0x20d   :  { %2853 = vmatmul.mubr.bf16.vlgmr.msra.gmra.mrb[0].mxu0 %v9263_v47  ;;  %v6209_v51 = vld [vmem:[%s9414_s12] sm:$0x3] }
 0x20e   :  { %2862 = vmatpush1.bf16.msra.mxu0 %v8382_v49  ;;  %2999 = vmatpush1.bf16.msra.mxu1 %v8385_v50  ;;  %v8468_v49 = vld [vmem:[#allocation5 + $0x7c4] ss:$16 sps:$4 sm:$0xff]   ;;  %v8471_v50 = vld [vmem:[#allocation5 + $0x6ac] ss:$16 sps:$4 sm:$0xff]  }
 0x20f   :  { %2863 = vmatprep.subr.bf16.mxu0 %v8390_v52  ;;  %3000 = vmatprep.subr.bf16.mxu1 %v8393_v53  ;;  %v287_v52 = vrot.slane %v9228_v55, %v286_v45  ;;  %v291_v53 = vrot.slane %v9228_v55, %v290_v48  ;;  %v8480_v55 = vld [vmem:[#allocation5 + $0x6ec] ss:$16 sps:$4 sm:$0xff]  }
 0x212   :  { %2864 = vmatpush1.bf16.msra.mxu0 %v8388_v8  ;;  %3001 = vmatpush1.bf16.msra.mxu1 %v8391_v57  ;;  %v8466_v8 = vld [vmem:[#allocation5 + $0x7c0] ss:$16 sps:$4 sm:$0xff]   ;;  %v8469_v57 = vld [vmem:[#allocation5 + $0x6a8] ss:$16 sps:$4 sm:$0xff]  }
 0x213   :  { %2865 = vmatprep.subr.bf16.mxu0 %v8396_v58  ;;  %3002 = vmatprep.subr.bf16.mxu1 %v8399_v59  ;;  %v8474_v58 = vld [vmem:[#allocation5 + $0x7e4] ss:$16 sps:$4 sm:$0xff]   ;;  %v8477_v59 = vld [vmem:[#allocation5 + $0x6cc] ss:$16 sps:$4 sm:$0xff]  }
 0x216   :  { %2866 = vmatpush1.bf16.msra.mxu0 %v8394_v60  ;;  %3003 = vmatpush1.bf16.msra.mxu1 %v8397_v61 }
 0x217   :  { %2867 = vmatprep.subr.bf16.mxu0 %v8402_v62  ;;  %3004 = vmatprep.subr.bf16.mxu1 %v8405_v63 }
 0x21a   :  { %2868 = vmatpush1.bf16.msra.mxu0 %v8400_v18  ;;  %3005 = vmatpush1.bf16.msra.mxu1 %v8403_v0  ;;  %v8472_v0 = vld [vmem:[#allocation5 + $0x7e0] ss:$16 sps:$4 sm:$0xff]  }
 0x21b   :  { %2869 = vmatprep.subr.bf16.mxu0 %v8408_v2  ;;  %3006 = vmatprep.subr.bf16.mxu1 %v8411_v3  ;;  %v8475_v2 = vld [vmem:[#allocation5 + $0x6c8] ss:$16 sps:$4 sm:$0xff]  }
 0x21e   :  { %2870 = vmatpush1.bf16.msra.mxu0 %v8406_v5  ;;  %3007 = vmatpush1.bf16.msra.mxu1 %v8409_v6  ;;  %v8507_v6 = vld [vmem:[#allocation7 + $0x4] ss:$8 sps:$4 sm:$0xff]  }
 0x21f   :  { %2871 = vmatprep.subr.bf16.mxu0 %v8414_v7  ;;  %3008 = vmatprep.subr.bf16.mxu1 %v8417_v9 }
 0x222   :  { %2872 = vmatpush1.bf16.msra.mxu0 %v8412_v10  ;;  %3009 = vmatpush1.bf16.msra.mxu1 %v8415_v11  ;;  %v8478_v10 = vld [vmem:[#allocation5 + $0x6e8] ss:$16 sps:$4 sm:$0xff]  }
 0x223   :  { %2873 = vmatprep.subr.bf16.mxu0 %v8420_v12  ;;  %3010 = vmatprep.subr.bf16.mxu1 %v8423_v13  ;;  %v8505_v11 = vld [vmem:[#allocation7] ss:$8 sps:$4 sm:$0xff]   ;;  %v8483_v13 = vld [vmem:[#allocation5 + $0x70c] ss:$16 sps:$4 sm:$0xff]  }
 0x226   :  { %2874 = vmatpush1.bf16.msra.mxu0 %v8418_v14  ;;  %3011 = vmatpush1.bf16.msra.mxu1 %v8421_v15  ;;  %v8510_v14 = vld [vmem:[#allocation7 + $0x14] ss:$8 sps:$4 sm:$0xff]   ;;  %v8481_v15 = vld [vmem:[#allocation5 + $0x708] ss:$16 sps:$4 sm:$0xff]  }
 0x227   :  { %2875 = vmatprep.subr.bf16.mxu0 %v8426_v16  ;;  %3012 = vmatprep.subr.bf16.mxu1 %v8429_v17  ;;  %v8508_v16 = vld [vmem:[#allocation7 + $0x10] ss:$8 sps:$4 sm:$0xff]   ;;  %v8486_v17 = vld [vmem:[#allocation5 + $0x72c] ss:$16 sps:$4 sm:$0xff]  }
 0x22a   :  { %2876 = vmatpush1.bf16.msra.mxu0 %v8424_v19  ;;  %3013 = vmatpush1.bf16.msra.mxu1 %v8427_v20  ;;  %v8513_v19 = vld [vmem:[#allocation7 + $0x24] ss:$8 sps:$4 sm:$0xff]   ;;  %v8484_v20 = vld [vmem:[#allocation5 + $0x728] ss:$16 sps:$4 sm:$0xff]  }
 0x22b   :  { %2877 = vmatprep.subr.bf16.mxu0 %v8432_v21  ;;  %3014 = vmatprep.subr.bf16.mxu1 %v8435_v22  ;;  %v8511_v21 = vld [vmem:[#allocation7 + $0x20] ss:$8 sps:$4 sm:$0xff]   ;;  %v8489_v22 = vld [vmem:[#allocation5 + $0x74c] ss:$16 sps:$4 sm:$0xff]  }
 0x22e   :  { %2878 = vmatpush1.bf16.msra.mxu0 %v8430_v24  ;;  %3015 = vmatpush1.bf16.msra.mxu1 %v8433_v25  ;;  %v8516_v24 = vld [vmem:[#allocation7 + $0x34] ss:$8 sps:$4 sm:$0xff]   ;;  %v8487_v25 = vld [vmem:[#allocation5 + $0x748] ss:$16 sps:$4 sm:$0xff]  }
 0x22f   :  { %2879 = vmatprep.subr.bf16.mxu0 %v8438_v27  ;;  %3025 = vmatprep.subr.bf16.mxu1 %v8441_v28  ;;  %v8514_v27 = vld [vmem:[#allocation7 + $0x30] ss:$8 sps:$4 sm:$0xff]   ;;  %v8492_v28 = vld [vmem:[#allocation5 + $0x76c] ss:$16 sps:$4 sm:$0xff]  }
 0x231   :  { %3017 = vmatmul.mubr.bf16.vlgmr.msra.gmra.mrb[16].mxu1 %v9263_v47  ;;  %v8463_v47 = vld [vmem:[#allocation5 + $0x688] ss:$16 sps:$4 sm:$0xff]  }
 0x232   :  { %2880 = vmatpush1.bf16.msra.mxu0 %v8436_v29  ;;  %3026 = vmatpush1.bf16.msra.mxu1 %v8439_v30  ;;  %v8519_v29 = vld [vmem:[#allocation7 + $0x44] ss:$8 sps:$4 sm:$0xff]   ;;  %v8490_v30 = vld [vmem:[#allocation5 + $0x768] ss:$16 sps:$4 sm:$0xff]  }
 0x233   :  { %2881 = vmatprep.subr.bf16.mxu0 %v8444_v31  ;;  %3027 = vmatprep.subr.bf16.mxu1 %v8447_v32  ;;  %v8517_v31 = vld [vmem:[#allocation7 + $0x40] ss:$8 sps:$4 sm:$0xff]   ;;  %v8495_v32 = vld [vmem:[#allocation5 + $0x78c] ss:$16 sps:$4 sm:$0xff]  }
 0x236   :  { %2882 = vmatpush1.bf16.msra.mxu0 %v8442_v33  ;;  %3028 = vmatpush1.bf16.msra.mxu1 %v8445_v34  ;;  %v8522_v33 = vld [vmem:[#allocation7 + $0x54] ss:$8 sps:$4 sm:$0xff]   ;;  %v8493_v34 = vld [vmem:[#allocation5 + $0x788] ss:$16 sps:$4 sm:$0xff]  }
 0x237   :  { %2883 = vmatprep.subr.bf16.mxu0 %v8450_v35  ;;  %3029 = vmatprep.subr.bf16.mxu1 %v8453_v36  ;;  %v8520_v35 = vld [vmem:[#allocation7 + $0x50] ss:$8 sps:$4 sm:$0xff]   ;;  %v8498_v36 = vld [vmem:[#allocation5 + $0x7ac] ss:$16 sps:$4 sm:$0xff]  }
 0x23a   :  { %2884 = vmatpush1.bf16.msra.mxu0 %v8448_v37  ;;  %3030 = vmatpush1.bf16.msra.mxu1 %v8451_v38  ;;  %v8525_v37 = vld [vmem:[#allocation7 + $0x64] ss:$8 sps:$4 sm:$0xff]   ;;  %v8496_v38 = vld [vmem:[#allocation5 + $0x7a8] ss:$16 sps:$4 sm:$0xff]  }
 0x23b   :  { %2885 = vmatprep.subr.bf16.mxu0 %v8456_v39  ;;  %3031 = vmatprep.subr.bf16.mxu1 %v8459_v40  ;;  %v8523_v39 = vld [vmem:[#allocation7 + $0x60] ss:$8 sps:$4 sm:$0xff]   ;;  %v8501_v40 = vld [vmem:[#allocation5 + $0x7cc] ss:$16 sps:$4 sm:$0xff]  }
 0x23e   :  { %2886 = vmatpush1.bf16.msra.mxu0 %v8454_v41  ;;  %3032 = vmatpush1.bf16.msra.mxu1 %v8457_v42  ;;  %v8528_v41 = vld [vmem:[#allocation7 + $0x74] ss:$8 sps:$4 sm:$0xff]   ;;  %v8499_v42 = vld [vmem:[#allocation5 + $0x7c8] ss:$16 sps:$4 sm:$0xff]  }
 0x23f   :  { %2887 = vmatprep.subr.bf16.mxu0 %v8462_v43  ;;  %3033 = vmatprep.subr.bf16.mxu1 %v8465_v44  ;;  %v8526_v43 = vld [vmem:[#allocation7 + $0x70] ss:$8 sps:$4 sm:$0xff]   ;;  %v8504_v44 = vld [vmem:[#allocation5 + $0x7ec] ss:$16 sps:$4 sm:$0xff]  }
 0x242   :  { %2888 = vmatpush1.bf16.msra.mxu0 %v8460_v46  ;;  %3034 = vmatpush1.bf16.msra.mxu1 %v8463_v47  ;;  %v8531_v46 = vld [vmem:[#allocation7 + $0x84] ss:$8 sps:$4 sm:$0xff]   ;;  %v8502_v47 = vld [vmem:[#allocation5 + $0x7e8] ss:$16 sps:$4 sm:$0xff]  }
 0x243   :  { %2889 = vmatprep.subr.bf16.mxu0 %v8468_v49  ;;  %3035 = vmatprep.subr.bf16.mxu1 %v8471_v50  ;;  %v8529_v49 = vld [vmem:[#allocation7 + $0x80] ss:$8 sps:$4 sm:$0xff]   ;;  %v8534_v50 = vld [vmem:[#allocation7 + $0x94] ss:$8 sps:$4 sm:$0xff]  }
 0x244   :  { %v1097_v60 = vpop.f32.mrb[12].mxu1 }
 0x245   :  { %v1098_v61 = vadd.f32 %v1097_v60, %v287_v52  ;;  %v1099_v62 = vpop.f32.mrb[13].mxu1  ;;  %v8532_v52 = vld [vmem:[#allocation7 + $0x90] ss:$8 sps:$4 sm:$0xff]   ;;  %v8541_v60 = vld [vmem:[#allocation7 + $0xc0] ss:$8 sps:$4 sm:$0xff]  }
 0x246   :  { %v1100_v63 = vadd.f32 %v1099_v62, %v291_v53  ;;  %v1101_v18 = vpop.f32.mrb[14].mxu1  ;;  %2890 = vmatpush1.bf16.msra.mxu0 %v8466_v8  ;;  %3036 = vmatpush1.bf16.msra.mxu1 %v8469_v57  ;;  %v8537_v53 = vld [vmem:[#allocation7 + $0xa4] ss:$8 sps:$4 sm:$0xff]   ;;  %v8535_v8 = vld [vmem:[#allocation7 + $0xa0] ss:$8 sps:$4 sm:$0xff]  }
 0x247   :  { %v1110_v3 = vmax.f32 %v1098_v61, 0.0  ;;  %v1102_v5 = vpop.f32.mrb[15].mxu1  ;;  %2891 = vmatprep.subr.bf16.mxu0 %v8474_v58  ;;  %3037 = vmatprep.subr.bf16.mxu1 %v8477_v59  ;;  %v8540_v57 = vld [vmem:[#allocation7 + $0xb4] ss:$8 sps:$4 sm:$0xff]   ;;  %v8538_v58 = vld [vmem:[#allocation7 + $0xb0] ss:$8 sps:$4 sm:$0xff]  }
 0x248   :  { %v1111_v7 = vmax.f32 %v1100_v63, 0.0  ;;  %v8543_v59 = vld [vmem:[#allocation7 + $0xc4] ss:$8 sps:$4 sm:$0xff]   ;;  %v8546_v61 = vld [vmem:[#allocation7 + $0xd4] ss:$8 sps:$4 sm:$0xff]  }
 0x249   :  { %v9275_v12 = vpack.c.bf16 %v1110_v3, %v1110_v3  ;;  %v8544_v62 = vld [vmem:[#allocation7 + $0xd0] ss:$8 sps:$4 sm:$0xff]   ;;  %v8549_v63 = vld [vmem:[#allocation7 + $0xe4] ss:$8 sps:$4 sm:$0xff]   ;;  %v8547_v18 = vld [vmem:[#allocation7 + $0xe0] ss:$8 sps:$4 sm:$0xff]  }
 0x24a   :  { %v8018_v9 = vpack.c.bf16 %v1111_v7, %v1111_v7  ;;  %2892 = vmatpush1.bf16.msra.mxu0 %v8472_v0  ;;  %3038 = vmatpush1.bf16.msra.mxu1 %v8475_v2  ;;  %v8552_v0 = vld [vmem:[#allocation7 + $0xf4] ss:$8 sps:$4 sm:$0xff]   ;;  %v8550_v2 = vld [vmem:[#allocation7 + $0xf0] ss:$8 sps:$4 sm:$0xff]   ;;  %v8555_v3 = vld [vmem:[#allocation7 + $0x104] ss:$8 sps:$4 sm:$0xff]  }
 0x24b   :  { %3039 = vmatprep.subr.bf16.mxu1 %v8480_v55  ;;  %3500 = vmatprep.subr.bf16.mxu0 %v8507_v6  ;;  %v8601_v5 = vld [vmem:[#allocation8] ss:$16 sps:$4 sm:$0xff]   ;;  %v8603_v55 = vld [vmem:[#allocation8 + $0x4] ss:$16 sps:$4 sm:$0xff]  }
 0x24c   :  { %2893 = vmatprep.mubr.bf16.mxu0 %v8018_v9  ;;  %3057 = vmatprep.mubr.bf16.mxu1 %v8018_v9  ;;  %v8606_v6 = vld [vmem:[#allocation8 + $0x24] ss:$16 sps:$4 sm:$0xff]   ;;  %v8604_v7 = vld [vmem:[#allocation8 + $0x20] ss:$16 sps:$4 sm:$0xff]  }
 0x24d   :  { %2894 = vmatmul.mubr.bf16.vlgmr.msra.gmra.mrb[0].mxu0 %v9275_v12  ;;  %v8609_v9 = vld [vmem:[#allocation8 + $0x44] ss:$16 sps:$4 sm:$0xff]  }
 0x24e   :  { %3040 = vmatpush1.bf16.msra.mxu1 %v8478_v10  ;;  %3501 = vmatpush1.bf16.msra.mxu0 %v8505_v11  ;;  %v8607_v10 = vld [vmem:[#allocation8 + $0x40] ss:$16 sps:$4 sm:$0xff]   ;;  %v8612_v11 = vld [vmem:[#allocation8 + $0x64] ss:$16 sps:$4 sm:$0xff]  }
 0x24f   :  { %3041 = vmatprep.subr.bf16.mxu1 %v8483_v13  ;;  %3502 = vmatprep.subr.bf16.mxu0 %v8510_v14  ;;  %v8615_v13 = vld [vmem:[#allocation8 + $0x84] ss:$16 sps:$4 sm:$0xff]   ;;  %v8613_v14 = vld [vmem:[#allocation8 + $0x80] ss:$16 sps:$4 sm:$0xff]  }
 0x252   :  { %3042 = vmatpush1.bf16.msra.mxu1 %v8481_v15  ;;  %3503 = vmatpush1.bf16.msra.mxu0 %v8508_v16  ;;  %v8618_v15 = vld [vmem:[#allocation8 + $0xa4] ss:$16 sps:$4 sm:$0xff]   ;;  %v8616_v16 = vld [vmem:[#allocation8 + $0xa0] ss:$16 sps:$4 sm:$0xff]  }
 0x253   :  { %3043 = vmatprep.subr.bf16.mxu1 %v8486_v17  ;;  %3504 = vmatprep.subr.bf16.mxu0 %v8513_v19  ;;  %v8621_v17 = vld [vmem:[#allocation8 + $0xc4] ss:$16 sps:$4 sm:$0xff]   ;;  %v8619_v19 = vld [vmem:[#allocation8 + $0xc0] ss:$16 sps:$4 sm:$0xff]  }
 0x256   :  { %3044 = vmatpush1.bf16.msra.mxu1 %v8484_v20  ;;  %3505 = vmatpush1.bf16.msra.mxu0 %v8511_v21  ;;  %v8624_v20 = vld [vmem:[#allocation8 + $0xe4] ss:$16 sps:$4 sm:$0xff]   ;;  %v8622_v21 = vld [vmem:[#allocation8 + $0xe0] ss:$16 sps:$4 sm:$0xff]  }
 0x257   :  { %3045 = vmatprep.subr.bf16.mxu1 %v8489_v22  ;;  %3506 = vmatprep.subr.bf16.mxu0 %v8516_v24  ;;  %v8627_v22 = vld [vmem:[#allocation8 + $0x104] ss:$16 sps:$4 sm:$0xff]   ;;  %v8625_v24 = vld [vmem:[#allocation8 + $0x100] ss:$16 sps:$4 sm:$0xff]  }
 0x25a   :  { %3046 = vmatpush1.bf16.msra.mxu1 %v8487_v25  ;;  %3507 = vmatpush1.bf16.msra.mxu0 %v8514_v27  ;;  %v8630_v25 = vld [vmem:[#allocation8 + $0x124] ss:$16 sps:$4 sm:$0xff]   ;;  %v8628_v27 = vld [vmem:[#allocation8 + $0x120] ss:$16 sps:$4 sm:$0xff]  }
 0x25b   :  { %3047 = vmatprep.subr.bf16.mxu1 %v8492_v28  ;;  %3508 = vmatprep.subr.bf16.mxu0 %v8519_v29  ;;  %v8633_v28 = vld [vmem:[#allocation8 + $0x144] ss:$16 sps:$4 sm:$0xff]   ;;  %v8631_v29 = vld [vmem:[#allocation8 + $0x140] ss:$16 sps:$4 sm:$0xff]  }
 0x25e   :  { %3048 = vmatpush1.bf16.msra.mxu1 %v8490_v30  ;;  %3509 = vmatpush1.bf16.msra.mxu0 %v8517_v31  ;;  %v8636_v30 = vld [vmem:[#allocation8 + $0x164] ss:$16 sps:$4 sm:$0xff]   ;;  %v8634_v31 = vld [vmem:[#allocation8 + $0x160] ss:$16 sps:$4 sm:$0xff]  }
 0x25f   :  { %3049 = vmatprep.subr.bf16.mxu1 %v8495_v32  ;;  %3510 = vmatprep.subr.bf16.mxu0 %v8522_v33  ;;  %v8639_v32 = vld [vmem:[#allocation8 + $0x184] ss:$16 sps:$4 sm:$0xff]   ;;  %v8637_v33 = vld [vmem:[#allocation8 + $0x180] ss:$16 sps:$4 sm:$0xff]  }
 0x262   :  { %3050 = vmatpush1.bf16.msra.mxu1 %v8493_v34  ;;  %3511 = vmatpush1.bf16.msra.mxu0 %v8520_v35  ;;  %v8642_v34 = vld [vmem:[#allocation8 + $0x1a4] ss:$16 sps:$4 sm:$0xff]   ;;  %v9282_v35 = vld [vmem:[%s9410_s8] sm:$0xf] }
 0x263   :  { %3051 = vmatprep.subr.bf16.mxu1 %v8498_v36  ;;  %3512 = vmatprep.subr.bf16.mxu0 %v8525_v37  ;;  %v8640_v36 = vld [vmem:[#allocation8 + $0x1a0] ss:$16 sps:$4 sm:$0xff]   ;;  %v1413_v37 = vrot.slane %v9282_v35, %v9223_v54 }
 0x266   :  { %3052 = vmatpush1.bf16.msra.mxu1 %v8496_v38  ;;  %3513 = vmatpush1.bf16.msra.mxu0 %v8523_v39  ;;  %v1417_v38 = vrot.slane %v9282_v35, %v9231_v56 }
 0x267   :  { %3053 = vmatprep.subr.bf16.mxu1 %v8501_v40  ;;  %3514 = vmatprep.subr.bf16.mxu0 %v8528_v41 }
 0x26a   :  { %3054 = vmatpush1.bf16.msra.mxu1 %v8499_v42  ;;  %3515 = vmatpush1.bf16.msra.mxu0 %v8526_v43 }
 0x26b   :  { %3055 = vmatprep.subr.bf16.mxu1 %v8504_v44  ;;  %3516 = vmatprep.subr.bf16.mxu0 %v8531_v46 }
 0x26e   :  { %3056 = vmatpush1.bf16.msra.mxu1 %v8502_v47  ;;  %3517 = vmatpush1.bf16.msra.mxu0 %v8529_v49 }
 0x26f   :  { %3518 = vmatprep.subr.bf16.mxu0 %v8534_v50  ;;  %4007 = vmatprep.subr.bf16.mxu1 %v8603_v55  ;;  %v8553_v50 = vld [vmem:[#allocation7 + $0x100] ss:$8 sps:$4 sm:$0xff]   ;;  %v1425_v55 = vrot.slane %v9282_v35, %v9245_v4 }
 0x271   :  { %3058 = vmatmul.mubr.bf16.vlgmr.msra.gmra.mrb[16].mxu1 %v9275_v12  ;;  %v8610_v12 = vld [vmem:[#allocation8 + $0x60] ss:$16 sps:$4 sm:$0xff]  }
 0x272   :  { %3519 = vmatpush1.bf16.msra.mxu0 %v8532_v52  ;;  %4008 = vmatpush1.bf16.msra.mxu1 %v8601_v5  ;;  %v8574_v5 = vld [vmem:[#allocation7 + $0x170] ss:$8 sps:$4 sm:$0xff]  }
 0x273   :  { %3520 = vmatprep.subr.bf16.mxu0 %v8537_v53  ;;  %4009 = vmatprep.subr.bf16.mxu1 %v8606_v6  ;;  %v8558_v53 = vld [vmem:[#allocation7 + $0x114] ss:$8 sps:$4 sm:$0xff]   ;;  %v8579_v6 = vld [vmem:[#allocation7 + $0x184] ss:$8 sps:$4 sm:$0xff]  }
 0x276   :  { %3521 = vmatpush1.bf16.msra.mxu0 %v8535_v8  ;;  %4010 = vmatpush1.bf16.msra.mxu1 %v8604_v7  ;;  %v8556_v8 = vld [vmem:[#allocation7 + $0x110] ss:$8 sps:$4 sm:$0xff]  }
 0x277   :  { %3522 = vmatprep.subr.bf16.mxu0 %v8540_v57  ;;  %4011 = vmatprep.subr.bf16.mxu1 %v8609_v9  ;;  %v8561_v57 = vld [vmem:[#allocation7 + $0x124] ss:$8 sps:$4 sm:$0xff]  }
 0x27a   :  { %3523 = vmatpush1.bf16.msra.mxu0 %v8538_v58  ;;  %4012 = vmatpush1.bf16.msra.mxu1 %v8607_v10  ;;  %v8559_v58 = vld [vmem:[#allocation7 + $0x120] ss:$8 sps:$4 sm:$0xff]  }
 0x27b   :  { %3524 = vmatprep.subr.bf16.mxu0 %v8543_v59  ;;  %4013 = vmatprep.subr.bf16.mxu1 %v8612_v11  ;;  %v8564_v59 = vld [vmem:[#allocation7 + $0x134] ss:$8 sps:$4 sm:$0xff]  }
 0x27e   :  { %3525 = vmatpush1.bf16.msra.mxu0 %v8541_v60  ;;  %4014 = vmatpush1.bf16.msra.mxu1 %v8610_v12  ;;  %v8562_v60 = vld [vmem:[#allocation7 + $0x130] ss:$8 sps:$4 sm:$0xff]   ;;  %v8577_v12 = vld [vmem:[#allocation7 + $0x180] ss:$8 sps:$4 sm:$0xff]  }
 0x27f   :  { %3526 = vmatprep.subr.bf16.mxu0 %v8546_v61  ;;  %4015 = vmatprep.subr.bf16.mxu1 %v8615_v13  ;;  %v8567_v61 = vld [vmem:[#allocation7 + $0x144] ss:$8 sps:$4 sm:$0xff]  }
 0x282   :  { %3527 = vmatpush1.bf16.msra.mxu0 %v8544_v62  ;;  %4016 = vmatpush1.bf16.msra.mxu1 %v8613_v14  ;;  %v8565_v62 = vld [vmem:[#allocation7 + $0x140] ss:$8 sps:$4 sm:$0xff]   ;;  %v8582_v14 = vld [vmem:[#allocation7 + $0x194] ss:$8 sps:$4 sm:$0xff]  }
 0x283   :  { %3528 = vmatprep.subr.bf16.mxu0 %v8549_v63  ;;  %4017 = vmatprep.subr.bf16.mxu1 %v8618_v15  ;;  %v8570_v63 = vld [vmem:[#allocation7 + $0x154] ss:$8 sps:$4 sm:$0xff]  }
 0x286   :  { %3529 = vmatpush1.bf16.msra.mxu0 %v8547_v18  ;;  %4018 = vmatpush1.bf16.msra.mxu1 %v8616_v16  ;;  %v8568_v18 = vld [vmem:[#allocation7 + $0x150] ss:$8 sps:$4 sm:$0xff]  }
 0x287   :  { %3530 = vmatprep.subr.bf16.mxu0 %v8552_v0  ;;  %4019 = vmatprep.subr.bf16.mxu1 %v8621_v17  ;;  %v8573_v0 = vld [vmem:[#allocation7 + $0x164] ss:$8 sps:$4 sm:$0xff]   ;;  %v8580_v17 = vld [vmem:[#allocation7 + $0x190] ss:$8 sps:$4 sm:$0xff]  }
 0x28a   :  { %3531 = vmatpush1.bf16.msra.mxu0 %v8550_v2  ;;  %4020 = vmatpush1.bf16.msra.mxu1 %v8619_v19  ;;  %v8571_v2 = vld [vmem:[#allocation7 + $0x160] ss:$8 sps:$4 sm:$0xff]   ;;  %v8585_v19 = vld [vmem:[#allocation7 + $0x1a4] ss:$8 sps:$4 sm:$0xff]  }
 0x28b   :  { %3541 = vmatprep.subr.bf16.mxu0 %v8555_v3  ;;  %4021 = vmatprep.subr.bf16.mxu1 %v8624_v20  ;;  %v8576_v3 = vld [vmem:[#allocation7 + $0x174] ss:$8 sps:$4 sm:$0xff]   ;;  %v8583_v20 = vld [vmem:[#allocation7 + $0x1a0] ss:$8 sps:$4 sm:$0xff]  }
 0x28e   :  { %4022 = vmatpush1.bf16.msra.mxu1 %v8622_v21  ;;  %v8588_v21 = vld [vmem:[#allocation7 + $0x1b4] ss:$8 sps:$4 sm:$0xff]  }
 0x28f   :  { %4023 = vmatprep.subr.bf16.mxu1 %v8627_v22  ;;  %v8586_v22 = vld [vmem:[#allocation7 + $0x1b0] ss:$8 sps:$4 sm:$0xff]  }
 0x292   :  { %4024 = vmatpush1.bf16.msra.mxu1 %v8625_v24  ;;  %v8591_v24 = vld [vmem:[#allocation7 + $0x1c4] ss:$8 sps:$4 sm:$0xff]  }
 0x293   :  { %4025 = vmatprep.subr.bf16.mxu1 %v8630_v25  ;;  %v8589_v25 = vld [vmem:[#allocation7 + $0x1c0] ss:$8 sps:$4 sm:$0xff]  }
 0x296   :  { %4026 = vmatpush1.bf16.msra.mxu1 %v8628_v27  ;;  %v8594_v27 = vld [vmem:[#allocation7 + $0x1d4] ss:$8 sps:$4 sm:$0xff]  }
 0x297   :  { %4027 = vmatprep.subr.bf16.mxu1 %v8633_v28  ;;  %v8592_v28 = vld [vmem:[#allocation7 + $0x1d0] ss:$8 sps:$4 sm:$0xff]  }
 0x29a   :  { %4028 = vmatpush1.bf16.msra.mxu1 %v8631_v29  ;;  %v1421_v29 = vrot.slane %v9282_v35, %v9242_v1  ;;  %v8646_v35 = vld [vmem:[#allocation8 + $0x1e0] ss:$16 sps:$4 sm:$0xff]  }
 0x29b   :  { %4029 = vmatprep.subr.bf16.mxu1 %v8636_v30  ;;  %v8597_v30 = vld [vmem:[#allocation7 + $0x1e4] ss:$8 sps:$4 sm:$0xff]  }
 0x29e   :  { %4030 = vmatpush1.bf16.msra.mxu1 %v8634_v31  ;;  %v8595_v31 = vld [vmem:[#allocation7 + $0x1e0] ss:$8 sps:$4 sm:$0xff]  }
 0x29f   :  { %4031 = vmatprep.subr.bf16.mxu1 %v8639_v32 }
 0x2a2   :  { %4032 = vmatpush1.bf16.msra.mxu1 %v8637_v33  ;;  %v8600_v33 = vld [vmem:[#allocation7 + $0x1f4] ss:$8 sps:$4 sm:$0xff]  }
 0x2a3   :  { %4033 = vmatprep.subr.bf16.mxu1 %v8642_v34  ;;  %v8598_v34 = vld [vmem:[#allocation7 + $0x1f0] ss:$8 sps:$4 sm:$0xff]  }
 0x2a6   :  { %4034 = vmatpush1.bf16.msra.mxu1 %v8640_v36 }
 0x320   :  { %v2895_v39 = vpop.f32.mrb[0].mxu0 }
 0x321   :  { %v8037_v40 = vadd.f32 %v2895_v39, %v1413_v37  ;;  %v2897_v41 = vpop.f32.mrb[1].mxu0  ;;  %v8643_v39 = vld [vmem:[#allocation8 + $0x1c0] ss:$16 sps:$4 sm:$0xff]  }
 0x322   :  { %v8038_v42 = vadd.f32 %v2897_v41, %v1417_v38  ;;  %v2899_v43 = vpop.f32.mrb[2].mxu0  ;;  %v8645_v38 = vld [vmem:[#allocation8 + $0x1c4] ss:$16 sps:$4 sm:$0xff]   ;;  %v8651_v41 = vld [vmem:[#allocation8 + $0xc] ss:$16 sps:$4 sm:$0xff]  }
 0x323   :  { %v3066_v44 = vmax.f32 %v8037_v40, 0.0  ;;  %v2900_v46 = vpop.f32.mrb[3].mxu0  ;;  %4035 = vmatprep.subr.bf16.mxu1 %v8645_v38  ;;  %v8648_v40 = vld [vmem:[#allocation8 + $0x1e4] ss:$16 sps:$4 sm:$0xff]  }
 0x324   :  { %v3067_v47 = vmax.f32 %v8038_v42, 0.0  ;;  %4036 = vmatpush1.bf16.msra.mxu1 %v8643_v39  ;;  %v4113_v42 = vld [vmem:[#allocation10] sm:$0xff] }
 0x325   :  { %v8019_v52 = vpack.c.bf16 %v3066_v44, %v3066_v44  ;;  %4037 = vmatprep.subr.bf16.mxu1 %v8648_v40  ;;  %v4117_v43 = vld [vmem:[#allocation10 + $0x20] sm:$0xff] }
 0x326   :  { %v8020_v49 = vpack.c.bf16 %v3067_v47, %v3067_v47  ;;  %v7602_v44 = vcombine.low %v4113_v42, %v4117_v43  ;;  %v7603_v46 = vcombine.high %v4113_v42, %v4117_v43  ;;  %v4121_v47 = vld [vmem:[#allocation10 + $0x40] sm:$0xff] }
 0x327   :  { %v3154_v40 = vld [vmem:[%s9411_s9] sm:$0x3] }
 0x328   :  { %3532 = vmatprep.mubr.bf16.mxu0 %v8020_v49  ;;  %4038 = vmatpush1.bf16.msra.mxu1 %v8646_v35  ;;  %v4125_v49 = vld [vmem:[#allocation10 + $0x60] sm:$0xff]  ;;  %v3159_v43 = vrot.slane %v3154_v40, %v9223_v54 }
 0x329   :  { %3533 = vmatmul.mubr.bf16.vlgmr.msra.gmra.mrb[4].mxu0 %v8019_v52  ;;  %4048 = vmatprep.subr.bf16.mxu1 %v8651_v41  ;;  %v7610_v52 = vcombine.low %v4121_v47, %v4125_v49  ;;  %v4217_v35 = vld [vmem:[#allocation10 + $0x340] sm:$0xff] }
 0x32a   :  { %3542 = vmatpush1.bf16.msra.mxu0 %v8553_v50  ;;  %v7611_v50 = vcombine.high %v4121_v47, %v4125_v49  ;;  %v4221_v41 = vld [vmem:[#allocation10 + $0x360] sm:$0xff] }
 0x32b   :  { %3543 = vmatprep.subr.bf16.mxu0 %v8558_v53  ;;  %v4129_v53 = vld [vmem:[#allocation10 + $0x80] sm:$0xff]  ;;  %v7707_v42 = vcombine.high %v4217_v35, %v4221_v41 }
 0x32e   :  { %3544 = vmatpush1.bf16.msra.mxu0 %v8556_v8  ;;  %v4133_v8 = vld [vmem:[#allocation10 + $0xa0] sm:$0xff] }
 0x32f   :  { %3545 = vmatprep.subr.bf16.mxu0 %v8561_v57  ;;  %v7619_v57 = vcombine.high %v4129_v53, %v4133_v8 }
 0x332   :  { %3546 = vmatpush1.bf16.msra.mxu0 %v8559_v58  ;;  %v7618_v58 = vcombine.low %v4129_v53, %v4133_v8 }
 0x333   :  { %3547 = vmatprep.subr.bf16.mxu0 %v8564_v59  ;;  %v4137_v59 = vld [vmem:[#allocation10 + $0xc0] sm:$0xff] }
 0x336   :  { %3548 = vmatpush1.bf16.msra.mxu0 %v8562_v60  ;;  %v4141_v60 = vld [vmem:[#allocation10 + $0xe0] sm:$0xff] }
 0x337   :  { %3549 = vmatprep.subr.bf16.mxu0 %v8567_v61  ;;  %v7627_v61 = vcombine.high %v4137_v59, %v4141_v60 }
 0x33a   :  { %3550 = vmatpush1.bf16.msra.mxu0 %v8565_v62  ;;  %v7626_v62 = vcombine.low %v4137_v59, %v4141_v60  ;;  %v8649_v60 = vld [vmem:[#allocation8 + $0x8] ss:$16 sps:$4 sm:$0xff]  }
 0x33b   :  { %3551 = vmatprep.subr.bf16.mxu0 %v8570_v63  ;;  %v4145_v63 = vld [vmem:[#allocation10 + $0x100] sm:$0xff] }
 0x33e   :  { %3552 = vmatpush1.bf16.msra.mxu0 %v8568_v18  ;;  %v4149_v18 = vld [vmem:[#allocation10 + $0x120] sm:$0xff] }
 0x33f   :  { %3553 = vmatprep.subr.bf16.mxu0 %v8573_v0  ;;  %v7635_v0 = vcombine.high %v4145_v63, %v4149_v18 }
 0x342   :  { %3554 = vmatpush1.bf16.msra.mxu0 %v8571_v2  ;;  %v7634_v2 = vcombine.low %v4145_v63, %v4149_v18  ;;  %v8652_v63 = vld [vmem:[#allocation8 + $0x28] ss:$16 sps:$4 sm:$0xff]   ;;  %v8657_v18 = vld [vmem:[#allocation8 + $0x4c] ss:$16 sps:$4 sm:$0xff]  }
 0x343   :  { %3555 = vmatprep.subr.bf16.mxu0 %v8576_v3  ;;  %v4153_v3 = vld [vmem:[#allocation10 + $0x140] sm:$0xff] }
 0x344   :  { %v3059_v7 = vpop.f32.mrb[16].mxu1 }
 0x345   :  { %v3061_v9 = vpop.f32.mrb[17].mxu1  ;;  %v8039_v32 = vadd.f32 %v3059_v7, %v1421_v29  ;;  %v4161_v7 = vld [vmem:[#allocation10 + $0x180] sm:$0xff] }
 0x346   :  { %v8040_v10 = vadd.f32 %v3061_v9, %v1425_v55  ;;  %3556 = vmatpush1.bf16.msra.mxu0 %v8574_v5  ;;  %v3063_v11 = vpop.f32.mrb[18].mxu1  ;;  %v4157_v5 = vld [vmem:[#allocation10 + $0x160] sm:$0xff] }
 0x347   :  { %v3064_v13 = vpop.f32.mrb[19].mxu1  ;;  %3557 = vmatprep.subr.bf16.mxu0 %v8579_v6  ;;  %v3068_v36 = vmax.f32 %v8039_v32, 0.0  ;;  %v7643_v55 = vcombine.high %v4153_v3, %v4157_v5  ;;  %v7642_v6 = vcombine.low %v4153_v3, %v4157_v5  ;;  %v4165_v9 = vld [vmem:[#allocation10 + $0x1a0] sm:$0xff]  ;;  %v8658_v3 = vld [vmem:[#allocation8 + $0x68] ss:$16 sps:$4 sm:$0xff]  }
 0x348   :  { %v3069_v15 = vmax.f32 %v8040_v10, 0.0  ;;  %v7651_v10 = vcombine.high %v4161_v7, %v4165_v9  ;;  %v7650_v11 = vcombine.low %v4161_v7, %v4165_v9  ;;  %v4173_v13 = vld [vmem:[#allocation10 + $0x1e0] sm:$0xff]  ;;  %v8663_v5 = vld [vmem:[#allocation8 + $0x8c] ss:$16 sps:$4 sm:$0xff]   ;;  %v8664_v7 = vld [vmem:[#allocation8 + $0xa8] ss:$16 sps:$4 sm:$0xff]  }
 0x349   :  { %v8021_v37 = vpack.c.bf16 %v3068_v36, %v3068_v36  ;;  %v4205_v32 = vld [vmem:[#allocation10 + $0x2e0] sm:$0xff]  ;;  %v8669_v9 = vld [vmem:[#allocation8 + $0xcc] ss:$16 sps:$4 sm:$0xff]  }
 0x34a   :  { %v8022_v16 = vpack.c.bf16 %v3069_v15, %v3069_v15  ;;  %3558 = vmatpush1.bf16.msra.mxu0 %v8577_v12  ;;  %v4169_v12 = vld [vmem:[#allocation10 + $0x1c0] sm:$0xff] }
 0x34b   :  { %3559 = vmatprep.subr.bf16.mxu0 %v8582_v14  ;;  %v7659_v14 = vcombine.high %v4169_v12, %v4173_v13  ;;  %v7658_v15 = vcombine.low %v4169_v12, %v4173_v13  ;;  %v4209_v36 = vld [vmem:[#allocation10 + $0x300] sm:$0xff]  ;;  %v8670_v12 = vld [vmem:[#allocation8 + $0xe8] ss:$16 sps:$4 sm:$0xff]   ;;  %v8675_v13 = vld [vmem:[#allocation8 + $0x10c] ss:$16 sps:$4 sm:$0xff]  }
 0x34c   :  { %3573 = vmatprep.mubr.bf16.mxu0 %v8022_v16  ;;  %v4177_v16 = vld [vmem:[#allocation10 + $0x200] sm:$0xff] }
 0x34e   :  { %3560 = vmatpush1.bf16.msra.mxu0 %v8580_v17  ;;  %v4181_v17 = vld [vmem:[#allocation10 + $0x220] sm:$0xff] }
 0x34f   :  { %3561 = vmatprep.subr.bf16.mxu0 %v8585_v19  ;;  %v7667_v19 = vcombine.high %v4177_v16, %v4181_v17 }
 0x352   :  { %3562 = vmatpush1.bf16.msra.mxu0 %v8583_v20  ;;  %v7666_v20 = vcombine.low %v4177_v16, %v4181_v17  ;;  %v8676_v16 = vld [vmem:[#allocation8 + $0x128] ss:$16 sps:$4 sm:$0xff]   ;;  %v8681_v17 = vld [vmem:[#allocation8 + $0x14c] ss:$16 sps:$4 sm:$0xff]  }
 0x353   :  { %3563 = vmatprep.subr.bf16.mxu0 %v8588_v21  ;;  %v4185_v21 = vld [vmem:[#allocation10 + $0x240] sm:$0xff] }
 0x356   :  { %3564 = vmatpush1.bf16.msra.mxu0 %v8586_v22  ;;  %v4189_v22 = vld [vmem:[#allocation10 + $0x260] sm:$0xff] }
 0x357   :  { %3565 = vmatprep.subr.bf16.mxu0 %v8591_v24  ;;  %v7675_v24 = vcombine.high %v4185_v21, %v4189_v22 }
 0x35a   :  { %3566 = vmatpush1.bf16.msra.mxu0 %v8589_v25  ;;  %v7674_v25 = vcombine.low %v4185_v21, %v4189_v22  ;;  %v8682_v21 = vld [vmem:[#allocation8 + $0x168] ss:$16 sps:$4 sm:$0xff]   ;;  %v8687_v22 = vld [vmem:[#allocation8 + $0x18c] ss:$16 sps:$4 sm:$0xff]  }
 0x35b   :  { %3567 = vmatprep.subr.bf16.mxu0 %v8594_v27  ;;  %v4193_v27 = vld [vmem:[#allocation10 + $0x280] sm:$0xff] }
 0x35e   :  { %3568 = vmatpush1.bf16.msra.mxu0 %v8592_v28  ;;  %v4197_v28 = vld [vmem:[#allocation10 + $0x2a0] sm:$0xff] }
 0x35f   :  { %3569 = vmatprep.subr.bf16.mxu0 %v8597_v30  ;;  %v7683_v29 = vcombine.high %v4193_v27, %v4197_v28  ;;  %v7682_v30 = vcombine.low %v4193_v27, %v4197_v28  ;;  %v8688_v27 = vld [vmem:[#allocation8 + $0x1a8] ss:$16 sps:$4 sm:$0xff]   ;;  %v8693_v28 = vld [vmem:[#allocation8 + $0x1cc] ss:$16 sps:$4 sm:$0xff]  }
 0x362   :  { %3570 = vmatpush1.bf16.msra.mxu0 %v8595_v31  ;;  %v4201_v31 = vld [vmem:[#allocation10 + $0x2c0] sm:$0xff] }
 0x363   :  { %3571 = vmatprep.subr.bf16.mxu0 %v8600_v33  ;;  %v7691_v33 = vcombine.high %v4201_v31, %v4205_v32 }
 0x366   :  { %3572 = vmatpush1.bf16.msra.mxu0 %v8598_v34  ;;  %v7690_v34 = vcombine.low %v4201_v31, %v4205_v32  ;;  %v4114_v31 = vld [vmem:[#allocation10 + $0x8] sm:$0xff] }
 0x367   :  { %5705 = vmatprep.subr.bf16.mxu0 %v7603_v46  ;;  %v3163_v46 = vrot.slane %v3154_v40, %v9231_v56  ;;  %v4118_v32 = vld [vmem:[#allocation10 + $0x28] sm:$0xff] }
 0x368   :  { %v4130_v40 = vld [vmem:[#allocation10 + $0x88] sm:$0xff] }
 0x369   :  { %3574 = vmatmul.mubr.bf16.vlgmr.msra.gmra.mrb[4].mxu0 %v8021_v37  ;;  %v4213_v37 = vld [vmem:[#allocation10 + $0x320] sm:$0xff] }
 0x36a   :  { %5706 = vmatpush1.bf16.msra.mxu0 %v7602_v44  ;;  %v7699_v38 = vcombine.high %v4209_v36, %v4213_v37  ;;  %v7698_v39 = vcombine.low %v4209_v36, %v4213_v37  ;;  %v7706_v44 = vcombine.low %v4217_v35, %v4221_v41  ;;  %v4122_v36 = vld [vmem:[#allocation10 + $0x48] sm:$0xff] }
 0x36b   :  { %5707 = vmatprep.subr.bf16.mxu0 %v7611_v50  ;;  %v4126_v37 = vld [vmem:[#allocation10 + $0x68] sm:$0xff] }
 0x36c   :  { %v4134_v35 = vld [vmem:[#allocation10 + $0xa8] sm:$0xff]  ;;  %v7612_v41 = vcombine.low %v4122_v36, %v4126_v37 }
 0x36e   :  { %5708 = vmatpush1.bf16.msra.mxu0 %v7610_v52 }
 0x36f   :  { %5709 = vmatprep.subr.bf16.mxu0 %v7619_v57 }
 0x372   :  { %5710 = vmatpush1.bf16.msra.mxu0 %v7618_v58 }
 0x373   :  { %5711 = vmatprep.subr.bf16.mxu0 %v7627_v61 }
 0x376   :  { %5712 = vmatpush1.bf16.msra.mxu0 %v7626_v62  ;;  %v8654_v62 = vld [vmem:[#allocation8 + $0x2c] ss:$16 sps:$4 sm:$0xff]  }
 0x377   :  { %5713 = vmatprep.subr.bf16.mxu0 %v7635_v0  ;;  %v8655_v0 = vld [vmem:[#allocation8 + $0x48] ss:$16 sps:$4 sm:$0xff]  }
 0x37a   :  { %5714 = vmatpush1.bf16.msra.mxu0 %v7634_v2  ;;  %v8660_v2 = vld [vmem:[#allocation8 + $0x6c] ss:$16 sps:$4 sm:$0xff]  }
 0x37b   :  { %5715 = vmatprep.subr.bf16.mxu0 %v7643_v55  ;;  %v8661_v55 = vld [vmem:[#allocation8 + $0x88] ss:$16 sps:$4 sm:$0xff]  }
 0x37e   :  { %5716 = vmatpush1.bf16.msra.mxu0 %v7642_v6  ;;  %v8666_v6 = vld [vmem:[#allocation8 + $0xac] ss:$16 sps:$4 sm:$0xff]  }
 0x37f   :  { %5717 = vmatprep.subr.bf16.mxu0 %v7651_v10  ;;  %v8667_v10 = vld [vmem:[#allocation8 + $0xc8] ss:$16 sps:$4 sm:$0xff]  }
 0x382   :  { %5718 = vmatpush1.bf16.msra.mxu0 %v7650_v11  ;;  %v8672_v11 = vld [vmem:[#allocation8 + $0xec] ss:$16 sps:$4 sm:$0xff]  }
 0x383   :  { %5719 = vmatprep.subr.bf16.mxu0 %v7659_v14  ;;  %v8673_v14 = vld [vmem:[#allocation8 + $0x108] ss:$16 sps:$4 sm:$0xff]  }
 0x386   :  { %5720 = vmatpush1.bf16.msra.mxu0 %v7658_v15  ;;  %v8678_v15 = vld [vmem:[#allocation8 + $0x12c] ss:$16 sps:$4 sm:$0xff]  }
 0x387   :  { %5721 = vmatprep.subr.bf16.mxu0 %v7667_v19  ;;  %v8679_v19 = vld [vmem:[#allocation8 + $0x148] ss:$16 sps:$4 sm:$0xff]  }
 0x38a   :  { %5722 = vmatpush1.bf16.msra.mxu0 %v7666_v20  ;;  %v8684_v20 = vld [vmem:[#allocation8 + $0x16c] ss:$16 sps:$4 sm:$0xff]  }
 0x38b   :  { %5723 = vmatprep.subr.bf16.mxu0 %v7675_v24  ;;  %v8685_v24 = vld [vmem:[#allocation8 + $0x188] ss:$16 sps:$4 sm:$0xff]  }
 0x38e   :  { %5724 = vmatpush1.bf16.msra.mxu0 %v7674_v25  ;;  %v8690_v25 = vld [vmem:[#allocation8 + $0x1ac] ss:$16 sps:$4 sm:$0xff]  }
 0x38f   :  { %5725 = vmatprep.subr.bf16.mxu0 %v7683_v29  ;;  %v8691_v29 = vld [vmem:[#allocation8 + $0x1c8] ss:$16 sps:$4 sm:$0xff]  }
 0x392   :  { %5726 = vmatpush1.bf16.msra.mxu0 %v7682_v30  ;;  %v8696_v30 = vld [vmem:[#allocation8 + $0x1ec] ss:$16 sps:$4 sm:$0xff]  }
 0x393   :  { %5727 = vmatprep.subr.bf16.mxu0 %v7691_v33  ;;  %v8694_v33 = vld [vmem:[#allocation8 + $0x1e8] ss:$16 sps:$4 sm:$0xff]  }
 0x396   :  { %5728 = vmatpush1.bf16.msra.mxu0 %v7690_v34  ;;  %v7605_v34 = vcombine.high %v4114_v31, %v4118_v32 }
 0x397   :  { %5729 = vmatprep.subr.bf16.mxu0 %v7699_v38  ;;  %v7604_v38 = vcombine.low %v4114_v31, %v4118_v32  ;;  %v4194_v31 = vld [vmem:[#allocation10 + $0x288] sm:$0xff] }
 0x398   :  { %v4198_v32 = vld [vmem:[#allocation10 + $0x2a8] sm:$0xff] }
 0x39a   :  { %5730 = vmatpush1.bf16.msra.mxu0 %v7698_v39  ;;  %v7613_v39 = vcombine.high %v4122_v36, %v4126_v37  ;;  %v4202_v36 = vld [vmem:[#allocation10 + $0x2c8] sm:$0xff] }
 0x39b   :  { %5731 = vmatprep.subr.bf16.mxu0 %v7707_v42  ;;  %v7621_v42 = vcombine.high %v4130_v40, %v4134_v35  ;;  %v4206_v37 = vld [vmem:[#allocation10 + $0x2e8] sm:$0xff] }
 0x39e   :  { %5732 = vmatpush1.bf16.msra.mxu0 %v7706_v44  ;;  %v4142_v44 = vld [vmem:[#allocation10 + $0xe8] sm:$0xff] }
 0x43c   :  { %v3575_v47 = vpop.f32.mrb[4].mxu0 }
 0x43d   :  { %v8041_v49 = vadd.f32 %v3575_v47, %v3159_v43  ;;  %v3577_v50 = vpop.f32.mrb[5].mxu0  ;;  %v4138_v43 = vld [vmem:[#allocation10 + $0xc8] sm:$0xff] }
 0x43e   :  { %v8042_v52 = vadd.f32 %v3577_v50, %v3163_v46  ;;  %v3579_v53 = vpop.f32.mrb[6].mxu0  ;;  %v7620_v46 = vcombine.low %v4130_v40, %v4134_v35  ;;  %v7629_v47 = vcombine.high %v4138_v43, %v4142_v44  ;;  %v4150_v50 = vld [vmem:[#allocation10 + $0x128] sm:$0xff] }
 0x43f   :  { %v3582_v8 = vmax.f32 %v8041_v49, 0.0  ;;  %v3580_v57 = vpop.f32.mrb[7].mxu0  ;;  %v4146_v49 = vld [vmem:[#allocation10 + $0x108] sm:$0xff] }
 0x440   :  { %v3583_v58 = vmax.f32 %v8042_v52, 0.0  ;;  %v7628_v52 = vcombine.low %v4138_v43, %v4142_v44  ;;  %v7637_v53 = vcombine.high %v4146_v49, %v4150_v50  ;;  %v4158_v57 = vld [vmem:[#allocation10 + $0x168] sm:$0xff] }
 0x441   :  { %v9297_v61 = vpack.c.bf16 %v3582_v8, %v3582_v8  ;;  %v4154_v8 = vld [vmem:[#allocation10 + $0x148] sm:$0xff] }
 0x442   :  { %v8024_v59 = vpack.c.bf16 %v3583_v58, %v3583_v58  ;;  %v7636_v58 = vcombine.low %v4146_v49, %v4150_v50  ;;  %v4210_v40 = vld [vmem:[#allocation10 + $0x308] sm:$0xff] }
 0x443   :  { %v4214_v35 = vld [vmem:[#allocation10 + $0x328] sm:$0xff] }
 0x444   :  { %4039 = vmatprep.mubr.bf16.mxu1 %v8024_v59  ;;  %v4218_v43 = vld [vmem:[#allocation10 + $0x348] sm:$0xff] }
 0x445   :  { %4040 = vmatmul.mubr.bf16.vlgmr.msra.gmra.mrb[20].mxu1 %v9297_v61  ;;  %v4222_v44 = vld [vmem:[#allocation10 + $0x368] sm:$0xff] }
 0x446   :  { %4049 = vmatpush1.bf16.msra.mxu1 %v8649_v60  ;;  %4080 = vmatprep.mubr.bf16.mxu1 %v8024_v59  ;;  %v7645_v59 = vcombine.high %v4154_v8, %v4158_v57  ;;  %v4162_v60 = vld [vmem:[#allocation10 + $0x188] sm:$0xff] }
 0x447   :  { %4050 = vmatprep.subr.bf16.mxu1 %v8654_v62  ;;  %v7644_v62 = vcombine.low %v4154_v8, %v4158_v57  ;;  %v4226_v49 = vld [vmem:[#allocation10 + $0x388] sm:$0xff] }
 0x448   :  { %v4230_v50 = vld [vmem:[#allocation10 + $0x3a8] sm:$0xff] }
 0x449   :  { %v4234_v8 = vld [vmem:[#allocation10 + $0x3c8] sm:$0xff] }
 0x44a   :  { %4051 = vmatpush1.bf16.msra.mxu1 %v8652_v63  ;;  %v4225_v63 = vld [vmem:[#allocation10 + $0x380] sm:$0xff]  ;;  %v4238_v57 = vld [vmem:[#allocation10 + $0x3e8] sm:$0xff] }
 0x44b   :  { %4052 = vmatprep.subr.bf16.mxu1 %v8657_v18  ;;  %v4229_v18 = vld [vmem:[#allocation10 + $0x3a0] sm:$0xff] }
 0x44e   :  { %4053 = vmatpush1.bf16.msra.mxu1 %v8655_v0 }
 0x44f   :  { %4054 = vmatprep.subr.bf16.mxu1 %v8660_v2  ;;  %v7715_v2 = vcombine.high %v4225_v63, %v4229_v18 }
 0x451   :  { %5733 = vmatprep.subr.bf16.mxu0 %v7715_v2 }
 0x452   :  { %4055 = vmatpush1.bf16.msra.mxu1 %v8658_v3  ;;  %v4170_v3 = vld [vmem:[#allocation10 + $0x1c8] sm:$0xff] }
 0x453   :  { %4056 = vmatprep.subr.bf16.mxu1 %v8663_v5  ;;  %v4174_v5 = vld [vmem:[#allocation10 + $0x1e8] sm:$0xff] }
 0x456   :  { %4057 = vmatpush1.bf16.msra.mxu1 %v8661_v55  ;;  %v7714_v55 = vcombine.low %v4225_v63, %v4229_v18 }
 0x457   :  { %4058 = vmatprep.subr.bf16.mxu1 %v8666_v6 }
 0x458   :  { %5734 = vmatpush1.bf16.msra.mxu0 %v7714_v55 }
 0x45a   :  { %4059 = vmatpush1.bf16.msra.mxu1 %v8664_v7  ;;  %v4233_v7 = vld [vmem:[#allocation10 + $0x3c0] sm:$0xff] }
 0x45b   :  { %4060 = vmatprep.subr.bf16.mxu1 %v8669_v9  ;;  %v4237_v9 = vld [vmem:[#allocation10 + $0x3e0] sm:$0xff] }
 0x45e   :  { %4061 = vmatpush1.bf16.msra.mxu1 %v8667_v10  ;;  %v7661_v10 = vcombine.high %v4170_v3, %v4174_v5 }
 0x45f   :  { %4062 = vmatprep.subr.bf16.mxu1 %v8672_v11  ;;  %v7723_v11 = vcombine.high %v4233_v7, %v4237_v9 }
 0x461   :  { %5735 = vmatprep.subr.bf16.mxu0 %v7723_v11  ;;  %v4253_v11 = vld [vmem:[#allocation10 + $0x460] sm:$0xff] }
 0x462   :  { %4063 = vmatpush1.bf16.msra.mxu1 %v8670_v12  ;;  %v4178_v12 = vld [vmem:[#allocation10 + $0x208] sm:$0xff] }
 0x463   :  { %4064 = vmatprep.subr.bf16.mxu1 %v8675_v13  ;;  %v4182_v13 = vld [vmem:[#allocation10 + $0x228] sm:$0xff] }
 0x466   :  { %4065 = vmatpush1.bf16.msra.mxu1 %v8673_v14  ;;  %v7722_v14 = vcombine.low %v4233_v7, %v4237_v9  ;;  %v4249_v9 = vld [vmem:[#allocation10 + $0x440] sm:$0xff] }
 0x467   :  { %4066 = vmatprep.subr.bf16.mxu1 %v8678_v15  ;;  %v7660_v15 = vcombine.low %v4170_v3, %v4174_v5 }
 0x468   :  { %5736 = vmatpush1.bf16.msra.mxu0 %v7722_v14 }
 0x46a   :  { %4067 = vmatpush1.bf16.msra.mxu1 %v8676_v16  ;;  %v9301_v16 = vld [vmem:[#allocation10 + $0x400] sm:$0xff] }
 0x46b   :  { %4068 = vmatprep.subr.bf16.mxu1 %v8681_v17  ;;  %v9303_v17 = vld [vmem:[#allocation10 + $0x420] sm:$0xff] }
 0x46e   :  { %4069 = vmatpush1.bf16.msra.mxu1 %v8679_v19  ;;  %v9305_v19 = vld [vmem:[#allocation10 + $0x408] sm:$0xff] }
 0x46f   :  { %4070 = vmatprep.subr.bf16.mxu1 %v8684_v20  ;;  %v7669_v20 = vcombine.high %v4178_v12, %v4182_v13 }
 0x472   :  { %4071 = vmatpush1.bf16.msra.mxu1 %v8682_v21  ;;  %v7731_v21 = vcombine.high %v9301_v16, %v9303_v17 }
 0x473   :  { %4072 = vmatprep.subr.bf16.mxu1 %v8687_v22  ;;  %v9309_v22 = vld [vmem:[#allocation10 + $0x428] sm:$0xff] }
 0x474   :  { %5746 = vmatprep.subr.bf16.mxu0 %v7731_v21 }
 0x476   :  { %4073 = vmatpush1.bf16.msra.mxu1 %v8685_v24  ;;  %v4186_v24 = vld [vmem:[#allocation10 + $0x248] sm:$0xff] }
 0x477   :  { %4074 = vmatprep.subr.bf16.mxu1 %v8690_v25  ;;  %v4190_v25 = vld [vmem:[#allocation10 + $0x268] sm:$0xff] }
 0x47a   :  { %4075 = vmatpush1.bf16.msra.mxu1 %v8688_v27  ;;  %v7730_v27 = vcombine.low %v9301_v16, %v9303_v17 }
 0x47b   :  { %4076 = vmatprep.subr.bf16.mxu1 %v8693_v28  ;;  %v7732_v28 = vcombine.low %v9305_v19, %v9309_v22 }
 0x47e   :  { %4077 = vmatpush1.bf16.msra.mxu1 %v8691_v29  ;;  %v7668_v29 = vcombine.low %v4178_v12, %v4182_v13  ;;  %v4250_v12 = vld [vmem:[#allocation10 + $0x448] sm:$0xff] }
 0x47f   :  { %4078 = vmatprep.subr.bf16.mxu1 %v8696_v30  ;;  %v7677_v30 = vcombine.high %v4186_v24, %v4190_v25  ;;  %v4254_v13 = vld [vmem:[#allocation10 + $0x468] sm:$0xff] }
 0x480   :  { %v7741_v21 = vcombine.high %v4250_v12, %v4254_v13 }
 0x482   :  { %4079 = vmatpush1.bf16.msra.mxu1 %v8694_v33  ;;  %v7676_v33 = vcombine.low %v4186_v24, %v4190_v25  ;;  %v4257_v24 = vld [vmem:[#allocation10 + $0x480] sm:$0xff] }
 0x483   :  { %5787 = vmatprep.subr.bf16.mxu1 %v7605_v34  ;;  %v7685_v34 = vcombine.high %v4194_v31, %v4198_v32  ;;  %v4261_v25 = vld [vmem:[#allocation10 + $0x4a0] sm:$0xff] }
 0x485   :  { %4081 = vmatmul.mubr.bf16.vlgmr.msra.gmra.mrb[24].mxu1 %v9297_v61  ;;  %v4166_v61 = vld [vmem:[#allocation10 + $0x1a8] sm:$0xff] }
 0x486   :  { %5788 = vmatpush1.bf16.msra.mxu1 %v7604_v38  ;;  %v7653_v0 = vcombine.high %v4162_v60, %v4166_v61  ;;  %v7652_v6 = vcombine.low %v4162_v60, %v4166_v61  ;;  %v7684_v38 = vcombine.low %v4194_v31, %v4198_v32  ;;  %v7724_v60 = vcombine.low %v4234_v8, %v4238_v57 }
 0x487   :  { %5789 = vmatprep.subr.bf16.mxu1 %v7613_v39  ;;  %v7693_v39 = vcombine.high %v4202_v36, %v4206_v37  ;;  %v7733_v61 = vcombine.high %v9305_v19, %v9309_v22  ;;  %v7738_v31 = vcombine.low %v4249_v9, %v4253_v11  ;;  %v7740_v32 = vcombine.low %v4250_v12, %v4254_v13  ;;  %v4273_v19 = vld [vmem:[#allocation10 + $0x500] sm:$0xff] }
 0x488   :  { %v4277_v22 = vld [vmem:[#allocation10 + $0x520] sm:$0xff] }
 0x489   :  { %v4305_v12 = vld [vmem:[#allocation10 + $0x600] sm:$0xff] }
 0x48a   :  { %5790 = vmatpush1.bf16.msra.mxu1 %v7612_v41  ;;  %v7692_v41 = vcombine.low %v4202_v36, %v4206_v37  ;;  %v4265_v36 = vld [vmem:[#allocation10 + $0x4c0] sm:$0xff] }
 0x48b   :  { %5791 = vmatprep.subr.bf16.mxu1 %v7621_v42  ;;  %v7701_v42 = vcombine.high %v4210_v40, %v4214_v35  ;;  %v4269_v37 = vld [vmem:[#allocation10 + $0x4e0] sm:$0xff] }
 0x48c   :  { %v7755_v16 = vcombine.high %v4265_v36, %v4269_v37  ;;  %v4309_v13 = vld [vmem:[#allocation10 + $0x620] sm:$0xff] }
 0x48e   :  { %5792 = vmatpush1.bf16.msra.mxu1 %v7620_v46  ;;  %v7700_v46 = vcombine.low %v4210_v40, %v4214_v35  ;;  %v7746_v40 = vcombine.low %v4257_v24, %v4261_v25 }
 0x48f   :  { %5793 = vmatprep.subr.bf16.mxu1 %v7629_v47  ;;  %v7709_v47 = vcombine.high %v4218_v43, %v4222_v44 }
 0x492   :  { %5794 = vmatpush1.bf16.msra.mxu1 %v7628_v52  ;;  %v7708_v52 = vcombine.low %v4218_v43, %v4222_v44  ;;  %v7763_v43 = vcombine.high %v4273_v19, %v4277_v22 }
 0x493   :  { %5795 = vmatprep.subr.bf16.mxu1 %v7637_v53  ;;  %v7717_v53 = vcombine.high %v4226_v49, %v4230_v50 }
 0x496   :  { %5796 = vmatpush1.bf16.msra.mxu1 %v7636_v58  ;;  %v7716_v58 = vcombine.low %v4226_v49, %v4230_v50  ;;  %v4282_v49 = vld [vmem:[#allocation10 + $0x548] sm:$0xff] }
 0x497   :  { %5797 = vmatprep.subr.bf16.mxu1 %v7645_v59  ;;  %v7725_v59 = vcombine.high %v4234_v8, %v4238_v57  ;;  %v4286_v50 = vld [vmem:[#allocation10 + $0x568] sm:$0xff] }
 0x498   :  { %v7773_v57 = vcombine.high %v4282_v49, %v4286_v50 }
 0x49a   :  { %5798 = vmatpush1.bf16.msra.mxu1 %v7644_v62  ;;  %v9320_v62 = vld [vmem:[%s9412_s10] sm:$0xf] }
 0x49b   :  { %5799 = vmatprep.subr.bf16.mxu1 %v7653_v0  ;;  %v3663_v63 = vrot.slane %v9320_v62, %v9223_v54  ;;  %v3667_v18 = vrot.slane %v9320_v62, %v9231_v56 }
 0x49e   :  { %5800 = vmatpush1.bf16.msra.mxu1 %v7652_v6 }
 0x49f   :  { %5801 = vmatprep.subr.bf16.mxu1 %v7661_v10 }
 0x4a2   :  { %5802 = vmatpush1.bf16.msra.mxu1 %v7660_v15 }
 0x4a3   :  { %5803 = vmatprep.subr.bf16.mxu1 %v7669_v20  ;;  %v7739_v20 = vcombine.high %v4249_v9, %v4253_v11 }
 0x4a6   :  { %5804 = vmatpush1.bf16.msra.mxu1 %v7668_v29  ;;  %v4258_v29 = vld [vmem:[#allocation10 + $0x488] sm:$0xff] }
 0x4a7   :  { %5805 = vmatprep.subr.bf16.mxu1 %v7677_v30  ;;  %v4262_v30 = vld [vmem:[#allocation10 + $0x4a8] sm:$0xff] }
 0x4a8   :  { %v7748_v35 = vcombine.low %v4258_v29, %v4262_v30 }
 0x4aa   :  { %5806 = vmatpush1.bf16.msra.mxu1 %v7676_v33  ;;  %v7747_v33 = vcombine.high %v4257_v24, %v4261_v25 }
 0x4ab   :  { %5807 = vmatprep.subr.bf16.mxu1 %v7685_v34  ;;  %v7749_v34 = vcombine.high %v4258_v29, %v4262_v30  ;;  %v7795_v29 = vcombine.high %v4305_v12, %v4309_v13 }
 0x4ae   :  { %5808 = vmatpush1.bf16.msra.mxu1 %v7684_v38  ;;  %v4266_v38 = vld [vmem:[#allocation10 + $0x4c8] sm:$0xff] }
 0x4af   :  { %5809 = vmatprep.subr.bf16.mxu1 %v7693_v39  ;;  %v4270_v39 = vld [vmem:[#allocation10 + $0x4e8] sm:$0xff] }
 0x4b0   :  { %v7757_v17 = vcombine.high %v4266_v38, %v4270_v39 }
 0x4b2   :  { %5810 = vmatpush1.bf16.msra.mxu1 %v7692_v41  ;;  %v7754_v41 = vcombine.low %v4265_v36, %v4269_v37  ;;  %v7794_v36 = vcombine.low %v4305_v12, %v4309_v13 }
 0x4b3   :  { %5811 = vmatprep.subr.bf16.mxu1 %v7701_v42  ;;  %v7756_v42 = vcombine.low %v4266_v38, %v4270_v39 }
 0x4b6   :  { %5812 = vmatpush1.bf16.msra.mxu1 %v7700_v46  ;;  %v4281_v46 = vld [vmem:[#allocation10 + $0x540] sm:$0xff] }
 0x4b7   :  { %5813 = vmatprep.subr.bf16.mxu1 %v7709_v47  ;;  %v4285_v47 = vld [vmem:[#allocation10 + $0x560] sm:$0xff] }
 0x4b8   :  { %v7771_v8 = vcombine.high %v4281_v46, %v4285_v47 }
 0x4ba   :  { %5814 = vmatpush1.bf16.msra.mxu1 %v7708_v52  ;;  %v7762_v52 = vcombine.low %v4273_v19, %v4277_v22 }
 0x4bb   :  { %5815 = vmatprep.subr.bf16.mxu1 %v7717_v53 }
 0x4be   :  { %5816 = vmatpush1.bf16.msra.mxu1 %v7716_v58  ;;  %v4289_v58 = vld [vmem:[#allocation10 + $0x580] sm:$0xff] }
 0x4bf   :  { %5817 = vmatprep.subr.bf16.mxu1 %v7725_v59  ;;  %v4293_v59 = vld [vmem:[#allocation10 + $0x5a0] sm:$0xff] }
 0x4c2   :  { %5818 = vmatpush1.bf16.msra.mxu1 %v7724_v60  ;;  %v4290_v60 = vld [vmem:[#allocation10 + $0x588] sm:$0xff] }
 0x4c3   :  { %5828 = vmatprep.subr.bf16.mxu1 %v7733_v61  ;;  %v4294_v61 = vld [vmem:[#allocation10 + $0x5a8] sm:$0xff] }
 0x4c4   :  { %v7780_v9 = vcombine.low %v4290_v60, %v4294_v61 }
 0x518   :  { %v4041_v0 = vpop.f32.mrb[20].mxu1 }
 0x519   :  { %v4042_v2 = vadd.f32 %v4041_v0, %v3663_v63  ;;  %v4043_v3 = vpop.f32.mrb[21].mxu1  ;;  %v7770_v63 = vcombine.low %v4281_v46, %v4285_v47  ;;  %v7779_v0 = vcombine.high %v4289_v58, %v4293_v59 }
 0x51a   :  { %v4044_v5 = vadd.f32 %v4043_v3, %v3667_v18  ;;  %v4045_v55 = vpop.f32.mrb[22].mxu1  ;;  %v7772_v18 = vcombine.low %v4282_v49, %v4286_v50  ;;  %v4297_v3 = vld [vmem:[#allocation10 + $0x5c0] sm:$0xff] }
 0x51b   :  { %v4089_v6 = vmax.f32 %v4042_v2, 0.0  ;;  %v4046_v7 = vpop.f32.mrb[23].mxu1  ;;  %v7781_v2 = vcombine.high %v4290_v60, %v4294_v61  ;;  %v4298_v55 = vld [vmem:[#allocation10 + $0x5c8] sm:$0xff] }
 0x51c   :  { %v4090_v10 = vmax.f32 %v4044_v5, 0.0  ;;  %v4301_v5 = vld [vmem:[#allocation10 + $0x5e0] sm:$0xff]  ;;  %v7778_v7 = vcombine.low %v4289_v58, %v4293_v59 }
 0x51d   :  { %v9328_v15 = vpack.c.bf16 %v4089_v6, %v4089_v6  ;;  %v4302_v6 = vld [vmem:[#allocation10 + $0x5e8] sm:$0xff]  ;;  %v7786_v24 = vcombine.low %v4297_v3, %v4301_v5 }
 0x51e   :  { %v9326_v14 = vpack.c.bf16 %v4090_v10, %v4090_v10  ;;  %v7787_v10 = vcombine.high %v4297_v3, %v4301_v5  ;;  %v7789_v11 = vcombine.high %v4298_v55, %v4302_v6  ;;  %v7788_v25 = vcombine.low %v4298_v55, %v4302_v6 }
 0x520   :  { %5737 = vmatprep.mubr.bf16.mxu0 %v9326_v14  ;;  %5819 = vmatprep.mubr.bf16.mxu1 %v9326_v14 }
 0x521   :  { %5738 = vmatmul.mubr.bf16.vlgmr.msra.gmra.mrb[8].mxu0 %v9328_v15  ;;  %5820 = vmatmul.mubr.bf16.vlgmr.msra.gmra.mrb[28].mxu1 %v9328_v15 }
 0x522   :  { %5747 = vmatpush1.bf16.msra.mxu0 %v7730_v27  ;;  %5829 = vmatpush1.bf16.msra.mxu1 %v7732_v28  ;;  %v4274_v27 = vld [vmem:[#allocation10 + $0x508] sm:$0xff] }
 0x523   :  { %5748 = vmatprep.subr.bf16.mxu0 %v7739_v20  ;;  %5830 = vmatprep.subr.bf16.mxu1 %v7741_v21  ;;  %v4278_v28 = vld [vmem:[#allocation10 + $0x528] sm:$0xff] }
 0x524   :  { %v7765_v44 = vcombine.high %v4274_v27, %v4278_v28  ;;  %v7764_v53 = vcombine.low %v4274_v27, %v4278_v28  ;;  %v4306_v20 = vld [vmem:[#allocation10 + $0x608] sm:$0xff] }
 0x525   :  { %v4310_v21 = vld [vmem:[#allocation10 + $0x628] sm:$0xff] }
 0x526   :  { %5749 = vmatpush1.bf16.msra.mxu0 %v7738_v31  ;;  %5831 = vmatpush1.bf16.msra.mxu1 %v7740_v32  ;;  %v7797_v30 = vcombine.high %v4306_v20, %v4310_v21  ;;  %v4313_v31 = vld [vmem:[#allocation10 + $0x640] sm:$0xff]  ;;  %v7796_v37 = vcombine.low %v4306_v20, %v4310_v21 }
 0x527   :  { %5750 = vmatprep.subr.bf16.mxu0 %v7747_v33  ;;  %5832 = vmatprep.subr.bf16.mxu1 %v7749_v34  ;;  %v4317_v32 = vld [vmem:[#allocation10 + $0x660] sm:$0xff]  ;;  %v4314_v33 = vld [vmem:[#allocation10 + $0x648] sm:$0xff] }
 0x528   :  { %v4318_v34 = vld [vmem:[#allocation10 + $0x668] sm:$0xff]  ;;  %v7803_v38 = vcombine.high %v4313_v31, %v4317_v32  ;;  %v7802_v19 = vcombine.low %v4313_v31, %v4317_v32  ;;  %v3671_v31 = vrot.slane %v9320_v62, %v9242_v1  ;;  %v3675_v32 = vrot.slane %v9320_v62, %v9245_v4 }
 0x529   :  { %v7805_v39 = vcombine.high %v4314_v33, %v4318_v34  ;;  %v7804_v22 = vcombine.low %v4314_v33, %v4318_v34 }
 0x52a   :  { %5751 = vmatpush1.bf16.msra.mxu0 %v7746_v40  ;;  %5833 = vmatpush1.bf16.msra.mxu1 %v7748_v35  ;;  %v4321_v40 = vld [vmem:[#allocation10 + $0x680] sm:$0xff] }
 0x52b   :  { %5752 = vmatprep.subr.bf16.mxu0 %v7755_v16  ;;  %5834 = vmatprep.subr.bf16.mxu1 %v7757_v17  ;;  %v4325_v35 = vld [vmem:[#allocation10 + $0x6a0] sm:$0xff]  ;;  %v4322_v16 = vld [vmem:[#allocation10 + $0x688] sm:$0xff] }
 0x52c   :  { %v4326_v17 = vld [vmem:[#allocation10 + $0x6a8] sm:$0xff]  ;;  %v7811_v27 = vcombine.high %v4321_v40, %v4325_v35  ;;  %v7810_v46 = vcombine.low %v4321_v40, %v4325_v35  ;;  %v4119_v40 = vld [vmem:[#allocation10 + $0x30] sm:$0xff]  ;;  %v4116_v35 = vld [vmem:[#allocation10 + $0x18] sm:$0xff] }
 0x52d   :  { %v7813_v28 = vcombine.high %v4322_v16, %v4326_v17  ;;  %v7812_v47 = vcombine.low %v4322_v16, %v4326_v17  ;;  %v4120_v16 = vld [vmem:[#allocation10 + $0x38] sm:$0xff] }
 0x52e   :  { %5753 = vmatpush1.bf16.msra.mxu0 %v7754_v41  ;;  %5835 = vmatpush1.bf16.msra.mxu1 %v7756_v42  ;;  %v4329_v41 = vld [vmem:[#allocation10 + $0x6c0] sm:$0xff] }
 0x52f   :  { %5754 = vmatprep.subr.bf16.mxu0 %v7763_v43  ;;  %5836 = vmatprep.subr.bf16.mxu1 %v7765_v44  ;;  %v4333_v42 = vld [vmem:[#allocation10 + $0x6e0] sm:$0xff]  ;;  %v4330_v43 = vld [vmem:[#allocation10 + $0x6c8] sm:$0xff] }
 0x530   :  { %v4334_v44 = vld [vmem:[#allocation10 + $0x6e8] sm:$0xff]  ;;  %v7819_v49 = vcombine.high %v4329_v41, %v4333_v42  ;;  %v7818_v58 = vcombine.low %v4329_v41, %v4333_v42 }
 0x531   :  { %v7821_v50 = vcombine.high %v4330_v43, %v4334_v44  ;;  %v7820_v59 = vcombine.low %v4330_v43, %v4334_v44  ;;  %v7609_v44 = vcombine.high %v4116_v35, %v4120_v16 }
 0x532   :  { %5755 = vmatpush1.bf16.msra.mxu0 %v7762_v52  ;;  %5837 = vmatpush1.bf16.msra.mxu1 %v7764_v53  ;;  %v4337_v52 = vld [vmem:[#allocation10 + $0x700] sm:$0xff] }
 0x533   :  { %5756 = vmatprep.subr.bf16.mxu0 %v7771_v8  ;;  %5838 = vmatprep.subr.bf16.mxu1 %v7773_v57  ;;  %v4341_v53 = vld [vmem:[#allocation10 + $0x720] sm:$0xff]  ;;  %v4338_v8 = vld [vmem:[#allocation10 + $0x708] sm:$0xff] }
 0x534   :  { %v4342_v57 = vld [vmem:[#allocation10 + $0x728] sm:$0xff]  ;;  %v7827_v60 = vcombine.high %v4337_v52, %v4341_v53  ;;  %v7826_v3 = vcombine.low %v4337_v52, %v4341_v53  ;;  %v4128_v52 = vld [vmem:[#allocation10 + $0x78] sm:$0xff] }
 0x535   :  { %v7829_v61 = vcombine.high %v4338_v8, %v4342_v57  ;;  %v7828_v5 = vcombine.low %v4338_v8, %v4342_v57 }
 0x536   :  { %5757 = vmatpush1.bf16.msra.mxu0 %v7770_v63  ;;  %5839 = vmatpush1.bf16.msra.mxu1 %v7772_v18  ;;  %v4345_v63 = vld [vmem:[#allocation10 + $0x740] sm:$0xff] }
 0x537   :  { %5758 = vmatprep.subr.bf16.mxu0 %v7779_v0  ;;  %5840 = vmatprep.subr.bf16.mxu1 %v7781_v2  ;;  %v4349_v18 = vld [vmem:[#allocation10 + $0x760] sm:$0xff]  ;;  %v4346_v0 = vld [vmem:[#allocation10 + $0x748] sm:$0xff] }
 0x538   :  { %v4350_v2 = vld [vmem:[#allocation10 + $0x768] sm:$0xff]  ;;  %v7835_v55 = vcombine.high %v4345_v63, %v4349_v18  ;;  %v7834_v12 = vcombine.low %v4345_v63, %v4349_v18  ;;  %v4135_v63 = vld [vmem:[#allocation10 + $0xb0] sm:$0xff]  ;;  %v4132_v18 = vld [vmem:[#allocation10 + $0x98] sm:$0xff] }
 0x539   :  { %v7837_v6 = vcombine.high %v4346_v0, %v4350_v2  ;;  %v7836_v13 = vcombine.low %v4346_v0, %v4350_v2  ;;  %v4136_v0 = vld [vmem:[#allocation10 + $0xb8] sm:$0xff] }
 0x53a   :  { %5759 = vmatpush1.bf16.msra.mxu0 %v7778_v7  ;;  %5841 = vmatpush1.bf16.msra.mxu1 %v7780_v9  ;;  %v4353_v7 = vld [vmem:[#allocation10 + $0x780] sm:$0xff] }
 0x53b   :  { %5760 = vmatprep.subr.bf16.mxu0 %v7787_v10  ;;  %5842 = vmatprep.subr.bf16.mxu1 %v7789_v11  ;;  %v4357_v9 = vld [vmem:[#allocation10 + $0x7a0] sm:$0xff]  ;;  %v4354_v10 = vld [vmem:[#allocation10 + $0x788] sm:$0xff] }
 0x53c   :  { %v4358_v11 = vld [vmem:[#allocation10 + $0x7a8] sm:$0xff]  ;;  %v7843_v20 = vcombine.high %v4353_v7, %v4357_v9  ;;  %v7842_v33 = vcombine.low %v4353_v7, %v4357_v9  ;;  %v4143_v7 = vld [vmem:[#allocation10 + $0xf0] sm:$0xff]  ;;  %v4140_v9 = vld [vmem:[#allocation10 + $0xd8] sm:$0xff] }
 0x53d   :  { %v7845_v21 = vcombine.high %v4354_v10, %v4358_v11  ;;  %v7844_v34 = vcombine.low %v4354_v10, %v4358_v11  ;;  %v4144_v10 = vld [vmem:[#allocation10 + $0xf8] sm:$0xff] }
 0x53e   :  { %5761 = vmatpush1.bf16.msra.mxu0 %v7786_v24  ;;  %5843 = vmatpush1.bf16.msra.mxu1 %v7788_v25  ;;  %v4361_v24 = vld [vmem:[#allocation10 + $0x7c0] sm:$0xff] }
 0x53f   :  { %5762 = vmatprep.subr.bf16.mxu0 %v7795_v29  ;;  %5844 = vmatprep.subr.bf16.mxu1 %v7797_v30  ;;  %v4365_v25 = vld [vmem:[#allocation10 + $0x7e0] sm:$0xff]  ;;  %v4362_v29 = vld [vmem:[#allocation10 + $0x7c8] sm:$0xff] }
 0x540   :  { %v4366_v30 = vld [vmem:[#allocation10 + $0x7e8] sm:$0xff] }
 0x541   :  { %v7852_v41 = vcombine.low %v4362_v29, %v4366_v30 }
 0x542   :  { %5763 = vmatpush1.bf16.msra.mxu0 %v7794_v36  ;;  %5845 = vmatpush1.bf16.msra.mxu1 %v7796_v37  ;;  %v7851_v36 = vcombine.high %v4361_v24, %v4365_v25  ;;  %v7853_v37 = vcombine.high %v4362_v29, %v4366_v30  ;;  %v7632_v30 = vcombine.low %v4140_v9, %v4144_v10 }
 0x543   :  { %5764 = vmatprep.subr.bf16.mxu0 %v7803_v38  ;;  %5846 = vmatprep.subr.bf16.mxu1 %v7805_v39  ;;  %v4115_v38 = vld [vmem:[#allocation10 + $0x10] sm:$0xff] }
 0x544   :  { %v7607_v43 = vcombine.high %v4115_v38, %v4119_v40  ;;  %v7606_v8 = vcombine.low %v4115_v38, %v4119_v40 }
 0x546   :  { %5765 = vmatpush1.bf16.msra.mxu0 %v7802_v19  ;;  %5847 = vmatpush1.bf16.msra.mxu1 %v7804_v22 }
 0x547   :  { %5766 = vmatprep.subr.bf16.mxu0 %v7811_v27  ;;  %5848 = vmatprep.subr.bf16.mxu1 %v7813_v28  ;;  %v7850_v28 = vcombine.low %v4361_v24, %v4365_v25  ;;  %v4151_v24 = vld [vmem:[#allocation10 + $0x130] sm:$0xff]  ;;  %v4152_v25 = vld [vmem:[#allocation10 + $0x138] sm:$0xff] }
 0x54a   :  { %5767 = vmatpush1.bf16.msra.mxu0 %v7810_v46  ;;  %5849 = vmatpush1.bf16.msra.mxu1 %v7812_v47  ;;  %v4123_v47 = vld [vmem:[#allocation10 + $0x50] sm:$0xff] }
 0x54b   :  { %5768 = vmatprep.subr.bf16.mxu0 %v7819_v49  ;;  %5850 = vmatprep.subr.bf16.mxu1 %v7821_v50  ;;  %v4127_v49 = vld [vmem:[#allocation10 + $0x70] sm:$0xff]  ;;  %v4124_v50 = vld [vmem:[#allocation10 + $0x58] sm:$0xff] }
 0x54c   :  { %v7614_v2 = vcombine.low %v4123_v47, %v4127_v49 }
 0x54e   :  { %5769 = vmatpush1.bf16.msra.mxu0 %v7818_v58  ;;  %5851 = vmatpush1.bf16.msra.mxu1 %v7820_v59  ;;  %v7608_v58 = vcombine.low %v4116_v35, %v4120_v16  ;;  %v7615_v59 = vcombine.high %v4123_v47, %v4127_v49  ;;  %v4163_v16 = vld [vmem:[#allocation10 + $0x190] sm:$0xff] }
 0x54f   :  { %5770 = vmatprep.subr.bf16.mxu0 %v7827_v60  ;;  %5852 = vmatprep.subr.bf16.mxu1 %v7829_v61  ;;  %v7617_v60 = vcombine.high %v4124_v50, %v4128_v52  ;;  %v4131_v61 = vld [vmem:[#allocation10 + $0x90] sm:$0xff] }
 0x550   :  { %v7622_v11 = vcombine.low %v4131_v61, %v4135_v63 }
 0x552   :  { %5771 = vmatpush1.bf16.msra.mxu0 %v7826_v3  ;;  %5853 = vmatpush1.bf16.msra.mxu1 %v7828_v5  ;;  %v7616_v3 = vcombine.low %v4124_v50, %v4128_v52  ;;  %v7623_v5 = vcombine.high %v4131_v61, %v4135_v63 }
 0x553   :  { %5772 = vmatprep.subr.bf16.mxu0 %v7835_v55  ;;  %5854 = vmatprep.subr.bf16.mxu1 %v7837_v6  ;;  %v7625_v55 = vcombine.high %v4132_v18, %v4136_v0  ;;  %v4139_v6 = vld [vmem:[#allocation10 + $0xd0] sm:$0xff] }
 0x554   :  { %v7630_v29 = vcombine.low %v4139_v6, %v4143_v7 }
 0x556   :  { %5773 = vmatpush1.bf16.msra.mxu0 %v7834_v12  ;;  %5855 = vmatpush1.bf16.msra.mxu1 %v7836_v13  ;;  %v7624_v12 = vcombine.low %v4132_v18, %v4136_v0  ;;  %v7631_v13 = vcombine.high %v4139_v6, %v4143_v7 }
 0x557   :  { %5774 = vmatprep.subr.bf16.mxu0 %v7843_v20  ;;  %5856 = vmatprep.subr.bf16.mxu1 %v7845_v21  ;;  %v7633_v20 = vcombine.high %v4140_v9, %v4144_v10  ;;  %v4147_v21 = vld [vmem:[#allocation10 + $0x110] sm:$0xff] }
 0x558   :  { %v4082_v39 = vpop.f32.mrb[24].mxu1  ;;  %v7638_v38 = vcombine.low %v4147_v21, %v4151_v24 }
 0x559   :  { %v4083_v17 = vadd.f32 %v4082_v39, %v3671_v31  ;;  %v4084_v19 = vpop.f32.mrb[25].mxu1  ;;  %v7639_v31 = vcombine.high %v4147_v21, %v4151_v24 }
 0x55a   :  { %v4085_v22 = vadd.f32 %v4084_v19, %v3675_v32  ;;  %v4086_v27 = vpop.f32.mrb[26].mxu1  ;;  %5775 = vmatpush1.bf16.msra.mxu0 %v7842_v33  ;;  %5857 = vmatpush1.bf16.msra.mxu1 %v7844_v34  ;;  %v4155_v33 = vld [vmem:[#allocation10 + $0x150] sm:$0xff]  ;;  %v4164_v19 = vld [vmem:[#allocation10 + $0x198] sm:$0xff] }
 0x55b   :  { %v4091_v62 = vmax.f32 %v4083_v17, 0.0  ;;  %v4087_v42 = vpop.f32.mrb[27].mxu1  ;;  %5776 = vmatprep.subr.bf16.mxu0 %v7851_v36  ;;  %5858 = vmatprep.subr.bf16.mxu1 %v7853_v37  ;;  %v4159_v34 = vld [vmem:[#allocation10 + $0x170] sm:$0xff]  ;;  %v4156_v36 = vld [vmem:[#allocation10 + $0x158] sm:$0xff] }
 0x55c   :  { %v4092_v46 = vmax.f32 %v4085_v22, 0.0  ;;  %v4160_v37 = vld [vmem:[#allocation10 + $0x178] sm:$0xff]  ;;  %v7647_v40 = vcombine.high %v4155_v33, %v4159_v34  ;;  %v4167_v17 = vld [vmem:[#allocation10 + $0x1b0] sm:$0xff]  ;;  %v7646_v27 = vcombine.low %v4155_v33, %v4159_v34 }
 0x55d   :  { %v9346_v57 = vpack.c.bf16 %v4091_v62, %v4091_v62  ;;  %v7649_v35 = vcombine.high %v4156_v36, %v4160_v37  ;;  %v4168_v22 = vld [vmem:[#allocation10 + $0x1b8] sm:$0xff]  ;;  %v4171_v42 = vld [vmem:[#allocation10 + $0x1d0] sm:$0xff]  ;;  %v7654_v47 = vcombine.low %v4163_v16, %v4167_v17 }
 0x55e   :  { %v9344_v53 = vpack.c.bf16 %v4092_v46, %v4092_v46  ;;  %5777 = vmatpush1.bf16.msra.mxu0 %v7850_v28  ;;  %5859 = vmatpush1.bf16.msra.mxu1 %v7852_v41  ;;  %v7648_v28 = vcombine.low %v4156_v36, %v4160_v37  ;;  %v7655_v41 = vcombine.high %v4163_v16, %v4167_v17  ;;  %v4176_v46 = vld [vmem:[#allocation10 + $0x1f8] sm:$0xff] }
 0x55f   :  { %5869 = vmatprep.subr.bf16.mxu0 %v7607_v43  ;;  %5951 = vmatprep.subr.bf16.mxu1 %v7609_v44  ;;  %v7657_v62 = vcombine.high %v4164_v19, %v4168_v22  ;;  %v4175_v43 = vld [vmem:[#allocation10 + $0x1f0] sm:$0xff]  ;;  %v4172_v44 = vld [vmem:[#allocation10 + $0x1d8] sm:$0xff]  ;;  %v7656_v49 = vcombine.low %v4164_v19, %v4168_v22 }
 0x560   :  { %5778 = vmatprep.mubr.bf16.mxu0 %v9344_v53  ;;  %5860 = vmatprep.mubr.bf16.mxu1 %v9344_v53  ;;  %v7663_v50 = vcombine.high %v4171_v42, %v4175_v43  ;;  %v7665_v52 = vcombine.high %v4172_v44, %v4176_v46  ;;  %v7662_v61 = vcombine.low %v4171_v42, %v4175_v43 }
 0x561   :  { %5779 = vmatmul.mubr.bf16.vlgmr.msra.gmra.mrb[8].mxu0 %v9346_v57  ;;  %5861 = vmatmul.mubr.bf16.vlgmr.msra.gmra.mrb[28].mxu1 %v9346_v57  ;;  %v7664_v63 = vcombine.low %v4172_v44, %v4176_v46 }
 0x562   :  { %5870 = vmatpush1.bf16.msra.mxu0 %v7606_v8  ;;  %5901 = vmatprep.mubr.bf16.mxu0 %v9326_v14  ;;  %v4179_v8 = vld [vmem:[#allocation10 + $0x210] sm:$0xff] }
 0x563   :  { %5952 = vmatpush1.bf16.msra.mxu1 %v7608_v58  ;;  %5983 = vmatprep.mubr.bf16.mxu1 %v9326_v14  ;;  %v4148_v14 = vld [vmem:[#allocation10 + $0x118] sm:$0xff]  ;;  %v4183_v58 = vld [vmem:[#allocation10 + $0x230] sm:$0xff] }
 0x564   :  { %5871 = vmatprep.subr.bf16.mxu0 %v7615_v59  ;;  %5953 = vmatprep.subr.bf16.mxu1 %v7617_v60  ;;  %v7641_v32 = vcombine.high %v4148_v14, %v4152_v25  ;;  %v7640_v39 = vcombine.low %v4148_v14, %v4152_v25  ;;  %v4180_v59 = vld [vmem:[#allocation10 + $0x218] sm:$0xff]  ;;  %v7671_v18 = vcombine.high %v4179_v8, %v4183_v58 }
 0x565   :  { %v4184_v60 = vld [vmem:[#allocation10 + $0x238] sm:$0xff]  ;;  %v7670_v6 = vcombine.low %v4179_v8, %v4183_v58 }
 0x566   :  { %5872 = vmatpush1.bf16.msra.mxu0 %v7614_v2  ;;  %v7673_v0 = vcombine.high %v4180_v59, %v4184_v60  ;;  %v4187_v2 = vld [vmem:[#allocation10 + $0x250] sm:$0xff]  ;;  %v7672_v7 = vcombine.low %v4180_v59, %v4184_v60 }
 0x567   :  { %5954 = vmatpush1.bf16.msra.mxu1 %v7616_v3  ;;  %5873 = vmatprep.subr.bf16.mxu0 %v7623_v5  ;;  %v4191_v3 = vld [vmem:[#allocation10 + $0x270] sm:$0xff]  ;;  %v4188_v5 = vld [vmem:[#allocation10 + $0x258] sm:$0xff] }
 0x568   :  { %5955 = vmatprep.subr.bf16.mxu1 %v7625_v55  ;;  %v4192_v55 = vld [vmem:[#allocation10 + $0x278] sm:$0xff]  ;;  %v7679_v9 = vcombine.high %v4187_v2, %v4191_v3  ;;  %v7678_v21 = vcombine.low %v4187_v2, %v4191_v3 }
 0x569   :  { %v7681_v10 = vcombine.high %v4188_v5, %v4192_v55  ;;  %v7680_v24 = vcombine.low %v4188_v5, %v4192_v55 }
 0x56a   :  { %5874 = vmatpush1.bf16.msra.mxu0 %v7622_v11  ;;  %v4195_v11 = vld [vmem:[#allocation10 + $0x290] sm:$0xff] }
 0x56b   :  { %5956 = vmatpush1.bf16.msra.mxu1 %v7624_v12  ;;  %5875 = vmatprep.subr.bf16.mxu0 %v7631_v13  ;;  %v4199_v12 = vld [vmem:[#allocation10 + $0x2b0] sm:$0xff]  ;;  %v4196_v13 = vld [vmem:[#allocation10 + $0x298] sm:$0xff] }
 0x56c   :  { %5957 = vmatprep.subr.bf16.mxu1 %v7633_v20  ;;  %v4200_v20 = vld [vmem:[#allocation10 + $0x2b8] sm:$0xff]  ;;  %v7687_v14 = vcombine.high %v4195_v11, %v4199_v12  ;;  %v7686_v33 = vcombine.low %v4195_v11, %v4199_v12 }
 0x56d   :  { %v7689_v25 = vcombine.high %v4196_v13, %v4200_v20  ;;  %v7688_v34 = vcombine.low %v4196_v13, %v4200_v20 }
 0x56e   :  { %5876 = vmatpush1.bf16.msra.mxu0 %v7630_v29  ;;  %v4203_v29 = vld [vmem:[#allocation10 + $0x2d0] sm:$0xff] }
 0x56f   :  { %5958 = vmatpush1.bf16.msra.mxu1 %v7632_v30  ;;  %5877 = vmatprep.subr.bf16.mxu0 %v7639_v31  ;;  %v4207_v30 = vld [vmem:[#allocation10 + $0x2f0] sm:$0xff]  ;;  %v4204_v31 = vld [vmem:[#allocation10 + $0x2d8] sm:$0xff] }
 0x570   :  { %5959 = vmatprep.subr.bf16.mxu1 %v7641_v32  ;;  %v4208_v32 = vld [vmem:[#allocation10 + $0x2f8] sm:$0xff]  ;;  %v7695_v36 = vcombine.high %v4203_v29, %v4207_v30  ;;  %v7694_v16 = vcombine.low %v4203_v29, %v4207_v30 }
 0x571   :  { %v7697_v37 = vcombine.high %v4204_v31, %v4208_v32  ;;  %v7696_v17 = vcombine.low %v4204_v31, %v4208_v32  ;;  %v4256_v29 = vld [vmem:[#allocation10 + $0x478] sm:$0xff]  ;;  %v4259_v32 = vld [vmem:[#allocation10 + $0x490] sm:$0xff] }
 0x572   :  { %5878 = vmatpush1.bf16.msra.mxu0 %v7638_v38  ;;  %v4211_v38 = vld [vmem:[#allocation10 + $0x310] sm:$0xff] }
 0x573   :  { %5960 = vmatpush1.bf16.msra.mxu1 %v7640_v39  ;;  %5879 = vmatprep.subr.bf16.mxu0 %v7647_v40  ;;  %v4215_v39 = vld [vmem:[#allocation10 + $0x330] sm:$0xff]  ;;  %v4212_v40 = vld [vmem:[#allocation10 + $0x318] sm:$0xff] }
 0x574   :  { %5961 = vmatprep.subr.bf16.mxu1 %v7649_v35  ;;  %v4216_v35 = vld [vmem:[#allocation10 + $0x338] sm:$0xff]  ;;  %v7703_v19 = vcombine.high %v4211_v38, %v4215_v39  ;;  %v7702_v42 = vcombine.low %v4211_v38, %v4215_v39 }
 0x575   :  { %v7705_v22 = vcombine.high %v4212_v40, %v4216_v35  ;;  %v7704_v43 = vcombine.low %v4212_v40, %v4216_v35 }
 0x576   :  { %5880 = vmatpush1.bf16.msra.mxu0 %v7646_v27  ;;  %v4219_v27 = vld [vmem:[#allocation10 + $0x350] sm:$0xff] }
 0x577   :  { %5962 = vmatpush1.bf16.msra.mxu1 %v7648_v28  ;;  %5881 = vmatprep.subr.bf16.mxu0 %v7655_v41  ;;  %v4223_v28 = vld [vmem:[#allocation10 + $0x370] sm:$0xff]  ;;  %v4220_v41 = vld [vmem:[#allocation10 + $0x358] sm:$0xff] }
 0x578   :  { %5963 = vmatprep.subr.bf16.mxu1 %v7657_v62  ;;  %v4224_v62 = vld [vmem:[#allocation10 + $0x378] sm:$0xff]  ;;  %v7711_v44 = vcombine.high %v4219_v27, %v4223_v28  ;;  %v7710_v8 = vcombine.low %v4219_v27, %v4223_v28 }
 0x579   :  { %v7713_v46 = vcombine.high %v4220_v41, %v4224_v62  ;;  %v7712_v58 = vcombine.low %v4220_v41, %v4224_v62  ;;  %v4275_v62 = vld [vmem:[#allocation10 + $0x510] sm:$0xff] }
 0x57a   :  { %5882 = vmatpush1.bf16.msra.mxu0 %v7654_v47  ;;  %v4227_v47 = vld [vmem:[#allocation10 + $0x390] sm:$0xff] }
 0x57b   :  { %5964 = vmatpush1.bf16.msra.mxu1 %v7656_v49  ;;  %5883 = vmatprep.subr.bf16.mxu0 %v7663_v50  ;;  %v4231_v49 = vld [vmem:[#allocation10 + $0x3b0] sm:$0xff]  ;;  %v4228_v50 = vld [vmem:[#allocation10 + $0x398] sm:$0xff] }
 0x57c   :  { %5965 = vmatprep.subr.bf16.mxu1 %v7665_v52  ;;  %v4232_v52 = vld [vmem:[#allocation10 + $0x3b8] sm:$0xff]  ;;  %v7719_v59 = vcombine.high %v4227_v47, %v4231_v49  ;;  %v7718_v2 = vcombine.low %v4227_v47, %v4231_v49 }
 0x57d   :  { %v7721_v60 = vcombine.high %v4228_v50, %v4232_v52  ;;  %v7720_v3 = vcombine.low %v4228_v50, %v4232_v52  ;;  %v4283_v50 = vld [vmem:[#allocation10 + $0x550] sm:$0xff] }
 0x57e   :  { %5884 = vmatpush1.bf16.msra.mxu0 %v7662_v61  ;;  %v4235_v61 = vld [vmem:[#allocation10 + $0x3d0] sm:$0xff] }
 0x57f   :  { %5966 = vmatpush1.bf16.msra.mxu1 %v7664_v63  ;;  %5885 = vmatprep.subr.bf16.mxu0 %v7671_v18  ;;  %v4239_v63 = vld [vmem:[#allocation10 + $0x3f0] sm:$0xff]  ;;  %v4236_v18 = vld [vmem:[#allocation10 + $0x3d8] sm:$0xff] }
 0x580   :  { %5967 = vmatprep.subr.bf16.mxu1 %v7673_v0  ;;  %v4240_v0 = vld [vmem:[#allocation10 + $0x3f8] sm:$0xff]  ;;  %v7727_v5 = vcombine.high %v4235_v61, %v4239_v63  ;;  %v7726_v11 = vcombine.low %v4235_v61, %v4239_v63  ;;  %v4287_v52 = vld [vmem:[#allocation10 + $0x570] sm:$0xff] }
 0x581   :  { %v7729_v55 = vcombine.high %v4236_v18, %v4240_v0  ;;  %v7728_v12 = vcombine.low %v4236_v18, %v4240_v0  ;;  %v7775_v61 = vcombine.high %v4283_v50, %v4287_v52  ;;  %v4291_v18 = vld [vmem:[#allocation10 + $0x590] sm:$0xff] }
 0x582   :  { %5886 = vmatpush1.bf16.msra.mxu0 %v7670_v6  ;;  %v4243_v6 = vld [vmem:[#allocation10 + $0x410] sm:$0xff] }
 0x583   :  { %5968 = vmatpush1.bf16.msra.mxu1 %v7672_v7  ;;  %5887 = vmatprep.subr.bf16.mxu0 %v7679_v9  ;;  %v4247_v7 = vld [vmem:[#allocation10 + $0x430] sm:$0xff]  ;;  %v4244_v9 = vld [vmem:[#allocation10 + $0x418] sm:$0xff] }
 0x584   :  { %5969 = vmatprep.subr.bf16.mxu1 %v7681_v10  ;;  %v4248_v10 = vld [vmem:[#allocation10 + $0x438] sm:$0xff]  ;;  %v7735_v13 = vcombine.high %v4243_v6, %v4247_v7  ;;  %v4295_v0 = vld [vmem:[#allocation10 + $0x5b0] sm:$0xff] }
 0x585   :  { %v7737_v20 = vcombine.high %v4244_v9, %v4248_v10  ;;  %v7736_v30 = vcombine.low %v4244_v9, %v4248_v10  ;;  %v4299_v9 = vld [vmem:[#allocation10 + $0x5d0] sm:$0xff] }
 0x586   :  { %5888 = vmatpush1.bf16.msra.mxu0 %v7678_v21  ;;  %v4251_v21 = vld [vmem:[#allocation10 + $0x450] sm:$0xff] }
 0x587   :  { %5970 = vmatpush1.bf16.msra.mxu1 %v7680_v24  ;;  %5889 = vmatprep.subr.bf16.mxu0 %v7687_v14  ;;  %v4255_v24 = vld [vmem:[#allocation10 + $0x470] sm:$0xff]  ;;  %v7734_v14 = vcombine.low %v4243_v6, %v4247_v7  ;;  %v7783_v6 = vcombine.high %v4291_v18, %v4295_v0 }
 0x588   :  { %5971 = vmatprep.subr.bf16.mxu1 %v7689_v25  ;;  %v4252_v25 = vld [vmem:[#allocation10 + $0x458] sm:$0xff]  ;;  %v7743_v31 = vcombine.high %v4251_v21, %v4255_v24  ;;  %v7742_v38 = vcombine.low %v4251_v21, %v4255_v24  ;;  %v4303_v10 = vld [vmem:[#allocation10 + $0x5f0] sm:$0xff] }
 0x589   :  { %v7744_v39 = vcombine.low %v4252_v25, %v4256_v29  ;;  %v7791_v21 = vcombine.high %v4299_v9, %v4303_v10 }
 0x58a   :  { %5890 = vmatpush1.bf16.msra.mxu0 %v7686_v33  ;;  %v4263_v33 = vld [vmem:[#allocation10 + $0x4b0] sm:$0xff] }
 0x58b   :  { %5972 = vmatpush1.bf16.msra.mxu1 %v7688_v34  ;;  %5891 = vmatprep.subr.bf16.mxu0 %v7695_v36  ;;  %v7745_v34 = vcombine.high %v4252_v25, %v4256_v29  ;;  %v4260_v36 = vld [vmem:[#allocation10 + $0x498] sm:$0xff]  ;;  %v7751_v40 = vcombine.high %v4259_v32, %v4263_v33  ;;  %v7750_v27 = vcombine.low %v4259_v32, %v4263_v33  ;;  %v4311_v25 = vld [vmem:[#allocation10 + $0x630] sm:$0xff] }
 0x58c   :  { %5973 = vmatprep.subr.bf16.mxu1 %v7697_v37  ;;  %v4264_v37 = vld [vmem:[#allocation10 + $0x4b8] sm:$0xff] }
 0x58d   :  { %v7753_v35 = vcombine.high %v4260_v36, %v4264_v37  ;;  %v4308_v29 = vld [vmem:[#allocation10 + $0x618] sm:$0xff] }
 0x58e   :  { %5892 = vmatpush1.bf16.msra.mxu0 %v7694_v16  ;;  %v4267_v16 = vld [vmem:[#allocation10 + $0x4d0] sm:$0xff] }
 0x58f   :  { %5974 = vmatpush1.bf16.msra.mxu1 %v7696_v17  ;;  %5893 = vmatprep.subr.bf16.mxu0 %v7703_v19  ;;  %v4271_v17 = vld [vmem:[#allocation10 + $0x4f0] sm:$0xff]  ;;  %v4268_v19 = vld [vmem:[#allocation10 + $0x4d8] sm:$0xff] }
 0x590   :  { %5975 = vmatprep.subr.bf16.mxu1 %v7705_v22  ;;  %v4272_v22 = vld [vmem:[#allocation10 + $0x4f8] sm:$0xff]  ;;  %v7759_v28 = vcombine.high %v4267_v16, %v4271_v17 }
 0x591   :  { %v7761_v41 = vcombine.high %v4268_v19, %v4272_v22 }
 0x592   :  { %5894 = vmatpush1.bf16.msra.mxu0 %v7702_v42  ;;  %v4279_v42 = vld [vmem:[#allocation10 + $0x530] sm:$0xff] }
 0x593   :  { %5976 = vmatpush1.bf16.msra.mxu1 %v7704_v43  ;;  %5895 = vmatprep.subr.bf16.mxu0 %v7711_v44  ;;  %v4276_v43 = vld [vmem:[#allocation10 + $0x518] sm:$0xff]  ;;  %v7767_v47 = vcombine.high %v4275_v62, %v4279_v42 }
 0x594   :  { %5977 = vmatprep.subr.bf16.mxu1 %v7713_v46  ;;  %v4280_v44 = vld [vmem:[#allocation10 + $0x538] sm:$0xff]  ;;  %v7760_v46 = vcombine.low %v4268_v19, %v4272_v22  ;;  %v4323_v19 = vld [vmem:[#allocation10 + $0x690] sm:$0xff] }
 0x595   :  { %v7769_v49 = vcombine.high %v4276_v43, %v4280_v44  ;;  %v4327_v22 = vld [vmem:[#allocation10 + $0x6b0] sm:$0xff] }
 0x596   :  { %5896 = vmatpush1.bf16.msra.mxu0 %v7710_v8  ;;  %v4284_v8 = vld [vmem:[#allocation10 + $0x558] sm:$0xff] }
 0x597   :  { %5978 = vmatpush1.bf16.msra.mxu1 %v7712_v58  ;;  %5897 = vmatprep.subr.bf16.mxu0 %v7719_v59  ;;  %v4288_v58 = vld [vmem:[#allocation10 + $0x578] sm:$0xff]  ;;  %v7766_v59 = vcombine.low %v4275_v62, %v4279_v42  ;;  %v7815_v62 = vcombine.high %v4323_v19, %v4327_v22 }
 0x598   :  { %5979 = vmatprep.subr.bf16.mxu1 %v7721_v60  ;;  %v7768_v60 = vcombine.low %v4276_v43, %v4280_v44  ;;  %v7777_v63 = vcombine.high %v4284_v8, %v4288_v58  ;;  %v4331_v43 = vld [vmem:[#allocation10 + $0x6d0] sm:$0xff] }
 0x599   :  { %v4335_v44 = vld [vmem:[#allocation10 + $0x6f0] sm:$0xff] }
 0x59a   :  { %5898 = vmatpush1.bf16.msra.mxu0 %v7718_v2  ;;  %v4292_v2 = vld [vmem:[#allocation10 + $0x598] sm:$0xff] }
 0x59b   :  { %5980 = vmatpush1.bf16.msra.mxu1 %v7720_v3  ;;  %5899 = vmatprep.subr.bf16.mxu0 %v7727_v5  ;;  %v4296_v3 = vld [vmem:[#allocation10 + $0x5b8] sm:$0xff]  ;;  %v7774_v5 = vcombine.low %v4283_v50, %v4287_v52  ;;  %v7823_v50 = vcombine.high %v4331_v43, %v4335_v44 }
 0x59c   :  { %5981 = vmatprep.subr.bf16.mxu1 %v7729_v55  ;;  %v7776_v55 = vcombine.low %v4284_v8, %v4288_v58  ;;  %v7785_v7 = vcombine.high %v4292_v2, %v4296_v3  ;;  %v4339_v8 = vld [vmem:[#allocation10 + $0x710] sm:$0xff] }
 0x59d   :  { %v4343_v58 = vld [vmem:[#allocation10 + $0x730] sm:$0xff] }
 0x59e   :  { %5900 = vmatpush1.bf16.msra.mxu0 %v7726_v11  ;;  %v4300_v11 = vld [vmem:[#allocation10 + $0x5d8] sm:$0xff] }
 0x59f   :  { %5982 = vmatpush1.bf16.msra.mxu1 %v7728_v12  ;;  %5910 = vmatprep.subr.bf16.mxu0 %v7735_v13  ;;  %v4304_v12 = vld [vmem:[#allocation10 + $0x5f8] sm:$0xff]  ;;  %v7782_v13 = vcombine.low %v4291_v18, %v4295_v0  ;;  %v7831_v18 = vcombine.high %v4339_v8, %v4343_v58 }
 0x5a0   :  { %5992 = vmatprep.subr.bf16.mxu1 %v7737_v20  ;;  %v7784_v20 = vcombine.low %v4292_v2, %v4296_v3  ;;  %v7793_v24 = vcombine.high %v4300_v11, %v4304_v12  ;;  %v7792_v32 = vcombine.low %v4300_v11, %v4304_v12  ;;  %v4347_v2 = vld [vmem:[#allocation10 + $0x750] sm:$0xff] }
 0x5a1   :  { %5902 = vmatmul.mubr.bf16.vlgmr.msra.gmra.mrb[12].mxu0 %v9328_v15  ;;  %v4351_v3 = vld [vmem:[#allocation10 + $0x770] sm:$0xff] }
 0x5a2   :  { %5984 = vmatmul.mubr.bf16.vlgmr.msra.gmra.mrb[32].mxu1 %v9328_v15  ;;  %5911 = vmatpush1.bf16.msra.mxu0 %v7734_v14  ;;  %v7752_v15 = vcombine.low %v4260_v36, %v4264_v37  ;;  %v4307_v14 = vld [vmem:[#allocation10 + $0x610] sm:$0xff] }
 0x5a3   :  { %5942 = vmatprep.mubr.bf16.mxu0 %v9344_v53  ;;  %5993 = vmatpush1.bf16.msra.mxu1 %v7736_v30  ;;  %v4312_v30 = vld [vmem:[#allocation10 + $0x638] sm:$0xff]  ;;  %v7799_v33 = vcombine.high %v4307_v14, %v4311_v25  ;;  %v4315_v36 = vld [vmem:[#allocation10 + $0x650] sm:$0xff] }
 0x5a4   :  { %6024 = vmatprep.mubr.bf16.mxu1 %v9344_v53  ;;  %5912 = vmatprep.subr.bf16.mxu0 %v7743_v31  ;;  %v7758_v53 = vcombine.low %v4267_v16, %v4271_v17  ;;  %v7790_v31 = vcombine.low %v4299_v9, %v4303_v10  ;;  %v4319_v37 = vld [vmem:[#allocation10 + $0x670] sm:$0xff]  ;;  %v7839_v9 = vcombine.high %v4347_v2, %v4351_v3 }
 0x5a5   :  { %5994 = vmatprep.subr.bf16.mxu1 %v7745_v34  ;;  %v7801_v34 = vcombine.high %v4308_v29, %v4312_v30  ;;  %v7807_v16 = vcombine.high %v4315_v36, %v4319_v37  ;;  %v4355_v11 = vld [vmem:[#allocation10 + $0x790] sm:$0xff] }
 0x5a6   :  { %5913 = vmatpush1.bf16.msra.mxu0 %v7742_v38  ;;  %v4316_v38 = vld [vmem:[#allocation10 + $0x658] sm:$0xff]  ;;  %v4359_v12 = vld [vmem:[#allocation10 + $0x7b0] sm:$0xff] }
 0x5a7   :  { %5995 = vmatpush1.bf16.msra.mxu1 %v7744_v39  ;;  %5914 = vmatprep.subr.bf16.mxu0 %v7751_v40  ;;  %v4320_v39 = vld [vmem:[#allocation10 + $0x678] sm:$0xff]  ;;  %v7798_v40 = vcombine.low %v4307_v14, %v4311_v25  ;;  %v7847_v14 = vcombine.high %v4355_v11, %v4359_v12 }
 0x5a8   :  { %5996 = vmatprep.subr.bf16.mxu1 %v7753_v35  ;;  %v7800_v35 = vcombine.low %v4308_v29, %v4312_v30  ;;  %v7809_v17 = vcombine.high %v4316_v38, %v4320_v39  ;;  %v4363_v29 = vld [vmem:[#allocation10 + $0x7d0] sm:$0xff] }
 0x5a9   :  { %v4367_v30 = vld [vmem:[#allocation10 + $0x7f0] sm:$0xff] }
 0x5aa   :  { %5915 = vmatpush1.bf16.msra.mxu0 %v7750_v27  ;;  %v4324_v27 = vld [vmem:[#allocation10 + $0x698] sm:$0xff] }
 0x5ab   :  { %5997 = vmatpush1.bf16.msra.mxu1 %v7752_v15  ;;  %5916 = vmatprep.subr.bf16.mxu0 %v7759_v28  ;;  %v4328_v15 = vld [vmem:[#allocation10 + $0x6b8] sm:$0xff]  ;;  %v7806_v28 = vcombine.low %v4315_v36, %v4319_v37  ;;  %v7855_v36 = vcombine.high %v4363_v29, %v4367_v30 }
 0x5ac   :  { %5998 = vmatprep.subr.bf16.mxu1 %v7761_v41  ;;  %v7808_v41 = vcombine.low %v4316_v38, %v4320_v39  ;;  %v7817_v42 = vcombine.high %v4324_v27, %v4328_v15  ;;  %v7854_v38 = vcombine.low %v4363_v29, %v4367_v30 }
 0x5ae   :  { %5917 = vmatpush1.bf16.msra.mxu0 %v7758_v53  ;;  %v4332_v53 = vld [vmem:[#allocation10 + $0x6d8] sm:$0xff] }
 0x5af   :  { %5999 = vmatpush1.bf16.msra.mxu1 %v7760_v46  ;;  %5918 = vmatprep.subr.bf16.mxu0 %v7767_v47  ;;  %v4336_v46 = vld [vmem:[#allocation10 + $0x6f8] sm:$0xff]  ;;  %v7814_v47 = vcombine.low %v4323_v19, %v4327_v22  ;;  %v8705_v19 = vld [vmem:[#allocation11 + $0x24] ss:$8 sps:$4 sm:$0xff]   ;;  %v8703_v22 = vld [vmem:[#allocation11 + $0x20] ss:$8 sps:$4 sm:$0xff]  }
 0x5b0   :  { %6000 = vmatprep.subr.bf16.mxu1 %v7769_v49  ;;  %v7816_v49 = vcombine.low %v4324_v27, %v4328_v15  ;;  %v7825_v52 = vcombine.high %v4332_v53, %v4336_v46  ;;  %v8708_v27 = vld [vmem:[#allocation11 + $0x34] ss:$8 sps:$4 sm:$0xff]   ;;  %v8706_v15 = vld [vmem:[#allocation11 + $0x30] ss:$8 sps:$4 sm:$0xff]  }
 0x5b2   :  { %5919 = vmatpush1.bf16.msra.mxu0 %v7766_v59  ;;  %v4340_v59 = vld [vmem:[#allocation10 + $0x718] sm:$0xff] }
 0x5b3   :  { %6001 = vmatpush1.bf16.msra.mxu1 %v7768_v60  ;;  %5920 = vmatprep.subr.bf16.mxu0 %v7775_v61  ;;  %v4344_v60 = vld [vmem:[#allocation10 + $0x738] sm:$0xff]  ;;  %v7822_v61 = vcombine.low %v4331_v43, %v4335_v44  ;;  %v8715_v43 = vld [vmem:[#allocation11 + $0x60] ss:$8 sps:$4 sm:$0xff]  }
 0x5b4   :  { %6002 = vmatprep.subr.bf16.mxu1 %v7777_v63  ;;  %v7824_v63 = vcombine.low %v4332_v53, %v4336_v46  ;;  %v7833_v0 = vcombine.high %v4340_v59, %v4344_v60  ;;  %v8720_v44 = vld [vmem:[#allocation11 + $0x74] ss:$8 sps:$4 sm:$0xff]   ;;  %v8718_v53 = vld [vmem:[#allocation11 + $0x70] ss:$8 sps:$4 sm:$0xff]   ;;  %v8723_v46 = vld [vmem:[#allocation11 + $0x84] ss:$8 sps:$4 sm:$0xff]  }
 0x5b6   :  { %5921 = vmatpush1.bf16.msra.mxu0 %v7774_v5  ;;  %v4348_v5 = vld [vmem:[#allocation10 + $0x758] sm:$0xff] }
 0x5b7   :  { %6003 = vmatpush1.bf16.msra.mxu1 %v7776_v55  ;;  %5922 = vmatprep.subr.bf16.mxu0 %v7783_v6  ;;  %v4352_v55 = vld [vmem:[#allocation10 + $0x778] sm:$0xff]  ;;  %v7830_v6 = vcombine.low %v4339_v8, %v4343_v58  ;;  %v8727_v8 = vld [vmem:[#allocation11 + $0xa0] ss:$8 sps:$4 sm:$0xff]  }
 0x5b8   :  { %6004 = vmatprep.subr.bf16.mxu1 %v7785_v7  ;;  %v7832_v7 = vcombine.low %v4340_v59, %v4344_v60  ;;  %v7841_v10 = vcombine.high %v4348_v5, %v4352_v55  ;;  %v8732_v58 = vld [vmem:[#allocation11 + $0xb4] ss:$8 sps:$4 sm:$0xff]   ;;  %v8730_v59 = vld [vmem:[#allocation11 + $0xb0] ss:$8 sps:$4 sm:$0xff]   ;;  %v8735_v60 = vld [vmem:[#allocation11 + $0xc4] ss:$8 sps:$4 sm:$0xff]  }
 0x5ba   :  { %5923 = vmatpush1.bf16.msra.mxu0 %v7782_v13  ;;  %v4356_v13 = vld [vmem:[#allocation10 + $0x798] sm:$0xff] }
 0x5bb   :  { %6005 = vmatpush1.bf16.msra.mxu1 %v7784_v20  ;;  %5924 = vmatprep.subr.bf16.mxu0 %v7791_v21  ;;  %v4360_v20 = vld [vmem:[#allocation10 + $0x7b8] sm:$0xff]  ;;  %v7838_v21 = vcombine.low %v4347_v2, %v4351_v3  ;;  %v8739_v2 = vld [vmem:[#allocation11 + $0xe0] ss:$8 sps:$4 sm:$0xff]  }
 0x5bc   :  { %6006 = vmatprep.subr.bf16.mxu1 %v7793_v24  ;;  %v7840_v24 = vcombine.low %v4348_v5, %v4352_v55  ;;  %v7849_v25 = vcombine.high %v4356_v13, %v4360_v20  ;;  %v8744_v3 = vld [vmem:[#allocation11 + $0xf4] ss:$8 sps:$4 sm:$0xff]   ;;  %v8742_v5 = vld [vmem:[#allocation11 + $0xf0] ss:$8 sps:$4 sm:$0xff]   ;;  %v8747_v55 = vld [vmem:[#allocation11 + $0x104] ss:$8 sps:$4 sm:$0xff]  }
 0x5be   :  { %5925 = vmatpush1.bf16.msra.mxu0 %v7790_v31  ;;  %v4364_v31 = vld [vmem:[#allocation10 + $0x7d8] sm:$0xff] }
 0x5bf   :  { %6007 = vmatpush1.bf16.msra.mxu1 %v7792_v32  ;;  %5926 = vmatprep.subr.bf16.mxu0 %v7799_v33  ;;  %v4368_v32 = vld [vmem:[#allocation10 + $0x7f8] sm:$0xff]  ;;  %v7846_v33 = vcombine.low %v4355_v11, %v4359_v12 }
 0x5c0   :  { %6008 = vmatprep.subr.bf16.mxu1 %v7801_v34  ;;  %v7848_v34 = vcombine.low %v4356_v13, %v4360_v20  ;;  %v7857_v37 = vcombine.high %v4364_v31, %v4368_v32  ;;  %v7856_v39 = vcombine.low %v4364_v31, %v4368_v32 }
 0x5c2   :  { %5927 = vmatpush1.bf16.msra.mxu0 %v7798_v40  ;;  %v8699_v40 = vld [vmem:[#allocation11 + $0x4] ss:$8 sps:$4 sm:$0xff]  }
 0x5c3   :  { %6009 = vmatpush1.bf16.msra.mxu1 %v7800_v35  ;;  %5928 = vmatprep.subr.bf16.mxu0 %v7807_v16  ;;  %v8697_v35 = vld [vmem:[#allocation11] ss:$8 sps:$4 sm:$0xff]   ;;  %v8702_v16 = vld [vmem:[#allocation11 + $0x14] ss:$8 sps:$4 sm:$0xff]  }
 0x5c4   :  { %6010 = vmatprep.subr.bf16.mxu1 %v7809_v17  ;;  %v8700_v17 = vld [vmem:[#allocation11 + $0x10] ss:$8 sps:$4 sm:$0xff]  }
 0x5c6   :  { %5929 = vmatpush1.bf16.msra.mxu0 %v7806_v28  ;;  %v8711_v28 = vld [vmem:[#allocation11 + $0x44] ss:$8 sps:$4 sm:$0xff]  }
 0x5c7   :  { %6011 = vmatpush1.bf16.msra.mxu1 %v7808_v41  ;;  %5930 = vmatprep.subr.bf16.mxu0 %v7815_v62  ;;  %v8709_v41 = vld [vmem:[#allocation11 + $0x40] ss:$8 sps:$4 sm:$0xff]   ;;  %v8714_v62 = vld [vmem:[#allocation11 + $0x54] ss:$8 sps:$4 sm:$0xff]  }
 0x5c8   :  { %6012 = vmatprep.subr.bf16.mxu1 %v7817_v42  ;;  %v8712_v42 = vld [vmem:[#allocation11 + $0x50] ss:$8 sps:$4 sm:$0xff]  }
 0x5ca   :  { %5931 = vmatpush1.bf16.msra.mxu0 %v7814_v47  ;;  %v8721_v47 = vld [vmem:[#allocation11 + $0x80] ss:$8 sps:$4 sm:$0xff]  }
 0x5cb   :  { %6013 = vmatpush1.bf16.msra.mxu1 %v7816_v49  ;;  %5932 = vmatprep.subr.bf16.mxu0 %v7823_v50  ;;  %v8726_v49 = vld [vmem:[#allocation11 + $0x94] ss:$8 sps:$4 sm:$0xff]   ;;  %v8724_v50 = vld [vmem:[#allocation11 + $0x90] ss:$8 sps:$4 sm:$0xff]  }
 0x5cc   :  { %6014 = vmatprep.subr.bf16.mxu1 %v7825_v52  ;;  %v8729_v52 = vld [vmem:[#allocation11 + $0xa4] ss:$8 sps:$4 sm:$0xff]  }
 0x5ce   :  { %5933 = vmatpush1.bf16.msra.mxu0 %v7822_v61  ;;  %v8733_v61 = vld [vmem:[#allocation11 + $0xc0] ss:$8 sps:$4 sm:$0xff]  }
 0x5cf   :  { %6015 = vmatpush1.bf16.msra.mxu1 %v7824_v63  ;;  %5934 = vmatprep.subr.bf16.mxu0 %v7831_v18  ;;  %v8738_v63 = vld [vmem:[#allocation11 + $0xd4] ss:$8 sps:$4 sm:$0xff]   ;;  %v8736_v18 = vld [vmem:[#allocation11 + $0xd0] ss:$8 sps:$4 sm:$0xff]  }
 0x5d0   :  { %6016 = vmatprep.subr.bf16.mxu1 %v7833_v0  ;;  %v8741_v0 = vld [vmem:[#allocation11 + $0xe4] ss:$8 sps:$4 sm:$0xff]  }
 0x5d2   :  { %5935 = vmatpush1.bf16.msra.mxu0 %v7830_v6  ;;  %v9363_v6 = vld [vmem:[%s9413_s11] sm:$0xff] }
 0x5d3   :  { %6017 = vmatpush1.bf16.msra.mxu1 %v7832_v7  ;;  %5936 = vmatprep.subr.bf16.mxu0 %v7839_v9  ;;  %v4374_v7 = vrot.slane %v9363_v6, %v9223_v54  ;;  %v4378_v9 = vrot.slane %v9363_v6, %v9231_v56 }
 0x5d4   :  { %6018 = vmatprep.subr.bf16.mxu1 %v7841_v10  ;;  %v4386_v10 = vrot.slane %v9363_v6, %v9245_v4 }
 0x5d6   :  { %5937 = vmatpush1.bf16.msra.mxu0 %v7838_v21 }
 0x5d7   :  { %6019 = vmatpush1.bf16.msra.mxu1 %v7840_v24  ;;  %5938 = vmatprep.subr.bf16.mxu0 %v7847_v14 }
 0x5d8   :  { %6020 = vmatprep.subr.bf16.mxu1 %v7849_v25 }
 0x5da   :  { %5939 = vmatpush1.bf16.msra.mxu0 %v7846_v33 }
 0x5db   :  { %6021 = vmatpush1.bf16.msra.mxu1 %v7848_v34  ;;  %5940 = vmatprep.subr.bf16.mxu0 %v7855_v36 }
 0x5dc   :  { %6022 = vmatprep.subr.bf16.mxu1 %v7857_v37  ;;  %v8745_v37 = vld [vmem:[#allocation11 + $0x100] ss:$8 sps:$4 sm:$0xff]  }
 0x5de   :  { %5941 = vmatpush1.bf16.msra.mxu0 %v7854_v38 }
 0x5df   :  { %6023 = vmatpush1.bf16.msra.mxu1 %v7856_v39  ;;  %6889 = vmatprep.subr.bf16.mxu0 %v8699_v40  ;;  %v8750_v39 = vld [vmem:[#allocation11 + $0x114] ss:$8 sps:$4 sm:$0xff]   ;;  %v8748_v40 = vld [vmem:[#allocation11 + $0x110] ss:$8 sps:$4 sm:$0xff]  }
 0x5e1   :  { %5943 = vmatmul.mubr.bf16.vlgmr.msra.gmra.mrb[12].mxu0 %v9346_v57 }
 0x5e2   :  { %6025 = vmatmul.mubr.bf16.vlgmr.msra.gmra.mrb[32].mxu1 %v9346_v57  ;;  %6890 = vmatpush1.bf16.msra.mxu0 %v8697_v35  ;;  %v8717_v57 = vld [vmem:[#allocation11 + $0x64] ss:$8 sps:$4 sm:$0xff]  }
 0x5e3   :  { %6891 = vmatprep.subr.bf16.mxu0 %v8702_v16  ;;  %v8753_v35 = vld [vmem:[#allocation11 + $0x124] ss:$8 sps:$4 sm:$0xff]   ;;  %v8751_v16 = vld [vmem:[#allocation11 + $0x120] ss:$8 sps:$4 sm:$0xff]  }
 0x5e6   :  { %6892 = vmatpush1.bf16.msra.mxu0 %v8700_v17  ;;  %v8756_v17 = vld [vmem:[#allocation11 + $0x134] ss:$8 sps:$4 sm:$0xff]  }
 0x5e7   :  { %6893 = vmatprep.subr.bf16.mxu0 %v8705_v19  ;;  %v8754_v19 = vld [vmem:[#allocation11 + $0x130] ss:$8 sps:$4 sm:$0xff]  }
 0x5ea   :  { %6894 = vmatpush1.bf16.msra.mxu0 %v8703_v22  ;;  %v8759_v22 = vld [vmem:[#allocation11 + $0x144] ss:$8 sps:$4 sm:$0xff]  }
 0x5eb   :  { %6895 = vmatprep.subr.bf16.mxu0 %v8708_v27  ;;  %v8757_v27 = vld [vmem:[#allocation11 + $0x140] ss:$8 sps:$4 sm:$0xff]  }
 0x5ee   :  { %6896 = vmatpush1.bf16.msra.mxu0 %v8706_v15  ;;  %v8762_v15 = vld [vmem:[#allocation11 + $0x154] ss:$8 sps:$4 sm:$0xff]  }
 0x5ef   :  { %6897 = vmatprep.subr.bf16.mxu0 %v8711_v28  ;;  %v8760_v28 = vld [vmem:[#allocation11 + $0x150] ss:$8 sps:$4 sm:$0xff]  }
 0x5f2   :  { %6898 = vmatpush1.bf16.msra.mxu0 %v8709_v41  ;;  %v8765_v41 = vld [vmem:[#allocation11 + $0x164] ss:$8 sps:$4 sm:$0xff]  }
 0x5f3   :  { %6899 = vmatprep.subr.bf16.mxu0 %v8714_v62  ;;  %v8763_v62 = vld [vmem:[#allocation11 + $0x160] ss:$8 sps:$4 sm:$0xff]  }
 0x5f6   :  { %6900 = vmatpush1.bf16.msra.mxu0 %v8712_v42  ;;  %v8768_v42 = vld [vmem:[#allocation11 + $0x174] ss:$8 sps:$4 sm:$0xff]  }
 0x5f7   :  { %6901 = vmatprep.subr.bf16.mxu0 %v8717_v57  ;;  %v8766_v57 = vld [vmem:[#allocation11 + $0x170] ss:$8 sps:$4 sm:$0xff]  }
 0x5fa   :  { %6902 = vmatpush1.bf16.msra.mxu0 %v8715_v43  ;;  %v8771_v43 = vld [vmem:[#allocation11 + $0x184] ss:$8 sps:$4 sm:$0xff]  }
 0x5fb   :  { %6903 = vmatprep.subr.bf16.mxu0 %v8720_v44  ;;  %v8769_v44 = vld [vmem:[#allocation11 + $0x180] ss:$8 sps:$4 sm:$0xff]  }
 0x5fe   :  { %6904 = vmatpush1.bf16.msra.mxu0 %v8718_v53  ;;  %v8774_v53 = vld [vmem:[#allocation11 + $0x194] ss:$8 sps:$4 sm:$0xff]  }
 0x5ff   :  { %6905 = vmatprep.subr.bf16.mxu0 %v8723_v46  ;;  %v8772_v46 = vld [vmem:[#allocation11 + $0x190] ss:$8 sps:$4 sm:$0xff]  }
 0x602   :  { %6906 = vmatpush1.bf16.msra.mxu0 %v8721_v47  ;;  %v8777_v47 = vld [vmem:[#allocation11 + $0x1a4] ss:$8 sps:$4 sm:$0xff]  }
 0x603   :  { %6907 = vmatprep.subr.bf16.mxu0 %v8726_v49  ;;  %v8775_v49 = vld [vmem:[#allocation11 + $0x1a0] ss:$8 sps:$4 sm:$0xff]  }
 0x606   :  { %6908 = vmatpush1.bf16.msra.mxu0 %v8724_v50  ;;  %v8780_v50 = vld [vmem:[#allocation11 + $0x1b4] ss:$8 sps:$4 sm:$0xff]  }
 0x607   :  { %6909 = vmatprep.subr.bf16.mxu0 %v8729_v52  ;;  %v8778_v52 = vld [vmem:[#allocation11 + $0x1b0] ss:$8 sps:$4 sm:$0xff]  }
 0x60a   :  { %6910 = vmatpush1.bf16.msra.mxu0 %v8727_v8  ;;  %v8783_v8 = vld [vmem:[#allocation11 + $0x1c4] ss:$8 sps:$4 sm:$0xff]  }
 0x60b   :  { %6911 = vmatprep.subr.bf16.mxu0 %v8732_v58  ;;  %v8781_v58 = vld [vmem:[#allocation11 + $0x1c0] ss:$8 sps:$4 sm:$0xff]  }
 0x60e   :  { %6912 = vmatpush1.bf16.msra.mxu0 %v8730_v59  ;;  %v8786_v59 = vld [vmem:[#allocation11 + $0x1d4] ss:$8 sps:$4 sm:$0xff]  }
 0x60f   :  { %6913 = vmatprep.subr.bf16.mxu0 %v8735_v60  ;;  %v8784_v60 = vld [vmem:[#allocation11 + $0x1d0] ss:$8 sps:$4 sm:$0xff]  }
 0x612   :  { %6914 = vmatpush1.bf16.msra.mxu0 %v8733_v61  ;;  %v4382_v61 = vrot.slane %v9363_v6, %v9242_v1  ;;  %v8796_v1 = vld [vmem:[#allocation11 + $0x210] ss:$8 sps:$4 sm:$0xff]  }
 0x613   :  { %6915 = vmatprep.subr.bf16.mxu0 %v8738_v63  ;;  %v8789_v63 = vld [vmem:[#allocation11 + $0x1e4] ss:$8 sps:$4 sm:$0xff]  }
 0x616   :  { %6916 = vmatpush1.bf16.msra.mxu0 %v8736_v18  ;;  %v8787_v18 = vld [vmem:[#allocation11 + $0x1e0] ss:$8 sps:$4 sm:$0xff]  }
 0x617   :  { %6917 = vmatprep.subr.bf16.mxu0 %v8741_v0 }
 0x61a   :  { %6918 = vmatpush1.bf16.msra.mxu0 %v8739_v2  ;;  %v8792_v2 = vld [vmem:[#allocation11 + $0x1f4] ss:$8 sps:$4 sm:$0xff]  }
 0x61b   :  { %6919 = vmatprep.subr.bf16.mxu0 %v8744_v3  ;;  %v8790_v3 = vld [vmem:[#allocation11 + $0x1f0] ss:$8 sps:$4 sm:$0xff]  }
 0x61e   :  { %6920 = vmatpush1.bf16.msra.mxu0 %v8742_v5 }
 0x61f   :  { %6930 = vmatprep.subr.bf16.mxu0 %v8747_v55  ;;  %v8795_v55 = vld [vmem:[#allocation11 + $0x204] ss:$8 sps:$4 sm:$0xff]  }
 0x634   :  { %v5780_v11 = vpop.f32.mrb[8].mxu0  ;;  %v9371_v12 = vpop.f32.mrb[28].mxu1 }
 0x635   :  { %v8043_v13 = vadd.f32 %v5780_v11, %v4374_v7  ;;  %v5782_v20 = vpop.f32.mrb[9].mxu0  ;;  %v5864_v21 = vpop.f32.mrb[29].mxu1  ;;  %v8045_v0 = vadd.f32 %v9371_v12, %v4382_v61  ;;  %v8793_v7 = vld [vmem:[#allocation11 + $0x200] ss:$8 sps:$4 sm:$0xff]   ;;  %v8801_v11 = vld [vmem:[#allocation11 + $0x224] ss:$8 sps:$4 sm:$0xff]  }
 0x636   :  { %v8044_v24 = vadd.f32 %v5782_v20, %v4378_v9  ;;  %v8046_v14 = vadd.f32 %v5864_v21, %v4386_v10  ;;  %v5784_v25 = vpop.f32.mrb[10].mxu0  ;;  %v5866_v29 = vpop.f32.mrb[30].mxu1  ;;  %v8798_v10 = vld [vmem:[#allocation11 + $0x214] ss:$8 sps:$4 sm:$0xff]   ;;  %v8802_v20 = vld [vmem:[#allocation11 + $0x230] ss:$8 sps:$4 sm:$0xff]  }
 0x637   :  { %v6033_v30 = vmax.f32 %v8043_v13, 0.0  ;;  %v5785_v31 = vpop.f32.mrb[11].mxu0  ;;  %v5867_v32 = vpop.f32.mrb[31].mxu1  ;;  %v6035_v5 = vmax.f32 %v8045_v0, 0.0  ;;  %v8799_v13 = vld [vmem:[#allocation11 + $0x220] ss:$8 sps:$4 sm:$0xff]  }
 0x638   :  { %v6034_v33 = vmax.f32 %v8044_v24, 0.0  ;;  %v6036_v34 = vmax.f32 %v8046_v14, 0.0  ;;  %v8804_v12 = vld [vmem:[#allocation11 + $0x234] ss:$8 sps:$4 sm:$0xff]   ;;  %v8807_v21 = vld [vmem:[#allocation11 + $0x244] ss:$8 sps:$4 sm:$0xff]  }
 0x639   :  { %v8029_v38 = vpack.c.bf16 %v6033_v30, %v6033_v30  ;;  %v8031_v9 = vpack.c.bf16 %v6035_v5, %v6035_v5  ;;  %v8805_v24 = vld [vmem:[#allocation11 + $0x240] ss:$8 sps:$4 sm:$0xff]   ;;  %v8810_v14 = vld [vmem:[#allocation11 + $0x254] ss:$8 sps:$4 sm:$0xff]   ;;  %v8808_v25 = vld [vmem:[#allocation11 + $0x250] ss:$8 sps:$4 sm:$0xff]  }
 0x63a   :  { %v8030_v36 = vpack.c.bf16 %v6034_v33, %v6034_v33  ;;  %v8032_v4 = vpack.c.bf16 %v6036_v34, %v6036_v34  ;;  %v8813_v29 = vld [vmem:[#allocation11 + $0x264] ss:$8 sps:$4 sm:$0xff]   ;;  %v8811_v30 = vld [vmem:[#allocation11 + $0x260] ss:$8 sps:$4 sm:$0xff]   ;;  %v8816_v31 = vld [vmem:[#allocation11 + $0x274] ss:$8 sps:$4 sm:$0xff]  }
 0x63b   :  { %v8814_v32 = vld [vmem:[#allocation11 + $0x270] ss:$8 sps:$4 sm:$0xff]   ;;  %v8819_v33 = vld [vmem:[#allocation11 + $0x284] ss:$8 sps:$4 sm:$0xff]   ;;  %v8817_v34 = vld [vmem:[#allocation11 + $0x280] ss:$8 sps:$4 sm:$0xff]  }
 0x63c   :  { %6921 = vmatprep.mubr.bf16.mxu0 %v8030_v36  ;;  %v8822_v36 = vld [vmem:[#allocation11 + $0x294] ss:$8 sps:$4 sm:$0xff]   ;;  %v8841_v61 = vld [vmem:[#allocation11 + $0x300] ss:$8 sps:$4 sm:$0xff]  }
 0x63d   :  { %6922 = vmatmul.mubr.bf16.vlgmr.msra.gmra.mrb[16].mxu0 %v8029_v38  ;;  %v8825_v38 = vld [vmem:[#allocation11 + $0x2a4] ss:$8 sps:$4 sm:$0xff]   ;;  %v8847_v5 = vld [vmem:[#allocation11 + $0x320] ss:$8 sps:$4 sm:$0xff]  }
 0x63e   :  { %6931 = vmatpush1.bf16.msra.mxu0 %v8745_v37  ;;  %6962 = vmatprep.mubr.bf16.mxu0 %v8032_v4  ;;  %v8820_v37 = vld [vmem:[#allocation11 + $0x290] ss:$8 sps:$4 sm:$0xff]   ;;  %v8828_v4 = vld [vmem:[#allocation11 + $0x2b4] ss:$8 sps:$4 sm:$0xff]  }
 0x63f   :  { %6932 = vmatprep.subr.bf16.mxu0 %v8750_v39  ;;  %v8823_v39 = vld [vmem:[#allocation11 + $0x2a0] ss:$8 sps:$4 sm:$0xff]  }
 0x642   :  { %6933 = vmatpush1.bf16.msra.mxu0 %v8748_v40  ;;  %v8826_v40 = vld [vmem:[#allocation11 + $0x2b0] ss:$8 sps:$4 sm:$0xff]  }
 0x643   :  { %6934 = vmatprep.subr.bf16.mxu0 %v8753_v35  ;;  %v8831_v35 = vld [vmem:[#allocation11 + $0x2c4] ss:$8 sps:$4 sm:$0xff]  }
 0x646   :  { %6935 = vmatpush1.bf16.msra.mxu0 %v8751_v16  ;;  %v8829_v16 = vld [vmem:[#allocation11 + $0x2c0] ss:$8 sps:$4 sm:$0xff]  }
 0x647   :  { %6936 = vmatprep.subr.bf16.mxu0 %v8756_v17  ;;  %v8834_v17 = vld [vmem:[#allocation11 + $0x2d4] ss:$8 sps:$4 sm:$0xff]  }
 0x64a   :  { %6937 = vmatpush1.bf16.msra.mxu0 %v8754_v19  ;;  %v8832_v19 = vld [vmem:[#allocation11 + $0x2d0] ss:$8 sps:$4 sm:$0xff]  }
 0x64b   :  { %6938 = vmatprep.subr.bf16.mxu0 %v8759_v22  ;;  %v8837_v22 = vld [vmem:[#allocation11 + $0x2e4] ss:$8 sps:$4 sm:$0xff]  }
 0x64e   :  { %6939 = vmatpush1.bf16.msra.mxu0 %v8757_v27  ;;  %v4390_v27 = vrot.slane %v9363_v6, %v278_v23 }
 0x64f   :  { %6940 = vmatprep.subr.bf16.mxu0 %v8762_v15  ;;  %v8835_v15 = vld [vmem:[#allocation11 + $0x2e0] ss:$8 sps:$4 sm:$0xff]  }
 0x652   :  { %6941 = vmatpush1.bf16.msra.mxu0 %v8760_v28  ;;  %v4394_v28 = vrot.slane %v9363_v6, %v282_v26 }
 0x653   :  { %6942 = vmatprep.subr.bf16.mxu0 %v8765_v41  ;;  %v4402_v41 = vrot.slane %v9363_v6, %v290_v48 }
 0x656   :  { %6943 = vmatpush1.bf16.msra.mxu0 %v8763_v62  ;;  %v8840_v62 = vld [vmem:[#allocation11 + $0x2f4] ss:$8 sps:$4 sm:$0xff]  }
 0x657   :  { %6944 = vmatprep.subr.bf16.mxu0 %v8768_v42 }
 0x65a   :  { %6945 = vmatpush1.bf16.msra.mxu0 %v8766_v57 }
 0x65b   :  { %6946 = vmatprep.subr.bf16.mxu0 %v8771_v43 }
 0x65e   :  { %6947 = vmatpush1.bf16.msra.mxu0 %v8769_v44 }
 0x65f   :  { %6948 = vmatprep.subr.bf16.mxu0 %v8774_v53 }
 0x662   :  { %6949 = vmatpush1.bf16.msra.mxu0 %v8772_v46 }
 0x663   :  { %6950 = vmatprep.subr.bf16.mxu0 %v8777_v47  ;;  %v8838_v47 = vld [vmem:[#allocation11 + $0x2f0] ss:$8 sps:$4 sm:$0xff]  }
 0x666   :  { %6951 = vmatpush1.bf16.msra.mxu0 %v8775_v49 }
 0x667   :  { %6952 = vmatprep.subr.bf16.mxu0 %v8780_v50 }
 0x66a   :  { %6953 = vmatpush1.bf16.msra.mxu0 %v8778_v52 }
 0x66b   :  { %6954 = vmatprep.subr.bf16.mxu0 %v8783_v8  ;;  %v8843_v8 = vld [vmem:[#allocation11 + $0x304] ss:$8 sps:$4 sm:$0xff]  }
 0x66e   :  { %6955 = vmatpush1.bf16.msra.mxu0 %v8781_v58 }
 0x66f   :  { %6956 = vmatprep.subr.bf16.mxu0 %v8786_v59 }
 0x672   :  { %6957 = vmatpush1.bf16.msra.mxu0 %v8784_v60 }
 0x673   :  { %6958 = vmatprep.subr.bf16.mxu0 %v8789_v63 }
 0x676   :  { %6959 = vmatpush1.bf16.msra.mxu0 %v8787_v18  ;;  %v8846_v18 = vld [vmem:[#allocation11 + $0x314] ss:$8 sps:$4 sm:$0xff]  }
 0x677   :  { %6960 = vmatprep.subr.bf16.mxu0 %v8792_v2  ;;  %v8844_v2 = vld [vmem:[#allocation11 + $0x310] ss:$8 sps:$4 sm:$0xff]  }
 0x67a   :  { %6961 = vmatpush1.bf16.msra.mxu0 %v8790_v3  ;;  %v8849_v3 = vld [vmem:[#allocation11 + $0x324] ss:$8 sps:$4 sm:$0xff]  }
 0x67b   :  { %6971 = vmatprep.subr.bf16.mxu0 %v8795_v55  ;;  %v8852_v55 = vld [vmem:[#allocation11 + $0x334] ss:$8 sps:$4 sm:$0xff]  }
 0x67d   :  { %6963 = vmatmul.mubr.bf16.vlgmr.msra.gmra.mrb[16].mxu0 %v8031_v9  ;;  %v8855_v9 = vld [vmem:[#allocation11 + $0x344] ss:$8 sps:$4 sm:$0xff]  }
 0x67e   :  { %6972 = vmatpush1.bf16.msra.mxu0 %v8793_v7  ;;  %v8850_v7 = vld [vmem:[#allocation11 + $0x330] ss:$8 sps:$4 sm:$0xff]  }
 0x67f   :  { %6973 = vmatprep.subr.bf16.mxu0 %v8798_v10  ;;  %v8853_v10 = vld [vmem:[#allocation11 + $0x340] ss:$8 sps:$4 sm:$0xff]  }
 0x682   :  { %6974 = vmatpush1.bf16.msra.mxu0 %v8796_v1  ;;  %v8858_v1 = vld [vmem:[#allocation11 + $0x354] ss:$8 sps:$4 sm:$0xff]  }
 0x683   :  { %6975 = vmatprep.subr.bf16.mxu0 %v8801_v11  ;;  %v8856_v11 = vld [vmem:[#allocation11 + $0x350] ss:$8 sps:$4 sm:$0xff]  }
 0x686   :  { %6976 = vmatpush1.bf16.msra.mxu0 %v8799_v13  ;;  %v8861_v13 = vld [vmem:[#allocation11 + $0x364] ss:$8 sps:$4 sm:$0xff]  }
 0x687   :  { %6977 = vmatprep.subr.bf16.mxu0 %v8804_v12  ;;  %v8859_v12 = vld [vmem:[#allocation11 + $0x360] ss:$8 sps:$4 sm:$0xff]  }
 0x68a   :  { %6978 = vmatpush1.bf16.msra.mxu0 %v8802_v20  ;;  %v8864_v20 = vld [vmem:[#allocation11 + $0x374] ss:$8 sps:$4 sm:$0xff]  }
 0x68b   :  { %6979 = vmatprep.subr.bf16.mxu0 %v8807_v21  ;;  %v8862_v21 = vld [vmem:[#allocation11 + $0x370] ss:$8 sps:$4 sm:$0xff]  }
 0x68e   :  { %6980 = vmatpush1.bf16.msra.mxu0 %v8805_v24  ;;  %v8867_v24 = vld [vmem:[#allocation11 + $0x384] ss:$8 sps:$4 sm:$0xff]  }
 0x68f   :  { %6981 = vmatprep.subr.bf16.mxu0 %v8810_v14  ;;  %v8865_v14 = vld [vmem:[#allocation11 + $0x380] ss:$8 sps:$4 sm:$0xff]  }
 0x692   :  { %6982 = vmatpush1.bf16.msra.mxu0 %v8808_v25  ;;  %v8870_v25 = vld [vmem:[#allocation11 + $0x394] ss:$8 sps:$4 sm:$0xff]  }
 0x693   :  { %6983 = vmatprep.subr.bf16.mxu0 %v8813_v29  ;;  %v8868_v29 = vld [vmem:[#allocation11 + $0x390] ss:$8 sps:$4 sm:$0xff]  }
 0x696   :  { %6984 = vmatpush1.bf16.msra.mxu0 %v8811_v30  ;;  %v8873_v30 = vld [vmem:[#allocation11 + $0x3a4] ss:$8 sps:$4 sm:$0xff]  }
 0x697   :  { %6985 = vmatprep.subr.bf16.mxu0 %v8816_v31  ;;  %v8871_v31 = vld [vmem:[#allocation11 + $0x3a0] ss:$8 sps:$4 sm:$0xff]  }
 0x69a   :  { %6986 = vmatpush1.bf16.msra.mxu0 %v8814_v32  ;;  %v8876_v32 = vld [vmem:[#allocation11 + $0x3b4] ss:$8 sps:$4 sm:$0xff]  }
 0x69b   :  { %6987 = vmatprep.subr.bf16.mxu0 %v8819_v33  ;;  %v8874_v33 = vld [vmem:[#allocation11 + $0x3b0] ss:$8 sps:$4 sm:$0xff]  }
 0x69e   :  { %6988 = vmatpush1.bf16.msra.mxu0 %v8817_v34  ;;  %v8879_v34 = vld [vmem:[#allocation11 + $0x3c4] ss:$8 sps:$4 sm:$0xff]  }
 0x69f   :  { %6989 = vmatprep.subr.bf16.mxu0 %v8822_v36  ;;  %v8877_v36 = vld [vmem:[#allocation11 + $0x3c0] ss:$8 sps:$4 sm:$0xff]  }
 0x6a2   :  { %6990 = vmatpush1.bf16.msra.mxu0 %v8820_v37  ;;  %v8882_v37 = vld [vmem:[#allocation11 + $0x3d4] ss:$8 sps:$4 sm:$0xff]  }
 0x6a3   :  { %6991 = vmatprep.subr.bf16.mxu0 %v8825_v38  ;;  %v8880_v38 = vld [vmem:[#allocation11 + $0x3d0] ss:$8 sps:$4 sm:$0xff]  }
 0x6a6   :  { %6992 = vmatpush1.bf16.msra.mxu0 %v8823_v39  ;;  %v4398_v39 = vrot.slane %v9363_v6, %v286_v45  ;;  %v6214_v45 = vrot.slane %v6209_v51, %v9223_v54  ;;  %v6218_v6 = vrot.slane %v6209_v51, %v9231_v56 }
 0x6a7   :  { %6993 = vmatprep.subr.bf16.mxu0 %v8828_v4  ;;  %v8885_v4 = vld [vmem:[#allocation11 + $0x3e4] ss:$8 sps:$4 sm:$0xff]  }
 0x6aa   :  { %6994 = vmatpush1.bf16.msra.mxu0 %v8826_v40  ;;  %v8883_v40 = vld [vmem:[#allocation11 + $0x3e0] ss:$8 sps:$4 sm:$0xff]  }
 0x6ab   :  { %6995 = vmatprep.subr.bf16.mxu0 %v8831_v35 }
 0x6ae   :  { %6996 = vmatpush1.bf16.msra.mxu0 %v8829_v16  ;;  %v8888_v16 = vld [vmem:[#allocation11 + $0x3f4] ss:$8 sps:$4 sm:$0xff]  }
 0x6af   :  { %6997 = vmatprep.subr.bf16.mxu0 %v8834_v17  ;;  %v8886_v17 = vld [vmem:[#allocation11 + $0x3f0] ss:$8 sps:$4 sm:$0xff]  }
 0x6b2   :  { %6998 = vmatpush1.bf16.msra.mxu0 %v8832_v19 }
 0x6b3   :  { %6999 = vmatprep.subr.bf16.mxu0 %v8837_v22 }
 0x6b4   :  { %v5944_v42 = vpop.f32.mrb[12].mxu0 }
 0x6b5   :  { %v8047_v57 = vadd.f32 %v5944_v42, %v4390_v27  ;;  %v9385_v43 = vpop.f32.mrb[32].mxu1  ;;  %v5946_v44 = vpop.f32.mrb[13].mxu0 }
 0x6b6   :  { %v8048_v53 = vadd.f32 %v5946_v44, %v4394_v28  ;;  %v6028_v46 = vpop.f32.mrb[33].mxu1  ;;  %7000 = vmatpush1.bf16.msra.mxu0 %v8835_v15  ;;  %v5948_v23 = vpop.f32.mrb[14].mxu0  ;;  %v8049_v35 = vadd.f32 %v9385_v43, %v4398_v39 }
 0x6b7   :  { %v6037_v49 = vmax.f32 %v8047_v57, 0.0  ;;  %v8050_v50 = vadd.f32 %v6028_v46, %v4402_v41  ;;  %v6030_v52 = vpop.f32.mrb[34].mxu1  ;;  %v5949_v26 = vpop.f32.mrb[15].mxu0  ;;  %7001 = vmatprep.subr.bf16.mxu0 %v8840_v62 }
 0x6b8   :  { %v6038_v58 = vmax.f32 %v8048_v53, 0.0  ;;  %v6031_v59 = vpop.f32.mrb[35].mxu1  ;;  %v6039_v19 = vmax.f32 %v8049_v35, 0.0 }
 0x6b9   :  { %v6040_v48 = vmax.f32 %v8050_v50, 0.0  ;;  %v8033_v63 = vpack.c.bf16 %v6037_v49, %v6037_v49 }
 0x6ba   :  { %v8034_v60 = vpack.c.bf16 %v6038_v58, %v6038_v58  ;;  %7002 = vmatpush1.bf16.msra.mxu0 %v8838_v47  ;;  %v8035_v22 = vpack.c.bf16 %v6039_v19, %v6039_v19 }
 0x6bb   :  { %7012 = vmatprep.subr.bf16.mxu0 %v8843_v8  ;;  %v8036_v0 = vpack.c.bf16 %v6040_v48, %v6040_v48 }
 0x6bc   :  { %7003 = vmatprep.mubr.bf16.mxu0 %v8034_v60 }
 0x6bd   :  { %7004 = vmatmul.mubr.bf16.vlgmr.msra.gmra.mrb[16].mxu0 %v8033_v63 }
 0x6be   :  { %7013 = vmatpush1.bf16.msra.mxu0 %v8841_v61  ;;  %7044 = vmatprep.mubr.bf16.mxu0 %v8036_v0 }
 0x6bf   :  { %7014 = vmatprep.subr.bf16.mxu0 %v8846_v18 }
 0x6c2   :  { %7015 = vmatpush1.bf16.msra.mxu0 %v8844_v2 }
 0x6c3   :  { %7016 = vmatprep.subr.bf16.mxu0 %v8849_v3 }
 0x6c6   :  { %7017 = vmatpush1.bf16.msra.mxu0 %v8847_v5 }
 0x6c7   :  { %7018 = vmatprep.subr.bf16.mxu0 %v8852_v55 }
 0x6ca   :  { %7019 = vmatpush1.bf16.msra.mxu0 %v8850_v7 }
 0x6cb   :  { %7020 = vmatprep.subr.bf16.mxu0 %v8855_v9 }
 0x6ce   :  { %7021 = vmatpush1.bf16.msra.mxu0 %v8853_v10 }
 0x6cf   :  { %7022 = vmatprep.subr.bf16.mxu0 %v8858_v1 }
 0x6d2   :  { %7023 = vmatpush1.bf16.msra.mxu0 %v8856_v11 }
 0x6d3   :  { %7024 = vmatprep.subr.bf16.mxu0 %v8861_v13 }
 0x6d6   :  { %7025 = vmatpush1.bf16.msra.mxu0 %v8859_v12 }
 0x6d7   :  { %7026 = vmatprep.subr.bf16.mxu0 %v8864_v20 }
 0x6da   :  { %7027 = vmatpush1.bf16.msra.mxu0 %v8862_v21 }
 0x6db   :  { %7028 = vmatprep.subr.bf16.mxu0 %v8867_v24 }
 0x6de   :  { %7029 = vmatpush1.bf16.msra.mxu0 %v8865_v14 }
 0x6df   :  { %7030 = vmatprep.subr.bf16.mxu0 %v8870_v25 }
 0x6e2   :  { %7031 = vmatpush1.bf16.msra.mxu0 %v8868_v29 }
 0x6e3   :  { %7032 = vmatprep.subr.bf16.mxu0 %v8873_v30 }
 0x6e6   :  { %7033 = vmatpush1.bf16.msra.mxu0 %v8871_v31 }
 0x6e7   :  { %7034 = vmatprep.subr.bf16.mxu0 %v8876_v32 }
 0x6ea   :  { %7035 = vmatpush1.bf16.msra.mxu0 %v8874_v33 }
 0x6eb   :  { %7036 = vmatprep.subr.bf16.mxu0 %v8879_v34 }
 0x6ee   :  { %7037 = vmatpush1.bf16.msra.mxu0 %v8877_v36 }
 0x6ef   :  { %7038 = vmatprep.subr.bf16.mxu0 %v8882_v37 }
 0x6f2   :  { %7039 = vmatpush1.bf16.msra.mxu0 %v8880_v38 }
 0x6f3   :  { %7040 = vmatprep.subr.bf16.mxu0 %v8885_v4 }
 0x6f6   :  { %7041 = vmatpush1.bf16.msra.mxu0 %v8883_v40 }
 0x6f7   :  { %7042 = vmatprep.subr.bf16.mxu0 %v8888_v16 }
 0x6fa   :  { %7043 = vmatpush1.bf16.msra.mxu0 %v8886_v17 }
 0x6fd   :  { %7045 = vmatmul.mubr.bf16.vlgmr.msra.gmra.mrb[16].mxu0 %v8035_v22 }
 0x7d0   :  { %v7046_v27 = vpop.f32.mrb[16].mxu0 }
 0x7d1   :  { %v8051_v15 = vadd.f32 %v7046_v27, %v6214_v45  ;;  %v7048_v28 = vpop.f32.mrb[17].mxu0 }
 0x7d2   :  { %v8052_v41 = vadd.f32 %v7048_v28, %v6218_v6  ;;  %v7050_v62 = vpop.f32.mrb[18].mxu0 }
 0x7d3   :  { %7053 = vst [vmem:[%s9415_s13] sm:$0xff] %v8051_v15  ;;  %v7051_v42 = vpop.f32.mrb[19].mxu0 }
 0x7d4   :  { %7054 = vst [vmem:[%s9415_s13 + $0x8] sm:$0xff] %v8052_v41 }
 0x7d5   :  { %7059 = vsyncpa [#allocation4], 1 }
 0x7d6   :  { %7060 = vsyncpa [#allocation6], 1 }
 0x7d7   :  { %7061 = vsyncpa [#allocation9], 1 }
 0x7d8   :  { %7062 = vsyncpa [#allocation12], 1 }

</bundles_post_ra>
